<compile_context>
chip_gen: v5e
topology: v5e:2x2
jax: 0.10.0
libtpu: 0.0.40
codegen_flags: <defaults>
</compile_context>

<pallas_src>
import math

import jax
import jax.numpy as jnp
from jax import lax
from jax.experimental import pallas as pl
from jax.experimental.pallas import tpu as pltpu

# ----------------------- small synthetic config -----------------------
BATCH = 2
SEQ = 16
HIDDEN = 64
NUM_HEADS = 4
NUM_KV_HEADS = 2
HEAD_DIM = HIDDEN // NUM_HEADS          # 16
KV_GROUPS = NUM_HEADS // NUM_KV_HEADS   # 2
MLP_MULT = 2                            # attention_GIN_MLP_multiplier
AGG_DIM = 4 * HEAD_DIM                  # mean|max|var|min concatenated = 64
MLP_HID = HEAD_DIM * MLP_MULT           # 32
THRESHOLD = 0.2                         # attention_GIN_MLP_GIN_threshold_value
ROPE_BASE = 10000.0
BIG = 1e30

QD = NUM_HEADS * HEAD_DIM               # 64
KD = NUM_KV_HEADS * HEAD_DIM            # 32
QK = QD + KD                            # 96  (rope'd q|k columns)
PROJ_W = 2 * QK + KD                    # 224 (q|k|v|q_rot|k_rot)
PROJ_PAD = 256                          # zero-pad to full 128-lane tiles


# ----------------------- fused forward kernel -----------------------
def _fused_pna_kernel(x_ref, wall_ref, cos_ref, sin_ref, w1_ref, w2_ref, o_ref):
    f32 = jnp.float32
    S, D, G = SEQ, HEAD_DIM, KV_GROUPS
    GS = G * S

    x = x_ref[...]                                                   # (B*S, HIDDEN)

    # One fused projection: [q*1/sqrt(d) | k | v | rot(q)*1/sqrt(d) | rot(k) | pad]
    proj = jnp.dot(x, wall_ref[...], preferred_element_type=f32)     # (B*S, 256)
    main_qk = proj[:, :QK]                                           # (B*S, 96)
    v_all = proj[:, QK:QK + KD]                                      # (B*S, 32)
    rot = proj[:, QK + KD:QK + KD + QK]                              # (B*S, 96)

    # Fused RoPE: rotate_half already folded into the weights -> single FMA.
    qk = main_qk * cos_ref[...] + rot * sin_ref[...]                 # (B*S, 96)

    # Shared causal mask / column-index helpers.
    row = lax.broadcasted_iota(jnp.int32, (S, S), 0)
    col = lax.broadcasted_iota(jnp.int32, (S, S), 1)
    causal_f = (col <= row).astype(f32)                              # (S, S)
    causal2 = jnp.concatenate([causal_f] * G, axis=0)                # (GS, S)
    colf2 = lax.broadcasted_iota(jnp.int32, (GS, S), 1).astype(f32)  # (GS, S)
    ones_row = jnp.ones((1, D), f32)

    batch_combined = []
    for b in range(BATCH):                    # static unroll over stacked batches
        rb = slice(b * S, (b + 1) * S)
        head_chunks = [None] * NUM_HEADS
        for g in range(NUM_KV_HEADS):         # static unroll: per-KV-head work once
            k_g = qk[rb, QD + g * D:QD + (g + 1) * D]                # (S, D)
            v_g = v_all[rb, g * D:(g + 1) * D]                       # (S, D)
            v2_g = v_g * v_g
            vcat = jnp.concatenate([v_g, v2_g], axis=-1)             # (S, 2D)
            # squared L2 norm of each value row as a (1,S) broadcast row
            # (argmax/argmin of norm == argmax/argmin of norm^2)
            nsq_row = lax.dot_general(ones_row, v2_g, (((1,), (1,)), ((), ())),
                                      preferred_element_type=f32)    # (1, S)

            # Stack this group's query heads along sublanes -> one fat score dot.
            q_stack = jnp.concatenate(
                [qk[rb, (g * G + r) * D:(g * G + r + 1) * D] for r in range(G)],
                axis=0)                                               # (GS, D)
            scores = lax.dot_general(q_stack, k_g, (((1,), (1,)), ((), ())),
                                     preferred_element_type=f32)      # (GS, S)
            # scores already carry 1/sqrt(D) (folded into Wq); ReLU + causal mask.
            A = jnp.maximum(scores, 0.0) * causal2                    # (GS, S)

            deg = jnp.sum(A, axis=-1, keepdims=True)                  # (GS, 1)
            deg_c = jnp.where(deg == 0.0, 1.0, deg)

            # mean and mean-of-squares for both heads in one matmul vs [v | v^2]
            moments = jnp.dot(A, vcat, preferred_element_type=f32) / deg_c
            mean_agg = moments[:, :D]
            var_agg = jnp.maximum(moments[:, D:] - mean_agg * mean_agg, 0.0)

            # max / min neighbour by L2 norm among edges A > threshold
            # (matches the reference: if no edge exceeds the threshold but
            #  deg > 0, the argmax/argmin of an all -inf/+inf row is index 0).
            valid = A > THRESHOLD
            mmax = jnp.where(valid, nsq_row, -BIG)
            mmin = jnp.where(valid, nsq_row, BIG)
            max_val = jnp.max(mmax, axis=-1, keepdims=True)
            max_idx = jnp.min(jnp.where(mmax == max_val, colf2, float(S)),
                              axis=-1, keepdims=True)                 # first-index argmax
            min_val = jnp.min(mmin, axis=-1, keepdims=True)
            min_idx = jnp.min(jnp.where(mmin == min_val, colf2, float(S)),
                              axis=-1, keepdims=True)                 # first-index argmin

            # gather max/min value rows for both heads with one stacked one-hot dot
            onehots = jnp.concatenate([(colf2 == max_idx).astype(f32),
                                       (colf2 == min_idx).astype(f32)], axis=0)  # (2GS, S)
            picks = jnp.dot(onehots, v_g, preferred_element_type=f32)            # (2GS, D)

            v_rep = jnp.concatenate([v_g] * G, axis=0)                # (GS, D)
            no_nb = deg == 0.0
            max_agg = jnp.where(no_nb, v_rep, picks[:GS])
            min_agg = jnp.where(no_nb, v_rep, picks[GS:])

            comb = jnp.concatenate([mean_agg, max_agg, var_agg, min_agg],
                                   axis=-1)                           # (GS, 4D)
            for r in range(G):
                head_chunks[g * G + r] = comb[r * S:(r + 1) * S]      # (S, 4D)

        # lanes ordered per query head h -> matches the block-diag MLP weight
        batch_combined.append(jnp.concatenate(head_chunks, axis=-1))  # (S, 256)

    combined_all = jnp.concatenate(batch_combined, axis=0)            # (B*S, 256)

    # block-diag per-head MLP layer-1 -> SiLU -> layer-2 with o_proj folded in
    h1 = jnp.dot(combined_all, w1_ref[...], preferred_element_type=f32)   # (B*S, 128)
    h1 = h1 * jax.nn.sigmoid(h1)                                          # SiLU (EUP)
    o_ref[...] = jnp.dot(h1, w2_ref[...], preferred_element_type=f32)     # (B*S, 64)


# ----------------------- host-side weight / RoPE prep (tiny, once per call) ---
def rope_cos_sin(seq_len, dim, base=ROPE_BASE):
    inv_freq = 1.0 / (base ** (jnp.arange(0, dim, 2, dtype=jnp.float32) / dim))
    t = jnp.arange(seq_len, dtype=jnp.float32)
    freqs = jnp.outer(t, inv_freq)
    emb = jnp.concatenate([freqs, freqs], axis=-1)                    # (S, D)
    return jnp.cos(emb), jnp.sin(emb)


def _rotate_half_matrix(d):
    # x @ R == rotate_half(x) == concat([-x[d//2:], x[:d//2]])
    half = d // 2
    r = jnp.zeros((d, d), jnp.float32)
    r = r.at[jnp.arange(half) + half, jnp.arange(half)].set(-1.0)
    r = r.at[jnp.arange(half), jnp.arange(half) + half].set(1.0)
    return r


def _block_diag(blocks):
    n = len(blocks)
    r, c = blocks[0].shape
    out = jnp.zeros((n * r, n * c), blocks[0].dtype)
    for i, b in enumerate(blocks):
        out = out.at[i * r:(i + 1) * r, i * c:(i + 1) * c].set(b)
    return out


# ----------------------- full forward -----------------------
@jax.jit
def llama_attention_pna_forward(hidden_states, Wq, Wk, Wv, W1, W2, Wo):
    B, S, Hd = hidden_states.shape
    scale = 1.0 / math.sqrt(HEAD_DIM)

    # Fold 1/sqrt(d) into Wq and rotate_half into the projection weights
    # (block-diagonal +/-1 matrix per head); RoPE is linear so this is exact.
    Rh = _rotate_half_matrix(HEAD_DIM)
    Rq = jnp.kron(jnp.eye(NUM_HEADS, dtype=jnp.float32), Rh)          # (QD, QD)
    Rk = jnp.kron(jnp.eye(NUM_KV_HEADS, dtype=jnp.float32), Rh)       # (KD, KD)
    Wq_s = Wq * scale
    # single fused projection weight: [q | k | v | q_rot | k_rot], padded to 256
    W_all = jnp.concatenate([Wq_s, Wk, Wv, Wq_s @ Rq, Wk @ Rk], axis=1)   # (64, 224)
    W_all = jnp.pad(W_all, ((0, 0), (0, PROJ_PAD - PROJ_W)))              # (64, 256)

    cos, sin = rope_cos_sin(S, HEAD_DIM)
    cos_qk = jnp.concatenate([jnp.tile(cos, (1, NUM_HEADS)),
                              jnp.tile(cos, (1, NUM_KV_HEADS))], axis=1)  # (S, 96)
    sin_qk = jnp.concatenate([jnp.tile(sin, (1, NUM_HEADS)),
                              jnp.tile(sin, (1, NUM_KV_HEADS))], axis=1)  # (S, 96)
    cos_all = jnp.tile(cos_qk, (B, 1))                                    # (B*S, 96)
    sin_all = jnp.tile(sin_qk, (B, 1))                                    # (B*S, 96)

    # block-diagonal per-head MLP layer-1; o_proj folded into layer-2 (exact).
    W1_bd = _block_diag([W1[h] for h in range(NUM_HEADS)])                # (256, 128)
    Wo_h = Wo.reshape(NUM_HEADS, HEAD_DIM, HIDDEN)
    W2_fold = jnp.einsum('hmk,hkd->hmd', W2, Wo_h).reshape(
        NUM_HEADS * MLP_HID, HIDDEN)                                      # (128, 64)

    # stack batches along sublanes: one kernel invocation, no per-step overhead
    x2d = hidden_states.astype(jnp.float32).reshape(B * S, Hd)            # (32, 64)

    out2d = pl.pallas_call(
        _fused_pna_kernel,
        grid=(1,),
        in_specs=[
            pl.BlockSpec(x2d.shape, lambda i: (0, 0)),
            pl.BlockSpec(W_all.shape, lambda i: (0, 0)),
            pl.BlockSpec(cos_all.shape, lambda i: (0, 0)),
            pl.BlockSpec(sin_all.shape, lambda i: (0, 0)),
            pl.BlockSpec(W1_bd.shape, lambda i: (0, 0)),
            pl.BlockSpec(W2_fold.shape, lambda i: (0, 0)),
        ],
        out_specs=pl.BlockSpec((B * S, HIDDEN), lambda i: (0, 0)),
        out_shape=jax.ShapeDtypeStruct((B * S, HIDDEN), jnp.float32),
        compiler_params=pltpu.CompilerParams(
            dimension_semantics=("arbitrary",)),
    )(x2d, W_all, cos_all, sin_all, W1_bd, W2_fold)

    return out2d.reshape(B, S, HIDDEN)


# ----------------------- deterministic params & run -----------------------
def init_params(key):
    ks = jax.random.split(key, 7)

    def lin(k, fan_in, shape):
        return jax.random.normal(k, shape, dtype=jnp.float32) / math.sqrt(fan_in)

    Wq = lin(ks[0], HIDDEN, (HIDDEN, NUM_HEADS * HEAD_DIM))
    Wk = lin(ks[1], HIDDEN, (HIDDEN, NUM_KV_HEADS * HEAD_DIM))
    Wv = lin(ks[2], HIDDEN, (HIDDEN, NUM_KV_HEADS * HEAD_DIM))
    W1 = lin(ks[3], AGG_DIM, (NUM_HEADS, AGG_DIM, MLP_HID))    # per-head MLP layer 1
    W2 = lin(ks[4], MLP_HID, (NUM_HEADS, MLP_HID, HEAD_DIM))   # per-head MLP layer 2
    Wo = lin(ks[5], NUM_HEADS * HEAD_DIM, (NUM_HEADS * HEAD_DIM, HIDDEN))
    return Wq, Wk, Wv, W1, W2, Wo, ks[6]


if __name__ == "__main__":
    key = jax.random.PRNGKey(0)
    Wq, Wk, Wv, W1, W2, Wo, kx = init_params(key)
    hidden_states = jax.random.normal(kx, (BATCH, SEQ, HIDDEN), dtype=jnp.float32)

    out = llama_attention_pna_forward(hidden_states, Wq, Wk, Wv, W1, W2, Wo)
    out = jax.block_until_ready(out)

    assert out.shape == (BATCH, SEQ, HIDDEN)
    assert bool(jnp.all(jnp.isfinite(out)))
    print("KERNEL_OK")
</pallas_src>

<mosaic_0001>
module attributes {stable_mosaic.version = 11 : i64} {
  func.func @_fused_pna_kernel(%arg0: i32, %arg1: memref<32x64xf32, #tpu.memory_space<vmem>>, %arg2: memref<64x256xf32, #tpu.memory_space<vmem>>, %arg3: memref<32x96xf32, #tpu.memory_space<vmem>>, %arg4: memref<32x96xf32, #tpu.memory_space<vmem>>, %arg5: memref<256x128xf32, #tpu.memory_space<vmem>>, %arg6: memref<128x64xf32, #tpu.memory_space<vmem>>, %arg7: memref<32x64xf32, #tpu.memory_space<vmem>>) attributes {dimension_semantics = [#tpu.dimension_semantics<arbitrary>], iteration_bounds = array<i64: 1>, scalar_prefetch = 0 : i64, scratch_operands = 0 : i64, tpu.core_type = #tpu.core_type<tc>, window_params = [{pipeline_mode = #tpu.pipeline_mode<synchronous>, transform_indices = @transform_0, window_bounds = array<i64: 32, 64>}, {pipeline_mode = #tpu.pipeline_mode<synchronous>, transform_indices = @transform_1, window_bounds = array<i64: 64, 256>}, {pipeline_mode = #tpu.pipeline_mode<synchronous>, transform_indices = @transform_2, window_bounds = array<i64: 32, 96>}, {pipeline_mode = #tpu.pipeline_mode<synchronous>, transform_indices = @transform_3, window_bounds = array<i64: 32, 96>}, {pipeline_mode = #tpu.pipeline_mode<synchronous>, transform_indices = @transform_4, window_bounds = array<i64: 256, 128>}, {pipeline_mode = #tpu.pipeline_mode<synchronous>, transform_indices = @transform_5, window_bounds = array<i64: 128, 64>}, {pipeline_mode = #tpu.pipeline_mode<synchronous>, transform_indices = @transform_6, window_bounds = array<i64: 32, 64>}]} {
    %c0 = arith.constant 0 : index
    %c0_0 = arith.constant 0 : index
    %0 = vector.load %arg1[%c0, %c0_0] : memref<32x64xf32, #tpu.memory_space<vmem>>, vector<32x64xf32>
    %c0_1 = arith.constant 0 : index
    %c0_2 = arith.constant 0 : index
    %1 = vector.load %arg2[%c0_1, %c0_2] : memref<64x256xf32, #tpu.memory_space<vmem>>, vector<64x256xf32>
    %cst = arith.constant dense<0.000000e+00> : vector<32x256xf32>
    %2 = tpu.matmul %0, %1, %cst {dimension_numbers = #tpu.dot_dimension_numbers<[1], [0], [0], [1], [0, 0, 1, 1], [], []>} : vector<32x64xf32>, vector<64x256xf32>, vector<32x256xf32> -> vector<32x256xf32>
    %3 = vector.extract_strided_slice %2 {offsets = [0, 0], sizes = [32, 96], strides = [1, 1]} : vector<32x256xf32> to vector<32x96xf32>
    %4 = vector.extract_strided_slice %2 {offsets = [0, 96], sizes = [32, 32], strides = [1, 1]} : vector<32x256xf32> to vector<32x32xf32>
    %5 = vector.extract_strided_slice %2 {offsets = [0, 128], sizes = [32, 96], strides = [1, 1]} : vector<32x256xf32> to vector<32x96xf32>
    %c0_3 = arith.constant 0 : index
    %c0_4 = arith.constant 0 : index
    %6 = vector.load %arg3[%c0_3, %c0_4] : memref<32x96xf32, #tpu.memory_space<vmem>>, vector<32x96xf32>
    %7 = arith.mulf %3, %6 : vector<32x96xf32>
    %c0_5 = arith.constant 0 : index
    %c0_6 = arith.constant 0 : index
    %8 = vector.load %arg4[%c0_5, %c0_6] : memref<32x96xf32, #tpu.memory_space<vmem>>, vector<32x96xf32>
    %9 = arith.mulf %5, %8 : vector<32x96xf32>
    %10 = arith.addf %7, %9 : vector<32x96xf32>
    %11 = tpu.iota {dimensions = array<i32: 0>} : vector<16x16xi32>
    %12 = tpu.iota {dimensions = array<i32: 1>} : vector<16x16xi32>
    %13 = arith.cmpi sle, %12, %11 : vector<16x16xi32>
    %14 = arith.extui %13 : vector<16x16xi1> to vector<16x16xi32>
    %15 = arith.sitofp %14 : vector<16x16xi32> to vector<16x16xf32>
    %16 = tpu.concatenate %15, %15 in 0 : vector<16x16xf32>, vector<16x16xf32> -> vector<32x16xf32>
    %17 = tpu.iota {dimensions = array<i32: 1>} : vector<32x16xi32>
    %18 = arith.sitofp %17 : vector<32x16xi32> to vector<32x16xf32>
    %cst_7 = arith.constant 1.000000e+00 : f32
    %19 = vector.broadcast %cst_7 : f32 to vector<1x16xf32>
    %20 = vector.extract_strided_slice %10 {offsets = [0, 64], sizes = [16, 16], strides = [1, 1]} : vector<32x96xf32> to vector<16x16xf32>
    %21 = vector.extract_strided_slice %4 {offsets = [0, 0], sizes = [16, 16], strides = [1, 1]} : vector<32x32xf32> to vector<16x16xf32>
    %22 = arith.mulf %21, %21 : vector<16x16xf32>
    %23 = tpu.concatenate %21, %22 in 1 : vector<16x16xf32>, vector<16x16xf32> -> vector<16x32xf32>
    %cst_8 = arith.constant dense<0.000000e+00> : vector<1x16xf32>
    %24 = tpu.matmul %19, %22, %cst_8 {dimension_numbers = #tpu.dot_dimension_numbers<[1], [1], [0], [0], [0, 0, 1, 0], [], []>} : vector<1x16xf32>, vector<16x16xf32>, vector<1x16xf32> -> vector<1x16xf32>
    %25 = vector.extract_strided_slice %10 {offsets = [0, 0], sizes = [16, 16], strides = [1, 1]} : vector<32x96xf32> to vector<16x16xf32>
    %26 = vector.extract_strided_slice %10 {offsets = [0, 16], sizes = [16, 16], strides = [1, 1]} : vector<32x96xf32> to vector<16x16xf32>
    %27 = tpu.concatenate %25, %26 in 0 : vector<16x16xf32>, vector<16x16xf32> -> vector<32x16xf32>
    %cst_9 = arith.constant dense<0.000000e+00> : vector<32x16xf32>
    %28 = tpu.matmul %27, %20, %cst_9 {dimension_numbers = #tpu.dot_dimension_numbers<[1], [1], [0], [0], [0, 0, 1, 0], [], []>} : vector<32x16xf32>, vector<16x16xf32>, vector<32x16xf32> -> vector<32x16xf32>
    %cst_10 = arith.constant 0.000000e+00 : f32
    %29 = vector.broadcast %cst_10 : f32 to vector<32x16xf32>
    %30 = arith.maximumf %28, %29 : vector<32x16xf32>
    %31 = arith.mulf %30, %16 : vector<32x16xf32>
    %cst_11 = arith.constant dense<0.000000e+00> : vector<32xf32>
    %32 = vector.multi_reduction <add>, %31, %cst_11 [1] : vector<32x16xf32> to vector<32xf32>
    %33 = vector.shape_cast %32 : vector<32xf32> to vector<32x1xf32>
    %cst_12 = arith.constant 0.000000e+00 : f32
    %34 = vector.broadcast %cst_12 : f32 to vector<32x1xf32>
    %35 = arith.cmpf oeq, %33, %34 : vector<32x1xf32>
    %cst_13 = arith.constant 1.000000e+00 : f32
    %36 = vector.broadcast %cst_13 : f32 to vector<32x1xf32>
    %37 = arith.select %35, %36, %33 : vector<32x1xi1>, vector<32x1xf32>
    %cst_14 = arith.constant dense<0.000000e+00> : vector<32x32xf32>
    %38 = tpu.matmul %31, %23, %cst_14 {dimension_numbers = #tpu.dot_dimension_numbers<[1], [0], [0], [1], [0, 0, 1, 1], [], []>} : vector<32x16xf32>, vector<16x32xf32>, vector<32x32xf32> -> vector<32x32xf32>
    %39 = vector.broadcast %37 : vector<32x1xf32> to vector<32x32xf32>
    %40 = arith.divf %38, %39 : vector<32x32xf32>
    %41 = vector.extract_strided_slice %40 {offsets = [0, 0], sizes = [32, 16], strides = [1, 1]} : vector<32x32xf32> to vector<32x16xf32>
    %42 = vector.extract_strided_slice %40 {offsets = [0, 16], sizes = [32, 16], strides = [1, 1]} : vector<32x32xf32> to vector<32x16xf32>
    %43 = arith.mulf %41, %41 : vector<32x16xf32>
    %44 = arith.subf %42, %43 : vector<32x16xf32>
    %cst_15 = arith.constant 0.000000e+00 : f32
    %45 = vector.broadcast %cst_15 : f32 to vector<32x16xf32>
    %46 = arith.maximumf %44, %45 : vector<32x16xf32>
    %cst_16 = arith.constant 2.000000e-01 : f32
    %47 = vector.broadcast %cst_16 : f32 to vector<32x16xf32>
    %48 = arith.cmpf ogt, %31, %47 : vector<32x16xf32>
    %cst_17 = arith.constant -1.000000e+30 : f32
    %49 = vector.shape_cast %24 : vector<1x16xf32> to vector<1x16xf32>
    %50 = vector.broadcast %49 : vector<1x16xf32> to vector<32x16xf32>
    %51 = vector.broadcast %cst_17 : f32 to vector<32x16xf32>
    %52 = arith.select %48, %50, %51 : vector<32x16xi1>, vector<32x16xf32>
    %cst_18 = arith.constant 1.000000e+30 : f32
    %53 = vector.shape_cast %24 : vector<1x16xf32> to vector<1x16xf32>
    %54 = vector.broadcast %53 : vector<1x16xf32> to vector<32x16xf32>
    %55 = vector.broadcast %cst_18 : f32 to vector<32x16xf32>
    %56 = arith.select %48, %54, %55 : vector<32x16xi1>, vector<32x16xf32>
    %cst_19 = arith.constant dense<0xFF800000> : vector<32xf32>
    %57 = vector.multi_reduction <maximumf>, %52, %cst_19 [1] : vector<32x16xf32> to vector<32xf32>
    %58 = vector.shape_cast %57 : vector<32xf32> to vector<32x1xf32>
    %59 = vector.broadcast %58 : vector<32x1xf32> to vector<32x16xf32>
    %60 = arith.cmpf oeq, %52, %59 : vector<32x16xf32>
    %cst_20 = arith.constant 1.600000e+01 : f32
    %61 = vector.broadcast %cst_20 : f32 to vector<32x16xf32>
    %62 = arith.select %60, %18, %61 : vector<32x16xi1>, vector<32x16xf32>
    %cst_21 = arith.constant dense<0x7F800000> : vector<32xf32>
    %63 = vector.multi_reduction <minimumf>, %62, %cst_21 [1] : vector<32x16xf32> to vector<32xf32>
    %64 = vector.shape_cast %63 : vector<32xf32> to vector<32x1xf32>
    %cst_22 = arith.constant dense<0x7F800000> : vector<32xf32>
    %65 = vector.multi_reduction <minimumf>, %56, %cst_22 [1] : vector<32x16xf32> to vector<32xf32>
    %66 = vector.shape_cast %65 : vector<32xf32> to vector<32x1xf32>
    %67 = vector.broadcast %66 : vector<32x1xf32> to vector<32x16xf32>
    %68 = arith.cmpf oeq, %56, %67 : vector<32x16xf32>
    %cst_23 = arith.constant 1.600000e+01 : f32
    %69 = vector.broadcast %cst_23 : f32 to vector<32x16xf32>
    %70 = arith.select %68, %18, %69 : vector<32x16xi1>, vector<32x16xf32>
    %cst_24 = arith.constant dense<0x7F800000> : vector<32xf32>
    %71 = vector.multi_reduction <minimumf>, %70, %cst_24 [1] : vector<32x16xf32> to vector<32xf32>
    %72 = vector.shape_cast %71 : vector<32xf32> to vector<32x1xf32>
    %73 = vector.broadcast %64 : vector<32x1xf32> to vector<32x16xf32>
    %74 = arith.cmpf oeq, %18, %73 : vector<32x16xf32>
    %75 = arith.extui %74 : vector<32x16xi1> to vector<32x16xi32>
    %76 = arith.sitofp %75 : vector<32x16xi32> to vector<32x16xf32>
    %77 = vector.broadcast %72 : vector<32x1xf32> to vector<32x16xf32>
    %78 = arith.cmpf oeq, %18, %77 : vector<32x16xf32>
    %79 = arith.extui %78 : vector<32x16xi1> to vector<32x16xi32>
    %80 = arith.sitofp %79 : vector<32x16xi32> to vector<32x16xf32>
    %81 = tpu.concatenate %76, %80 in 0 : vector<32x16xf32>, vector<32x16xf32> -> vector<64x16xf32>
    %cst_25 = arith.constant dense<0.000000e+00> : vector<64x16xf32>
    %82 = tpu.matmul %81, %21, %cst_25 {dimension_numbers = #tpu.dot_dimension_numbers<[1], [0], [0], [1], [0, 0, 1, 1], [], []>} : vector<64x16xf32>, vector<16x16xf32>, vector<64x16xf32> -> vector<64x16xf32>
    %83 = tpu.concatenate %21, %21 in 0 : vector<16x16xf32>, vector<16x16xf32> -> vector<32x16xf32>
    %cst_26 = arith.constant 0.000000e+00 : f32
    %84 = vector.broadcast %cst_26 : f32 to vector<32x1xf32>
    %85 = arith.cmpf oeq, %33, %84 : vector<32x1xf32>
    %86 = vector.extract_strided_slice %82 {offsets = [0, 0], sizes = [32, 16], strides = [1, 1]} : vector<64x16xf32> to vector<32x16xf32>
    %87 = vector.shape_cast %85 : vector<32x1xi1> to vector<32x1xi1>
    %88 = vector.broadcast %87 : vector<32x1xi1> to vector<32x16xi1>
    %89 = arith.select %88, %83, %86 : vector<32x16xi1>, vector<32x16xf32>
    %90 = vector.extract_strided_slice %82 {offsets = [32, 0], sizes = [32, 16], strides = [1, 1]} : vector<64x16xf32> to vector<32x16xf32>
    %91 = vector.shape_cast %85 : vector<32x1xi1> to vector<32x1xi1>
    %92 = vector.broadcast %91 : vector<32x1xi1> to vector<32x16xi1>
    %93 = arith.select %92, %83, %90 : vector<32x16xi1>, vector<32x16xf32>
    %94 = tpu.concatenate %41, %89, %46, %93 in 1 : vector<32x16xf32>, vector<32x16xf32>, vector<32x16xf32>, vector<32x16xf32> -> vector<32x64xf32>
    %95 = vector.extract_strided_slice %94 {offsets = [0, 0], sizes = [16, 64], strides = [1, 1]} : vector<32x64xf32> to vector<16x64xf32>
    %96 = vector.extract_strided_slice %94 {offsets = [16, 0], sizes = [16, 64], strides = [1, 1]} : vector<32x64xf32> to vector<16x64xf32>
    %97 = vector.extract_strided_slice %10 {offsets = [0, 80], sizes = [16, 16], strides = [1, 1]} : vector<32x96xf32> to vector<16x16xf32>
    %98 = vector.extract_strided_slice %4 {offsets = [0, 16], sizes = [16, 16], strides = [1, 1]} : vector<32x32xf32> to vector<16x16xf32>
    %99 = arith.mulf %98, %98 : vector<16x16xf32>
    %100 = tpu.concatenate %98, %99 in 1 : vector<16x16xf32>, vector<16x16xf32> -> vector<16x32xf32>
    %cst_27 = arith.constant dense<0.000000e+00> : vector<1x16xf32>
    %101 = tpu.matmul %19, %99, %cst_27 {dimension_numbers = #tpu.dot_dimension_numbers<[1], [1], [0], [0], [0, 0, 1, 0], [], []>} : vector<1x16xf32>, vector<16x16xf32>, vector<1x16xf32> -> vector<1x16xf32>
    %102 = vector.extract_strided_slice %10 {offsets = [0, 32], sizes = [16, 16], strides = [1, 1]} : vector<32x96xf32> to vector<16x16xf32>
    %103 = vector.extract_strided_slice %10 {offsets = [0, 48], sizes = [16, 16], strides = [1, 1]} : vector<32x96xf32> to vector<16x16xf32>
    %104 = tpu.concatenate %102, %103 in 0 : vector<16x16xf32>, vector<16x16xf32> -> vector<32x16xf32>
    %cst_28 = arith.constant dense<0.000000e+00> : vector<32x16xf32>
    %105 = tpu.matmul %104, %97, %cst_28 {dimension_numbers = #tpu.dot_dimension_numbers<[1], [1], [0], [0], [0, 0, 1, 0], [], []>} : vector<32x16xf32>, vector<16x16xf32>, vector<32x16xf32> -> vector<32x16xf32>
    %cst_29 = arith.constant 0.000000e+00 : f32
    %106 = vector.broadcast %cst_29 : f32 to vector<32x16xf32>
    %107 = arith.maximumf %105, %106 : vector<32x16xf32>
    %108 = arith.mulf %107, %16 : vector<32x16xf32>
    %cst_30 = arith.constant dense<0.000000e+00> : vector<32xf32>
    %109 = vector.multi_reduction <add>, %108, %cst_30 [1] : vector<32x16xf32> to vector<32xf32>
    %110 = vector.shape_cast %109 : vector<32xf32> to vector<32x1xf32>
    %cst_31 = arith.constant 0.000000e+00 : f32
    %111 = vector.broadcast %cst_31 : f32 to vector<32x1xf32>
    %112 = arith.cmpf oeq, %110, %111 : vector<32x1xf32>
    %cst_32 = arith.constant 1.000000e+00 : f32
    %113 = vector.broadcast %cst_32 : f32 to vector<32x1xf32>
    %114 = arith.select %112, %113, %110 : vector<32x1xi1>, vector<32x1xf32>
    %cst_33 = arith.constant dense<0.000000e+00> : vector<32x32xf32>
    %115 = tpu.matmul %108, %100, %cst_33 {dimension_numbers = #tpu.dot_dimension_numbers<[1], [0], [0], [1], [0, 0, 1, 1], [], []>} : vector<32x16xf32>, vector<16x32xf32>, vector<32x32xf32> -> vector<32x32xf32>
    %116 = vector.broadcast %114 : vector<32x1xf32> to vector<32x32xf32>
    %117 = arith.divf %115, %116 : vector<32x32xf32>
    %118 = vector.extract_strided_slice %117 {offsets = [0, 0], sizes = [32, 16], strides = [1, 1]} : vector<32x32xf32> to vector<32x16xf32>
    %119 = vector.extract_strided_slice %117 {offsets = [0, 16], sizes = [32, 16], strides = [1, 1]} : vector<32x32xf32> to vector<32x16xf32>
    %120 = arith.mulf %118, %118 : vector<32x16xf32>
    %121 = arith.subf %119, %120 : vector<32x16xf32>
    %cst_34 = arith.constant 0.000000e+00 : f32
    %122 = vector.broadcast %cst_34 : f32 to vector<32x16xf32>
    %123 = arith.maximumf %121, %122 : vector<32x16xf32>
    %cst_35 = arith.constant 2.000000e-01 : f32
    %124 = vector.broadcast %cst_35 : f32 to vector<32x16xf32>
    %125 = arith.cmpf ogt, %108, %124 : vector<32x16xf32>
    %cst_36 = arith.constant -1.000000e+30 : f32
    %126 = vector.shape_cast %101 : vector<1x16xf32> to vector<1x16xf32>
    %127 = vector.broadcast %126 : vector<1x16xf32> to vector<32x16xf32>
    %128 = vector.broadcast %cst_36 : f32 to vector<32x16xf32>
    %129 = arith.select %125, %127, %128 : vector<32x16xi1>, vector<32x16xf32>
    %cst_37 = arith.constant 1.000000e+30 : f32
    %130 = vector.shape_cast %101 : vector<1x16xf32> to vector<1x16xf32>
    %131 = vector.broadcast %130 : vector<1x16xf32> to vector<32x16xf32>
    %132 = vector.broadcast %cst_37 : f32 to vector<32x16xf32>
    %133 = arith.select %125, %131, %132 : vector<32x16xi1>, vector<32x16xf32>
    %cst_38 = arith.constant dense<0xFF800000> : vector<32xf32>
    %134 = vector.multi_reduction <maximumf>, %129, %cst_38 [1] : vector<32x16xf32> to vector<32xf32>
    %135 = vector.shape_cast %134 : vector<32xf32> to vector<32x1xf32>
    %136 = vector.broadcast %135 : vector<32x1xf32> to vector<32x16xf32>
    %137 = arith.cmpf oeq, %129, %136 : vector<32x16xf32>
    %cst_39 = arith.constant 1.600000e+01 : f32
    %138 = vector.broadcast %cst_39 : f32 to vector<32x16xf32>
    %139 = arith.select %137, %18, %138 : vector<32x16xi1>, vector<32x16xf32>
    %cst_40 = arith.constant dense<0x7F800000> : vector<32xf32>
    %140 = vector.multi_reduction <minimumf>, %139, %cst_40 [1] : vector<32x16xf32> to vector<32xf32>
    %141 = vector.shape_cast %140 : vector<32xf32> to vector<32x1xf32>
    %cst_41 = arith.constant dense<0x7F800000> : vector<32xf32>
    %142 = vector.multi_reduction <minimumf>, %133, %cst_41 [1] : vector<32x16xf32> to vector<32xf32>
    %143 = vector.shape_cast %142 : vector<32xf32> to vector<32x1xf32>
    %144 = vector.broadcast %143 : vector<32x1xf32> to vector<32x16xf32>
    %145 = arith.cmpf oeq, %133, %144 : vector<32x16xf32>
    %cst_42 = arith.constant 1.600000e+01 : f32
    %146 = vector.broadcast %cst_42 : f32 to vector<32x16xf32>
    %147 = arith.select %145, %18, %146 : vector<32x16xi1>, vector<32x16xf32>
    %cst_43 = arith.constant dense<0x7F800000> : vector<32xf32>
    %148 = vector.multi_reduction <minimumf>, %147, %cst_43 [1] : vector<32x16xf32> to vector<32xf32>
    %149 = vector.shape_cast %148 : vector<32xf32> to vector<32x1xf32>
    %150 = vector.broadcast %141 : vector<32x1xf32> to vector<32x16xf32>
    %151 = arith.cmpf oeq, %18, %150 : vector<32x16xf32>
    %152 = arith.extui %151 : vector<32x16xi1> to vector<32x16xi32>
    %153 = arith.sitofp %152 : vector<32x16xi32> to vector<32x16xf32>
    %154 = vector.broadcast %149 : vector<32x1xf32> to vector<32x16xf32>
    %155 = arith.cmpf oeq, %18, %154 : vector<32x16xf32>
    %156 = arith.extui %155 : vector<32x16xi1> to vector<32x16xi32>
    %157 = arith.sitofp %156 : vector<32x16xi32> to vector<32x16xf32>
    %158 = tpu.concatenate %153, %157 in 0 : vector<32x16xf32>, vector<32x16xf32> -> vector<64x16xf32>
    %cst_44 = arith.constant dense<0.000000e+00> : vector<64x16xf32>
    %159 = tpu.matmul %158, %98, %cst_44 {dimension_numbers = #tpu.dot_dimension_numbers<[1], [0], [0], [1], [0, 0, 1, 1], [], []>} : vector<64x16xf32>, vector<16x16xf32>, vector<64x16xf32> -> vector<64x16xf32>
    %160 = tpu.concatenate %98, %98 in 0 : vector<16x16xf32>, vector<16x16xf32> -> vector<32x16xf32>
    %cst_45 = arith.constant 0.000000e+00 : f32
    %161 = vector.broadcast %cst_45 : f32 to vector<32x1xf32>
    %162 = arith.cmpf oeq, %110, %161 : vector<32x1xf32>
    %163 = vector.extract_strided_slice %159 {offsets = [0, 0], sizes = [32, 16], strides = [1, 1]} : vector<64x16xf32> to vector<32x16xf32>
    %164 = vector.shape_cast %162 : vector<32x1xi1> to vector<32x1xi1>
    %165 = vector.broadcast %164 : vector<32x1xi1> to vector<32x16xi1>
    %166 = arith.select %165, %160, %163 : vector<32x16xi1>, vector<32x16xf32>
    %167 = vector.extract_strided_slice %159 {offsets = [32, 0], sizes = [32, 16], strides = [1, 1]} : vector<64x16xf32> to vector<32x16xf32>
    %168 = vector.shape_cast %162 : vector<32x1xi1> to vector<32x1xi1>
    %169 = vector.broadcast %168 : vector<32x1xi1> to vector<32x16xi1>
    %170 = arith.select %169, %160, %167 : vector<32x16xi1>, vector<32x16xf32>
    %171 = tpu.concatenate %118, %166, %123, %170 in 1 : vector<32x16xf32>, vector<32x16xf32>, vector<32x16xf32>, vector<32x16xf32> -> vector<32x64xf32>
    %172 = vector.extract_strided_slice %171 {offsets = [0, 0], sizes = [16, 64], strides = [1, 1]} : vector<32x64xf32> to vector<16x64xf32>
    %173 = vector.extract_strided_slice %171 {offsets = [16, 0], sizes = [16, 64], strides = [1, 1]} : vector<32x64xf32> to vector<16x64xf32>
    %174 = tpu.concatenate %95, %96, %172, %173 in 1 : vector<16x64xf32>, vector<16x64xf32>, vector<16x64xf32>, vector<16x64xf32> -> vector<16x256xf32>
    %175 = vector.extract_strided_slice %10 {offsets = [16, 64], sizes = [16, 16], strides = [1, 1]} : vector<32x96xf32> to vector<16x16xf32>
    %176 = vector.extract_strided_slice %4 {offsets = [16, 0], sizes = [16, 16], strides = [1, 1]} : vector<32x32xf32> to vector<16x16xf32>
    %177 = arith.mulf %176, %176 : vector<16x16xf32>
    %178 = tpu.concatenate %176, %177 in 1 : vector<16x16xf32>, vector<16x16xf32> -> vector<16x32xf32>
    %cst_46 = arith.constant dense<0.000000e+00> : vector<1x16xf32>
    %179 = tpu.matmul %19, %177, %cst_46 {dimension_numbers = #tpu.dot_dimension_numbers<[1], [1], [0], [0], [0, 0, 1, 0], [], []>} : vector<1x16xf32>, vector<16x16xf32>, vector<1x16xf32> -> vector<1x16xf32>
    %180 = vector.extract_strided_slice %10 {offsets = [16, 0], sizes = [16, 16], strides = [1, 1]} : vector<32x96xf32> to vector<16x16xf32>
    %181 = vector.extract_strided_slice %10 {offsets = [16, 16], sizes = [16, 16], strides = [1, 1]} : vector<32x96xf32> to vector<16x16xf32>
    %182 = tpu.concatenate %180, %181 in 0 : vector<16x16xf32>, vector<16x16xf32> -> vector<32x16xf32>
    %cst_47 = arith.constant dense<0.000000e+00> : vector<32x16xf32>
    %183 = tpu.matmul %182, %175, %cst_47 {dimension_numbers = #tpu.dot_dimension_numbers<[1], [1], [0], [0], [0, 0, 1, 0], [], []>} : vector<32x16xf32>, vector<16x16xf32>, vector<32x16xf32> -> vector<32x16xf32>
    %cst_48 = arith.constant 0.000000e+00 : f32
    %184 = vector.broadcast %cst_48 : f32 to vector<32x16xf32>
    %185 = arith.maximumf %183, %184 : vector<32x16xf32>
    %186 = arith.mulf %185, %16 : vector<32x16xf32>
    %cst_49 = arith.constant dense<0.000000e+00> : vector<32xf32>
    %187 = vector.multi_reduction <add>, %186, %cst_49 [1] : vector<32x16xf32> to vector<32xf32>
    %188 = vector.shape_cast %187 : vector<32xf32> to vector<32x1xf32>
    %cst_50 = arith.constant 0.000000e+00 : f32
    %189 = vector.broadcast %cst_50 : f32 to vector<32x1xf32>
    %190 = arith.cmpf oeq, %188, %189 : vector<32x1xf32>
    %cst_51 = arith.constant 1.000000e+00 : f32
    %191 = vector.broadcast %cst_51 : f32 to vector<32x1xf32>
    %192 = arith.select %190, %191, %188 : vector<32x1xi1>, vector<32x1xf32>
    %cst_52 = arith.constant dense<0.000000e+00> : vector<32x32xf32>
    %193 = tpu.matmul %186, %178, %cst_52 {dimension_numbers = #tpu.dot_dimension_numbers<[1], [0], [0], [1], [0, 0, 1, 1], [], []>} : vector<32x16xf32>, vector<16x32xf32>, vector<32x32xf32> -> vector<32x32xf32>
    %194 = vector.broadcast %192 : vector<32x1xf32> to vector<32x32xf32>
    %195 = arith.divf %193, %194 : vector<32x32xf32>
    %196 = vector.extract_strided_slice %195 {offsets = [0, 0], sizes = [32, 16], strides = [1, 1]} : vector<32x32xf32> to vector<32x16xf32>
    %197 = vector.extract_strided_slice %195 {offsets = [0, 16], sizes = [32, 16], strides = [1, 1]} : vector<32x32xf32> to vector<32x16xf32>
    %198 = arith.mulf %196, %196 : vector<32x16xf32>
    %199 = arith.subf %197, %198 : vector<32x16xf32>
    %cst_53 = arith.constant 0.000000e+00 : f32
    %200 = vector.broadcast %cst_53 : f32 to vector<32x16xf32>
    %201 = arith.maximumf %199, %200 : vector<32x16xf32>
    %cst_54 = arith.constant 2.000000e-01 : f32
    %202 = vector.broadcast %cst_54 : f32 to vector<32x16xf32>
    %203 = arith.cmpf ogt, %186, %202 : vector<32x16xf32>
    %cst_55 = arith.constant -1.000000e+30 : f32
    %204 = vector.shape_cast %179 : vector<1x16xf32> to vector<1x16xf32>
    %205 = vector.broadcast %204 : vector<1x16xf32> to vector<32x16xf32>
    %206 = vector.broadcast %cst_55 : f32 to vector<32x16xf32>
    %207 = arith.select %203, %205, %206 : vector<32x16xi1>, vector<32x16xf32>
    %cst_56 = arith.constant 1.000000e+30 : f32
    %208 = vector.shape_cast %179 : vector<1x16xf32> to vector<1x16xf32>
    %209 = vector.broadcast %208 : vector<1x16xf32> to vector<32x16xf32>
    %210 = vector.broadcast %cst_56 : f32 to vector<32x16xf32>
    %211 = arith.select %203, %209, %210 : vector<32x16xi1>, vector<32x16xf32>
    %cst_57 = arith.constant dense<0xFF800000> : vector<32xf32>
    %212 = vector.multi_reduction <maximumf>, %207, %cst_57 [1] : vector<32x16xf32> to vector<32xf32>
    %213 = vector.shape_cast %212 : vector<32xf32> to vector<32x1xf32>
    %214 = vector.broadcast %213 : vector<32x1xf32> to vector<32x16xf32>
    %215 = arith.cmpf oeq, %207, %214 : vector<32x16xf32>
    %cst_58 = arith.constant 1.600000e+01 : f32
    %216 = vector.broadcast %cst_58 : f32 to vector<32x16xf32>
    %217 = arith.select %215, %18, %216 : vector<32x16xi1>, vector<32x16xf32>
    %cst_59 = arith.constant dense<0x7F800000> : vector<32xf32>
    %218 = vector.multi_reduction <minimumf>, %217, %cst_59 [1] : vector<32x16xf32> to vector<32xf32>
    %219 = vector.shape_cast %218 : vector<32xf32> to vector<32x1xf32>
    %cst_60 = arith.constant dense<0x7F800000> : vector<32xf32>
    %220 = vector.multi_reduction <minimumf>, %211, %cst_60 [1] : vector<32x16xf32> to vector<32xf32>
    %221 = vector.shape_cast %220 : vector<32xf32> to vector<32x1xf32>
    %222 = vector.broadcast %221 : vector<32x1xf32> to vector<32x16xf32>
    %223 = arith.cmpf oeq, %211, %222 : vector<32x16xf32>
    %cst_61 = arith.constant 1.600000e+01 : f32
    %224 = vector.broadcast %cst_61 : f32 to vector<32x16xf32>
    %225 = arith.select %223, %18, %224 : vector<32x16xi1>, vector<32x16xf32>
    %cst_62 = arith.constant dense<0x7F800000> : vector<32xf32>
    %226 = vector.multi_reduction <minimumf>, %225, %cst_62 [1] : vector<32x16xf32> to vector<32xf32>
    %227 = vector.shape_cast %226 : vector<32xf32> to vector<32x1xf32>
    %228 = vector.broadcast %219 : vector<32x1xf32> to vector<32x16xf32>
    %229 = arith.cmpf oeq, %18, %228 : vector<32x16xf32>
    %230 = arith.extui %229 : vector<32x16xi1> to vector<32x16xi32>
    %231 = arith.sitofp %230 : vector<32x16xi32> to vector<32x16xf32>
    %232 = vector.broadcast %227 : vector<32x1xf32> to vector<32x16xf32>
    %233 = arith.cmpf oeq, %18, %232 : vector<32x16xf32>
    %234 = arith.extui %233 : vector<32x16xi1> to vector<32x16xi32>
    %235 = arith.sitofp %234 : vector<32x16xi32> to vector<32x16xf32>
    %236 = tpu.concatenate %231, %235 in 0 : vector<32x16xf32>, vector<32x16xf32> -> vector<64x16xf32>
    %cst_63 = arith.constant dense<0.000000e+00> : vector<64x16xf32>
    %237 = tpu.matmul %236, %176, %cst_63 {dimension_numbers = #tpu.dot_dimension_numbers<[1], [0], [0], [1], [0, 0, 1, 1], [], []>} : vector<64x16xf32>, vector<16x16xf32>, vector<64x16xf32> -> vector<64x16xf32>
    %238 = tpu.concatenate %176, %176 in 0 : vector<16x16xf32>, vector<16x16xf32> -> vector<32x16xf32>
    %cst_64 = arith.constant 0.000000e+00 : f32
    %239 = vector.broadcast %cst_64 : f32 to vector<32x1xf32>
    %240 = arith.cmpf oeq, %188, %239 : vector<32x1xf32>
    %241 = vector.extract_strided_slice %237 {offsets = [0, 0], sizes = [32, 16], strides = [1, 1]} : vector<64x16xf32> to vector<32x16xf32>
    %242 = vector.shape_cast %240 : vector<32x1xi1> to vector<32x1xi1>
    %243 = vector.broadcast %242 : vector<32x1xi1> to vector<32x16xi1>
    %244 = arith.select %243, %238, %241 : vector<32x16xi1>, vector<32x16xf32>
    %245 = vector.extract_strided_slice %237 {offsets = [32, 0], sizes = [32, 16], strides = [1, 1]} : vector<64x16xf32> to vector<32x16xf32>
    %246 = vector.shape_cast %240 : vector<32x1xi1> to vector<32x1xi1>
    %247 = vector.broadcast %246 : vector<32x1xi1> to vector<32x16xi1>
    %248 = arith.select %247, %238, %245 : vector<32x16xi1>, vector<32x16xf32>
    %249 = tpu.concatenate %196, %244, %201, %248 in 1 : vector<32x16xf32>, vector<32x16xf32>, vector<32x16xf32>, vector<32x16xf32> -> vector<32x64xf32>
    %250 = vector.extract_strided_slice %249 {offsets = [0, 0], sizes = [16, 64], strides = [1, 1]} : vector<32x64xf32> to vector<16x64xf32>
    %251 = vector.extract_strided_slice %249 {offsets = [16, 0], sizes = [16, 64], strides = [1, 1]} : vector<32x64xf32> to vector<16x64xf32>
    %252 = vector.extract_strided_slice %10 {offsets = [16, 80], sizes = [16, 16], strides = [1, 1]} : vector<32x96xf32> to vector<16x16xf32>
    %253 = vector.extract_strided_slice %4 {offsets = [16, 16], sizes = [16, 16], strides = [1, 1]} : vector<32x32xf32> to vector<16x16xf32>
    %254 = arith.mulf %253, %253 : vector<16x16xf32>
    %255 = tpu.concatenate %253, %254 in 1 : vector<16x16xf32>, vector<16x16xf32> -> vector<16x32xf32>
    %cst_65 = arith.constant dense<0.000000e+00> : vector<1x16xf32>
    %256 = tpu.matmul %19, %254, %cst_65 {dimension_numbers = #tpu.dot_dimension_numbers<[1], [1], [0], [0], [0, 0, 1, 0], [], []>} : vector<1x16xf32>, vector<16x16xf32>, vector<1x16xf32> -> vector<1x16xf32>
    %257 = vector.extract_strided_slice %10 {offsets = [16, 32], sizes = [16, 16], strides = [1, 1]} : vector<32x96xf32> to vector<16x16xf32>
    %258 = vector.extract_strided_slice %10 {offsets = [16, 48], sizes = [16, 16], strides = [1, 1]} : vector<32x96xf32> to vector<16x16xf32>
    %259 = tpu.concatenate %257, %258 in 0 : vector<16x16xf32>, vector<16x16xf32> -> vector<32x16xf32>
    %cst_66 = arith.constant dense<0.000000e+00> : vector<32x16xf32>
    %260 = tpu.matmul %259, %252, %cst_66 {dimension_numbers = #tpu.dot_dimension_numbers<[1], [1], [0], [0], [0, 0, 1, 0], [], []>} : vector<32x16xf32>, vector<16x16xf32>, vector<32x16xf32> -> vector<32x16xf32>
    %cst_67 = arith.constant 0.000000e+00 : f32
    %261 = vector.broadcast %cst_67 : f32 to vector<32x16xf32>
    %262 = arith.maximumf %260, %261 : vector<32x16xf32>
    %263 = arith.mulf %262, %16 : vector<32x16xf32>
    %cst_68 = arith.constant dense<0.000000e+00> : vector<32xf32>
    %264 = vector.multi_reduction <add>, %263, %cst_68 [1] : vector<32x16xf32> to vector<32xf32>
    %265 = vector.shape_cast %264 : vector<32xf32> to vector<32x1xf32>
    %cst_69 = arith.constant 0.000000e+00 : f32
    %266 = vector.broadcast %cst_69 : f32 to vector<32x1xf32>
    %267 = arith.cmpf oeq, %265, %266 : vector<32x1xf32>
    %cst_70 = arith.constant 1.000000e+00 : f32
    %268 = vector.broadcast %cst_70 : f32 to vector<32x1xf32>
    %269 = arith.select %267, %268, %265 : vector<32x1xi1>, vector<32x1xf32>
    %cst_71 = arith.constant dense<0.000000e+00> : vector<32x32xf32>
    %270 = tpu.matmul %263, %255, %cst_71 {dimension_numbers = #tpu.dot_dimension_numbers<[1], [0], [0], [1], [0, 0, 1, 1], [], []>} : vector<32x16xf32>, vector<16x32xf32>, vector<32x32xf32> -> vector<32x32xf32>
    %271 = vector.broadcast %269 : vector<32x1xf32> to vector<32x32xf32>
    %272 = arith.divf %270, %271 : vector<32x32xf32>
    %273 = vector.extract_strided_slice %272 {offsets = [0, 0], sizes = [32, 16], strides = [1, 1]} : vector<32x32xf32> to vector<32x16xf32>
    %274 = vector.extract_strided_slice %272 {offsets = [0, 16], sizes = [32, 16], strides = [1, 1]} : vector<32x32xf32> to vector<32x16xf32>
    %275 = arith.mulf %273, %273 : vector<32x16xf32>
    %276 = arith.subf %274, %275 : vector<32x16xf32>
    %cst_72 = arith.constant 0.000000e+00 : f32
    %277 = vector.broadcast %cst_72 : f32 to vector<32x16xf32>
    %278 = arith.maximumf %276, %277 : vector<32x16xf32>
    %cst_73 = arith.constant 2.000000e-01 : f32
    %279 = vector.broadcast %cst_73 : f32 to vector<32x16xf32>
    %280 = arith.cmpf ogt, %263, %279 : vector<32x16xf32>
    %cst_74 = arith.constant -1.000000e+30 : f32
    %281 = vector.shape_cast %256 : vector<1x16xf32> to vector<1x16xf32>
    %282 = vector.broadcast %281 : vector<1x16xf32> to vector<32x16xf32>
    %283 = vector.broadcast %cst_74 : f32 to vector<32x16xf32>
    %284 = arith.select %280, %282, %283 : vector<32x16xi1>, vector<32x16xf32>
    %cst_75 = arith.constant 1.000000e+30 : f32
    %285 = vector.shape_cast %256 : vector<1x16xf32> to vector<1x16xf32>
    %286 = vector.broadcast %285 : vector<1x16xf32> to vector<32x16xf32>
    %287 = vector.broadcast %cst_75 : f32 to vector<32x16xf32>
    %288 = arith.select %280, %286, %287 : vector<32x16xi1>, vector<32x16xf32>
    %cst_76 = arith.constant dense<0xFF800000> : vector<32xf32>
    %289 = vector.multi_reduction <maximumf>, %284, %cst_76 [1] : vector<32x16xf32> to vector<32xf32>
    %290 = vector.shape_cast %289 : vector<32xf32> to vector<32x1xf32>
    %291 = vector.broadcast %290 : vector<32x1xf32> to vector<32x16xf32>
    %292 = arith.cmpf oeq, %284, %291 : vector<32x16xf32>
    %cst_77 = arith.constant 1.600000e+01 : f32
    %293 = vector.broadcast %cst_77 : f32 to vector<32x16xf32>
    %294 = arith.select %292, %18, %293 : vector<32x16xi1>, vector<32x16xf32>
    %cst_78 = arith.constant dense<0x7F800000> : vector<32xf32>
    %295 = vector.multi_reduction <minimumf>, %294, %cst_78 [1] : vector<32x16xf32> to vector<32xf32>
    %296 = vector.shape_cast %295 : vector<32xf32> to vector<32x1xf32>
    %cst_79 = arith.constant dense<0x7F800000> : vector<32xf32>
    %297 = vector.multi_reduction <minimumf>, %288, %cst_79 [1] : vector<32x16xf32> to vector<32xf32>
    %298 = vector.shape_cast %297 : vector<32xf32> to vector<32x1xf32>
    %299 = vector.broadcast %298 : vector<32x1xf32> to vector<32x16xf32>
    %300 = arith.cmpf oeq, %288, %299 : vector<32x16xf32>
    %cst_80 = arith.constant 1.600000e+01 : f32
    %301 = vector.broadcast %cst_80 : f32 to vector<32x16xf32>
    %302 = arith.select %300, %18, %301 : vector<32x16xi1>, vector<32x16xf32>
    %cst_81 = arith.constant dense<0x7F800000> : vector<32xf32>
    %303 = vector.multi_reduction <minimumf>, %302, %cst_81 [1] : vector<32x16xf32> to vector<32xf32>
    %304 = vector.shape_cast %303 : vector<32xf32> to vector<32x1xf32>
    %305 = vector.broadcast %296 : vector<32x1xf32> to vector<32x16xf32>
    %306 = arith.cmpf oeq, %18, %305 : vector<32x16xf32>
    %307 = arith.extui %306 : vector<32x16xi1> to vector<32x16xi32>
    %308 = arith.sitofp %307 : vector<32x16xi32> to vector<32x16xf32>
    %309 = vector.broadcast %304 : vector<32x1xf32> to vector<32x16xf32>
    %310 = arith.cmpf oeq, %18, %309 : vector<32x16xf32>
    %311 = arith.extui %310 : vector<32x16xi1> to vector<32x16xi32>
    %312 = arith.sitofp %311 : vector<32x16xi32> to vector<32x16xf32>
    %313 = tpu.concatenate %308, %312 in 0 : vector<32x16xf32>, vector<32x16xf32> -> vector<64x16xf32>
    %cst_82 = arith.constant dense<0.000000e+00> : vector<64x16xf32>
    %314 = tpu.matmul %313, %253, %cst_82 {dimension_numbers = #tpu.dot_dimension_numbers<[1], [0], [0], [1], [0, 0, 1, 1], [], []>} : vector<64x16xf32>, vector<16x16xf32>, vector<64x16xf32> -> vector<64x16xf32>
    %315 = tpu.concatenate %253, %253 in 0 : vector<16x16xf32>, vector<16x16xf32> -> vector<32x16xf32>
    %cst_83 = arith.constant 0.000000e+00 : f32
    %316 = vector.broadcast %cst_83 : f32 to vector<32x1xf32>
    %317 = arith.cmpf oeq, %265, %316 : vector<32x1xf32>
    %318 = vector.extract_strided_slice %314 {offsets = [0, 0], sizes = [32, 16], strides = [1, 1]} : vector<64x16xf32> to vector<32x16xf32>
    %319 = vector.shape_cast %317 : vector<32x1xi1> to vector<32x1xi1>
    %320 = vector.broadcast %319 : vector<32x1xi1> to vector<32x16xi1>
    %321 = arith.select %320, %315, %318 : vector<32x16xi1>, vector<32x16xf32>
    %322 = vector.extract_strided_slice %314 {offsets = [32, 0], sizes = [32, 16], strides = [1, 1]} : vector<64x16xf32> to vector<32x16xf32>
    %323 = vector.shape_cast %317 : vector<32x1xi1> to vector<32x1xi1>
    %324 = vector.broadcast %323 : vector<32x1xi1> to vector<32x16xi1>
    %325 = arith.select %324, %315, %322 : vector<32x16xi1>, vector<32x16xf32>
    %326 = tpu.concatenate %273, %321, %278, %325 in 1 : vector<32x16xf32>, vector<32x16xf32>, vector<32x16xf32>, vector<32x16xf32> -> vector<32x64xf32>
    %327 = vector.extract_strided_slice %326 {offsets = [0, 0], sizes = [16, 64], strides = [1, 1]} : vector<32x64xf32> to vector<16x64xf32>
    %328 = vector.extract_strided_slice %326 {offsets = [16, 0], sizes = [16, 64], strides = [1, 1]} : vector<32x64xf32> to vector<16x64xf32>
    %329 = tpu.concatenate %250, %251, %327, %328 in 1 : vector<16x64xf32>, vector<16x64xf32>, vector<16x64xf32>, vector<16x64xf32> -> vector<16x256xf32>
    %330 = tpu.concatenate %174, %329 in 0 : vector<16x256xf32>, vector<16x256xf32> -> vector<32x256xf32>
    %c0_84 = arith.constant 0 : index
    %c0_85 = arith.constant 0 : index
    %331 = vector.load %arg5[%c0_84, %c0_85] : memref<256x128xf32, #tpu.memory_space<vmem>>, vector<256x128xf32>
    %cst_86 = arith.constant dense<0.000000e+00> : vector<32x128xf32>
    %332 = tpu.matmul %330, %331, %cst_86 {dimension_numbers = #tpu.dot_dimension_numbers<[1], [0], [0], [1], [0, 0, 1, 1], [], []>} : vector<32x256xf32>, vector<256x128xf32>, vector<32x128xf32> -> vector<32x128xf32>
    %333 = arith.negf %332 : vector<32x128xf32>
    %334 = math.exp %333 : vector<32x128xf32>
    %cst_87 = arith.constant 1.000000e+00 : f32
    %335 = vector.broadcast %cst_87 : f32 to vector<32x128xf32>
    %336 = arith.addf %335, %334 : vector<32x128xf32>
    %337 = arith.divf %335, %336 : vector<32x128xf32>
    %338 = arith.mulf %332, %337 : vector<32x128xf32>
    %c0_88 = arith.constant 0 : index
    %c0_89 = arith.constant 0 : index
    %339 = vector.load %arg6[%c0_88, %c0_89] : memref<128x64xf32, #tpu.memory_space<vmem>>, vector<128x64xf32>
    %cst_90 = arith.constant dense<0.000000e+00> : vector<32x64xf32>
    %340 = tpu.matmul %338, %339, %cst_90 {dimension_numbers = #tpu.dot_dimension_numbers<[1], [0], [0], [1], [0, 0, 1, 1], [], []>} : vector<32x128xf32>, vector<128x64xf32>, vector<32x64xf32> -> vector<32x64xf32>
    %c0_91 = arith.constant 0 : index
    %c0_92 = arith.constant 0 : index
    %341 = vector.load %arg7[%c0_91, %c0_92] : memref<32x64xf32, #tpu.memory_space<vmem>>, vector<32x64xf32>
    tpu.vector_store %arg7[%c0_91, %c0_92], %340 {strides = array<i32>} : memref<32x64xf32, #tpu.memory_space<vmem>>, vector<32x64xf32>,
    return
  }
  func.func @transform_0(%arg0: i32) -> (i32, i32) {
    %c0_i32 = arith.constant 0 : i32
    %c0_i32_0 = arith.constant 0 : i32
    %c0_i32_1 = arith.constant 0 : i32
    return %c0_i32, %c0_i32_0 : i32, i32
  }
  func.func @transform_1(%arg0: i32) -> (i32, i32) {
    %c0_i32 = arith.constant 0 : i32
    %c0_i32_0 = arith.constant 0 : i32
    %c0_i32_1 = arith.constant 0 : i32
    return %c0_i32, %c0_i32_0 : i32, i32
  }
  func.func @transform_2(%arg0: i32) -> (i32, i32) {
    %c0_i32 = arith.constant 0 : i32
    %c0_i32_0 = arith.constant 0 : i32
    %c0_i32_1 = arith.constant 0 : i32
    return %c0_i32, %c0_i32_0 : i32, i32
  }
  func.func @transform_3(%arg0: i32) -> (i32, i32) {
    %c0_i32 = arith.constant 0 : i32
    %c0_i32_0 = arith.constant 0 : i32
    %c0_i32_1 = arith.constant 0 : i32
    return %c0_i32, %c0_i32_0 : i32, i32
  }
  func.func @transform_4(%arg0: i32) -> (i32, i32) {
    %c0_i32 = arith.constant 0 : i32
    %c0_i32_0 = arith.constant 0 : i32
    %c0_i32_1 = arith.constant 0 : i32
    return %c0_i32, %c0_i32_0 : i32, i32
  }
  func.func @transform_5(%arg0: i32) -> (i32, i32) {
    %c0_i32 = arith.constant 0 : i32
    %c0_i32_0 = arith.constant 0 : i32
    %c0_i32_1 = arith.constant 0 : i32
    return %c0_i32, %c0_i32_0 : i32, i32
  }
  func.func @transform_6(%arg0: i32) -> (i32, i32) {
    %c0_i32 = arith.constant 0 : i32
    %c0_i32_0 = arith.constant 0 : i32
    %c0_i32_1 = arith.constant 0 : i32
    return %c0_i32, %c0_i32_0 : i32, i32
  }
}

</mosaic_0001>

<bundles_post_ra>
// kernel: tile.34
= control target key start
LH: loop header
LB: loop body
LE: loop exit
PB: predicated region body
PF: predicated region fallthrough
CT: control target
= control target key end

     0   :  { %vm68_vm0 = vcmask 1047556   ;;  %s167_s9 = smov 32   ;;  %s168_s10 = smov 16   ;;  %vm70_vm1 = vcmask 130048   ;;  %vm89_vm2 = vcmask 523648   ;;  %vm110_vm3 = vcmask 392448   ;;  %s259_s0 = inlined_call_operand.vmem [shape: f32[16,4,16], index: 0, kind: input, shape index: {}]   ;;  %s260_s1 = inlined_call_operand.vmem [shape: f32[16,64], index: 1, kind: output, shape index: {}]  }
   0x1   :  { %v152_v0 = vld [vmem:[%s259_s0 + $0x1c] sm:$0xf]  ;;  %v153_v1 = vld [vmem:[%s259_s0 + $0x18] sm:$0xf]  ;;  %v154_v2 = vld [vmem:[%s259_s0 + $0x14] sm:$0xf] }
   0x2   :  { %39 = vst [vmem:[#allocation0 + $0x38] sm:$0xf] %v152_v0  ;;  %v155_v3 = vld [vmem:[%s259_s0 + $0x10] sm:$0xf]  ;;  %v156_v4 = vld [vmem:[%s259_s0 + $0xc] sm:$0xf] }
   0x3   :  { %43 = vst [vmem:[#allocation0 + $0x30] sm:$0xf] %v153_v1  ;;  %v157_v5 = vld [vmem:[%s259_s0 + $0x8] sm:$0xf]  ;;  %v158_v6 = vld [vmem:[%s259_s0 + $0x4] sm:$0xf] }
   0x4   :  { %47 = vst [vmem:[#allocation0 + $0x28] sm:$0xf] %v154_v2  ;;  %v64_v7 = vld [vmem:[%s259_s0] sm:$0xf]  ;;  %v144_v8 = vld [vmem:[%s259_s0 + $0x3c] sm:$0xf] }
   0x5   :  { %51 = vst [vmem:[#allocation0 + $0x20] sm:$0xf] %v155_v3  ;;  %v145_v9 = vld [vmem:[%s259_s0 + $0x38] sm:$0xf]  ;;  %v146_v10 = vld [vmem:[%s259_s0 + $0x34] sm:$0xf] }
   0x6   :  { %55 = vst [vmem:[#allocation0 + $0x18] sm:$0xf] %v156_v4  ;;  %v147_v11 = vld [vmem:[%s259_s0 + $0x30] sm:$0xf]  ;;  %v148_v12 = vld [vmem:[%s259_s0 + $0x2c] sm:$0xf] }
   0x7   :  { %59 = vst [vmem:[#allocation0 + $0x10] sm:$0xf] %v157_v5  ;;  %v149_v13 = vld [vmem:[%s259_s0 + $0x28] sm:$0xf]  ;;  %v150_v15 = vld [vmem:[%s259_s0 + $0x24] sm:$0xf] }
   0x8   :  { %63 = vst [vmem:[#allocation0 + $0x8] sm:$0xf] %v158_v6  ;;  %v151_v17 = vld [vmem:[%s259_s0 + $0x20] sm:$0xf]  ;;  %s166_s0 = smov 48   ;;  %vm131_vm4 = vcmask 261248  }
   0x9   :  { %65 = vst [vmem:[#allocation0] sm:$0xf] %v64_v7 }
   0xa   :  { %7 = vst [vmem:[#allocation0 + $0x78] sm:$0xf] %v144_v8 }
   0xb   :  { %11 = vst [vmem:[#allocation0 + $0x70] sm:$0xf] %v145_v9 }
   0xc   :  { %v84_v14 = vld [vmem:[#allocation0 + $0x3] ss:$8 sm:$0xf0]   ;;  %15 = vst [vmem:[#allocation0 + $0x68] sm:$0xf] %v146_v10 }
   0xd   :  { %v105_v16 = vld [vmem:[#allocation0 + $0x2] ss:$8 sm:$0xf0]   ;;  %19 = vst [vmem:[#allocation0 + $0x60] sm:$0xf] %v147_v11 }
   0xe   :  { %23 = vst [vmem:[#allocation0 + $0x58] sm:$0xf] %v148_v12  ;;  %v126_v18 = vld [vmem:[#allocation0 + $0x1] ss:$8 sm:$0xf0]  }
   0xf   :  { %27 = vst [vmem:[#allocation0 + $0x50] sm:$0xf] %v149_v13  ;;  %v67_v35 = vld [vmem:[#allocation0] ss:$8 sm:$0xf0]  }
  0x10   :  { %v82_v19 = vld [vmem:[#allocation0 + $0x3] ss:$8 sm:$0xf]   ;;  %v103_v20 = vld [vmem:[#allocation0 + $0x2] ss:$8 sm:$0xf]  }
  0x11   :  { %v86_v21 = vsel %vm68_vm0, %v84_v14, %v82_v19  ;;  %v107_v22 = vsel %vm68_vm0, %v105_v16, %v103_v20  ;;  %v124_v23 = vld [vmem:[#allocation0 + $0x1] ss:$8 sm:$0xf]   ;;  %31 = vst [vmem:[#allocation0 + $0x48] sm:$0xf] %v150_v15 }
  0x12   :  { %87 = vrot.lane.b32.xlu0 %v86_v21, %s166_s0  ;;  %108 = vrot.lane.b32.xlu1 %v107_v22, %s167_s9  ;;  %v128_v24 = vsel %vm68_vm0, %v126_v18, %v124_v23  ;;  %35 = vst [vmem:[#allocation0 + $0x40] sm:$0xf] %v151_v17  ;;  %v66_v34 = vld [vmem:[#allocation0] ss:$8 sm:$0xf]  }
  0x13   :  { %129 = vrot.lane.b32.xlu2 %v128_v24, %s168_s10  ;;  %v69_v36 = vsel %vm68_vm0, %v67_v35, %v66_v34 }
  0x14   :  { %v94_v25 = vld [vmem:[#allocation0 + $0x43] ss:$8 sm:$0xf0]   ;;  %v115_v26 = vld [vmem:[#allocation0 + $0x42] ss:$8 sm:$0xf0]  }
  0x15   :  { %v136_v27 = vld [vmem:[#allocation0 + $0x41] ss:$8 sm:$0xf0]   ;;  %71 = vst.msk [vmem:[%s260_s1] sm:$0xff] %vm70_vm1, %v69_v36  }
  0x16   :  { %v75_v38 = vld [vmem:[#allocation0 + $0x40] ss:$8 sm:$0xf0]  }
  0x19   :  { %v92_v28 = vld [vmem:[#allocation0 + $0x43] ss:$8 sm:$0xf]   ;;  %v113_v29 = vld [vmem:[#allocation0 + $0x42] ss:$8 sm:$0xf]  }
  0x1a   :  { %v96_v30 = vsel %vm68_vm0, %v94_v25, %v92_v28  ;;  %v117_v31 = vsel %vm68_vm0, %v115_v26, %v113_v29  ;;  %v134_v32 = vld [vmem:[#allocation0 + $0x41] ss:$8 sm:$0xf]   ;;  %v73_v37 = vld [vmem:[#allocation0 + $0x40] ss:$8 sm:$0xf]  }
  0x1b   :  { %97 = vrot.lane.b32.xlu0 %v96_v30, %s166_s0  ;;  %118 = vrot.lane.b32.xlu1 %v117_v31, %s167_s9  ;;  %v138_v33 = vsel %vm68_vm0, %v136_v27, %v134_v32  ;;  %v77_v40 = vsel %vm68_vm0, %v75_v38, %v73_v37 }
  0x1c   :  { %139 = vrot.lane.b32.xlu2 %v138_v33, %s168_s10  ;;  %159 = vst.msk [vmem:[%s260_s1 + $0x8] sm:$0xff] %vm70_vm1, %v77_v40  }
  0x6d   :  { %v130_v39 = vpop.permute.xlu2 %129  }
  0x76   :  { %v140_v41 = vpop.permute.xlu2 %139  }
  0x84   :  { %v88_v42 = vpop.permute.xlu0 %87   ;;  %v109_v43 = vpop.permute.xlu1 %108  }
  0x85   :  { %90 = vst.msk [vmem:[%s260_s1] sm:$0xff] %vm89_vm2, %v88_v42  }
  0x86   :  { %111 = vst.msk [vmem:[%s260_s1] sm:$0xff] %vm110_vm3, %v109_v43  }
  0x87   :  { %132 = vst.msk [vmem:[%s260_s1] sm:$0xff] %vm131_vm4, %v130_v39  }
  0x8d   :  { %v98_v44 = vpop.permute.xlu0 %97   ;;  %v119_v45 = vpop.permute.xlu1 %118  }
  0x8e   :  { %160 = vst.msk [vmem:[%s260_s1 + $0x8] sm:$0xff] %vm89_vm2, %v98_v44  }
  0x8f   :  { %161 = vst.msk [vmem:[%s260_s1 + $0x8] sm:$0xff] %vm110_vm3, %v119_v45  }
  0x90   :  { %162 = vst.msk [vmem:[%s260_s1 + $0x8] sm:$0xff] %vm131_vm4, %v140_v41  }

// kernel: tile.39
= control target key start
LH: loop header
LB: loop body
LE: loop exit
PB: predicated region body
PF: predicated region fallthrough
CT: control target
= control target key end

     0   :  { %vm68_vm0 = vcmask 1047556   ;;  %vm70_vm1 = vcmask 130048   ;;  %vm89_vm2 = vcmask 261248   ;;  %s195_s0 = inlined_call_operand.vmem [shape: f32[16,2,16], index: 0, kind: input, shape index: {}]   ;;  %s196_s1 = inlined_call_operand.vmem [shape: f32[16,32], index: 1, kind: output, shape index: {}]  }
   0x1   :  { %v110_v0 = vld [vmem:[%s195_s0 + $0xe] sm:$0x3]  ;;  %v111_v1 = vld [vmem:[%s195_s0 + $0xc] sm:$0x3]  ;;  %v112_v2 = vld [vmem:[%s195_s0 + $0xa] sm:$0x3] }
   0x2   :  { %39 = vst [vmem:[#allocation0 + $0x38] sm:$0x3] %v110_v0  ;;  %v113_v3 = vld [vmem:[%s195_s0 + $0x8] sm:$0x3]  ;;  %v114_v4 = vld [vmem:[%s195_s0 + $0x6] sm:$0x3] }
   0x3   :  { %43 = vst [vmem:[#allocation0 + $0x30] sm:$0x3] %v111_v1  ;;  %v115_v5 = vld [vmem:[%s195_s0 + $0x4] sm:$0x3]  ;;  %v116_v6 = vld [vmem:[%s195_s0 + $0x2] sm:$0x3] }
   0x4   :  { %47 = vst [vmem:[#allocation0 + $0x28] sm:$0x3] %v112_v2  ;;  %v64_v7 = vld [vmem:[%s195_s0] sm:$0x3]  ;;  %v102_v8 = vld [vmem:[%s195_s0 + $0x1e] sm:$0x3] }
   0x5   :  { %51 = vst [vmem:[#allocation0 + $0x20] sm:$0x3] %v113_v3  ;;  %v103_v9 = vld [vmem:[%s195_s0 + $0x1c] sm:$0x3]  ;;  %v104_v10 = vld [vmem:[%s195_s0 + $0x1a] sm:$0x3] }
   0x6   :  { %55 = vst [vmem:[#allocation0 + $0x18] sm:$0x3] %v114_v4  ;;  %v105_v11 = vld [vmem:[%s195_s0 + $0x18] sm:$0x3]  ;;  %v106_v12 = vld [vmem:[%s195_s0 + $0x16] sm:$0x3] }
   0x7   :  { %59 = vst [vmem:[#allocation0 + $0x10] sm:$0x3] %v115_v5  ;;  %v107_v13 = vld [vmem:[%s195_s0 + $0x14] sm:$0x3]  ;;  %v108_v14 = vld [vmem:[%s195_s0 + $0x12] sm:$0x3] }
   0x8   :  { %63 = vst [vmem:[#allocation0 + $0x8] sm:$0x3] %v116_v6  ;;  %v109_v15 = vld [vmem:[%s195_s0 + $0x10] sm:$0x3]  ;;  %s120_s0 = smov 16  }
   0x9   :  { %65 = vst [vmem:[#allocation0] sm:$0x3] %v64_v7 }
   0xa   :  { %7 = vst [vmem:[#allocation0 + $0x78] sm:$0x3] %v102_v8 }
   0xb   :  { %11 = vst [vmem:[#allocation0 + $0x70] sm:$0x3] %v103_v9 }
   0xc   :  { %15 = vst [vmem:[#allocation0 + $0x68] sm:$0x3] %v104_v10  ;;  %v84_v16 = vld [vmem:[#allocation0 + $0x1] ss:$8 sm:$0xf0]  }
   0xd   :  { %19 = vst [vmem:[#allocation0 + $0x60] sm:$0x3] %v105_v11  ;;  %v67_v23 = vld [vmem:[#allocation0] ss:$8 sm:$0xf0]  }
   0xe   :  { %23 = vst [vmem:[#allocation0 + $0x58] sm:$0x3] %v106_v12 }
   0xf   :  { %27 = vst [vmem:[#allocation0 + $0x50] sm:$0x3] %v107_v13 }
  0x10   :  { %v82_v17 = vld [vmem:[#allocation0 + $0x1] ss:$8 sm:$0xf]   ;;  %31 = vst [vmem:[#allocation0 + $0x48] sm:$0x3] %v108_v14 }
  0x11   :  { %v86_v18 = vsel %vm68_vm0, %v84_v16, %v82_v17  ;;  %35 = vst [vmem:[#allocation0 + $0x40] sm:$0x3] %v109_v15  ;;  %v66_v22 = vld [vmem:[#allocation0] ss:$8 sm:$0xf]  }
  0x12   :  { %87 = vrot.lane.b32.xlu0 %v86_v18, %s120_s0  ;;  %v69_v24 = vsel %vm68_vm0, %v67_v23, %v66_v22 }
  0x13   :  { %71 = vst.msk [vmem:[%s196_s1] sm:$0xff] %vm70_vm1, %v69_v24  }
  0x14   :  { %v94_v19 = vld [vmem:[#allocation0 + $0x41] ss:$8 sm:$0xf0]   ;;  %v75_v26 = vld [vmem:[#allocation0 + $0x40] ss:$8 sm:$0xf0]  }
  0x18   :  { %v92_v20 = vld [vmem:[#allocation0 + $0x41] ss:$8 sm:$0xf]   ;;  %v73_v25 = vld [vmem:[#allocation0 + $0x40] ss:$8 sm:$0xf]  }
  0x19   :  { %v96_v21 = vsel %vm68_vm0, %v94_v19, %v92_v20  ;;  %v77_v27 = vsel %vm68_vm0, %v75_v26, %v73_v25 }
  0x1a   :  { %97 = vrot.lane.b32.xlu0 %v96_v21, %s120_s0  ;;  %117 = vst.msk [vmem:[%s196_s1 + $0x8] sm:$0xff] %vm70_vm1, %v77_v27  }
  0x84   :  { %v88_v28 = vpop.permute.xlu0 %87  }
  0x85   :  { %90 = vst.msk [vmem:[%s196_s1] sm:$0xff] %vm89_vm2, %v88_v28  }
  0x8c   :  { %v98_v29 = vpop.permute.xlu0 %97  }
  0x8d   :  { %118 = vst.msk [vmem:[%s196_s1 + $0x8] sm:$0xff] %vm89_vm2, %v98_v29  }

// kernel: llama_attention_pna_forward.1
= control target key start
LH: loop header
LB: loop body
LE: loop exit
PB: predicated region body
PF: predicated region fallthrough
CT: control target
= control target key end

     0   :  { %s4756_s0 = inlined_call_operand.vmem [shape: f32[32,64], index: 0, kind: input, shape index: {}]   ;;  %s4757_s1 = inlined_call_operand.vmem [shape: f32[64,256], index: 1, kind: input, shape index: {}]   ;;  %s4758_s2 = inlined_call_operand.vmem [shape: f32[32,96], index: 2, kind: input, shape index: {}]   ;;  %s4759_s3 = inlined_call_operand.vmem [shape: f32[32,96], index: 3, kind: input, shape index: {}]   ;;  %s4760_s4 = inlined_call_operand.vmem [shape: f32[256,128], index: 4, kind: input, shape index: {}]   ;;  %s4761_s5 = inlined_call_operand.vmem [shape: f32[128,64], index: 5, kind: input, shape index: {}]   ;;  %s4762_s6 = inlined_call_operand.hbm [shape: f32[32,64], index: 6, kind: output, shape index: {}]  }
   0x1   :  { %v42_v0 = vld [vmem:[%s4757_s1 + $0x70] sm:$0xff]  ;;  %v43_v1 = vld [vmem:[%s4757_s1 + $0x78] sm:$0xff]  ;;  %v40_v2 = vld [vmem:[%s4757_s1 + $0x60] sm:$0xff] }
   0x2   :  { %65 = vmatpush.msra.mxu0 %v42_v0  ;;  %94 = vmatpush.msra.mxu1 %v43_v1  ;;  %v41_v3 = vld [vmem:[%s4757_s1 + $0x68] sm:$0xff]  ;;  %v38_v4 = vld [vmem:[%s4757_s1 + $0x50] sm:$0xff]  ;;  %v39_v5 = vld [vmem:[%s4757_s1 + $0x58] sm:$0xff] }
   0x3   :  { %v36_v6 = vld [vmem:[%s4757_s1 + $0x40] sm:$0xff]  ;;  %v37_v7 = vld [vmem:[%s4757_s1 + $0x48] sm:$0xff]  ;;  %v34_v8 = vld [vmem:[%s4757_s1 + $0x30] sm:$0xff] }
   0x4   :  { %66 = vmatpush.msra.mxu0 %v40_v2  ;;  %95 = vmatpush.msra.mxu1 %v41_v3  ;;  %v35_v9 = vld [vmem:[%s4757_s1 + $0x38] sm:$0xff] }
   0x6   :  { %67 = vmatpush.msra.mxu0 %v38_v4  ;;  %96 = vmatpush.msra.mxu1 %v39_v5 }
   0x7   :  { %11 = vsyncpa [#allocation3], 0  ;;  %v32_v10 = vld [vmem:[%s4757_s1 + $0x20] sm:$0xff]  ;;  %v33_v11 = vld [vmem:[%s4757_s1 + $0x28] sm:$0xff]  ;;  %vm4769_vm0 = vcmask 523264   ;;  %s3002_s12 = smov 112  }
   0x8   :  { %68 = vmatpush.msra.mxu0 %v36_v6  ;;  %97 = vmatpush.msra.mxu1 %v37_v7  ;;  %v30_v12 = vld [vmem:[%s4757_s1 + $0x10] sm:$0xff]  ;;  %v31_v13 = vld [vmem:[%s4757_s1 + $0x18] sm:$0xff]  ;;  %v28_v14 = vld [vmem:[%s4757_s1] sm:$0xff]  ;;  %s3003_s17 = smov 16   ;;  %s3004_s18 = smov 64   ;;  %vm165_vm1 = vcmask 130048  }
   0x9   :  { %v29_v15 = vld [vmem:[%s4757_s1 + $0x8] sm:$0xff]  ;;  %v24_v16 = vld [vmem:[%s4756_s0] sm:$0xff]  ;;  %v26_v33 = vld [vmem:[%s4756_s0 + $0x10] sm:$0xff]  ;;  %s3005_s21 = smov 48   ;;  %s3006_s22 = smov 96   ;;  %v3008_v48 = vmov 1.0  }
   0xa   :  { %69 = vmatpush.msra.mxu0 %v34_v8  ;;  %98 = vmatpush.msra.mxu1 %v35_v9  ;;  %v25_v17 = vld [vmem:[%s4756_s0 + $0x8] sm:$0xff]  ;;  %v115_v18 = vld [vmem:[%s4758_s2] sm:$0xff]  ;;  %s3007_s23 = smov 32   ;;  %v27_v36 = vld [vmem:[%s4756_s0 + $0x18] sm:$0xff]  ;;  %s2522_s0 = sshll.u32 %s4762_s6, 4  ;;  %s2523_s0 = int_to_ptr.hbm [resolvable:$true] %s2522_s0 }
   0xb   :  { %v123_v19 = vld [vmem:[%s4759_s3] sm:$0xff]  ;;  %v116_v25 = vld [vmem:[%s4758_s2 + $0x8] sm:$0xff]  ;;  %v117_v55 = vld [vmem:[%s4758_s2 + $0x10] sm:$0xff]  ;;  %s3012_s26 = smov 128   ;;  %s3013_s27 = smov 8  }
   0xc   :  { %70 = vmatpush.msra.mxu0 %v32_v10  ;;  %99 = vmatpush.msra.mxu1 %v33_v11  ;;  %v124_v26 = vld [vmem:[%s4759_s3 + $0x8] sm:$0xff]  ;;  %v125_v56 = vld [vmem:[%s4759_s3 + $0x10] sm:$0xff]  ;;  %v118_v62 = vld [vmem:[%s4758_s2 + $0x18] sm:$0xff]  ;;  %s3010_s2 = smov 80  }
   0xd   :  { %v126_v63 = vld [vmem:[%s4759_s3 + $0x18] sm:$0xff] }
   0xe   :  { %71 = vmatpush.msra.mxu0 %v30_v12  ;;  %100 = vmatpush.msra.mxu1 %v31_v13  ;;  %v135_v13 = vlaneseq }
  0x10   :  { %72 = vmatpush.msra.mxu0 %v28_v14  ;;  %101 = vmatpush.msra.mxu1 %v29_v15 }
  0x11   :  { %2534 = vmatmul.msk.f32.vlgmr.msra.gmra.mxu0 %vm4769_vm0, %v24_v16  ;;  %2538 = vmatmul.msk.f32.vlgmr.msra.gmra.mxu1 %vm4769_vm0, %v24_v16  ;;  %v136_v16 = vshrl.u32 %v135_v13, 7 }
  0x19   :  { %2535 = vmatmul.msk.f32.gmra.mxu0 %vm4769_vm0, %v25_v17  ;;  %2539 = vmatmul.msk.f32.gmra.mxu1 %vm4769_vm0, %v25_v17  ;;  %v3213_v17 = vand.u32 127, %v135_v13 }
  0x1b   :  { %vm140_vm2 = vcmp.le.s32.totalorder %v3213_v17, %v136_v16 }
  0x21   :  { %2536 = vmatmul.msk.f32.gmra.mxu0 %vm4769_vm0, %v26_v33  ;;  %2540 = vmatmul.msk.f32.gmra.mxu1 %vm4769_vm0, %v26_v33 }
  0x29   :  { %2537 = vmatmul.msk.f32.gmra.mxu0 %vm4769_vm0, %v27_v36  ;;  %2541 = vmatmul.msk.f32.gmra.mxu1 %vm4769_vm0, %v27_v36 }
  0x8e   :  { %v3113_v20 = vpop.f32.mrf.mxu0  ;;  %v103_v21 = vpop.f32.mrf.mxu1 }
  0x8f   :  { %v119_v22 = vmul.f32 %v115_v18, %v3113_v20  ;;  %v127_v23 = vmul.f32 %v123_v19, %v103_v21  ;;  %v147_v34 = vmul.f32 %v3113_v20, %v3113_v20  ;;  %v4765_v19 = vmov 0.0  }
  0x90   :  { %v3218_v21 = vsel %vm140_vm2, 1.0, %v4765_v19 }
  0x91   :  { %v131_v24 = vadd.f32 %v127_v23, %v119_v22 }
  0x93   :  { %201 = vrot.lane.b32.xlu0 %v131_v24, %s3002_s12 }
  0x96   :  { %v3123_v27 = vpop.f32.mrf.mxu0  ;;  %v106_v28 = vpop.f32.mrf.mxu1 }
  0x97   :  { %v120_v29 = vmul.f32 %v116_v25, %v3123_v27  ;;  %v128_v30 = vmul.f32 %v124_v26, %v106_v28  ;;  %v148_v31 = vmul.f32 %v3123_v27, %v3123_v27  ;;  %v2678_v35 = vpack.i.bf16 %v3113_v20, %v3123_v27 }
  0x99   :  { %v132_v32 = vadd.f32 %v128_v30, %v120_v29  ;;  %695 = vrot.lane.b32.xlu2 %v148_v31, %s3003_s17  ;;  %v2683_v42 = vpack.i.bf16 %v147_v34, %v148_v31 }
  0x9b   :  { %207 = vrot.lane.b32.xlu1 %v132_v32, %s3004_s18  ;;  %203 = vrot.lane.b32.xlu0 %v132_v32, %s3002_s12 }
  0x9e   :  { %v3175_v53 = vpop.f32.mrf.mxu0  ;;  %v109_v54 = vpop.f32.mrf.mxu1 }
  0x9f   :  { %4793 = vst [vmem:[#allocation5_spill] sm:$0xff] %v3175_v53  ;;  %v121_v57 = vmul.f32 %v117_v55, %v3175_v53  ;;  %v129_v58 = vmul.f32 %v125_v56, %v109_v54 }
  0xa1   :  { %731 = vrot.lane.b32.xlu2 %v132_v32, %s3005_s21  ;;  %v3184_v59 = vadd.f32 %v129_v58, %v121_v57 }
  0xa3   :  { %205 = vrot.lane.b32.xlu1 %v131_v24, %s3004_s18  ;;  %729 = vrot.lane.b32.xlu0 %v131_v24, %s3005_s21 }
  0xa6   :  { %v3190_v60 = vpop.f32.mrf.mxu0  ;;  %v112_v61 = vpop.f32.mrf.mxu1 }
  0xa7   :  { %4794 = vst [vmem:[#allocation6_spill] sm:$0xff] %v3190_v60  ;;  %v122_v0 = vmul.f32 %v118_v62, %v3190_v60  ;;  %v130_v1 = vmul.f32 %v126_v63, %v112_v61 }
  0xa9   :  { %721 = vrot.lane.b32.xlu2 %v131_v24, %s3006_s22  ;;  %v3199_v2 = vadd.f32 %v130_v1, %v122_v0 }
  0xab   :  { %693 = vrot.lane.b32.xlu1 %v147_v34, %s3003_s17  ;;  %723 = vrot.lane.b32.xlu0 %v132_v32, %s3006_s22 }
  0xb3   :  { %170 = vrot.lane.b32.xlu0 %v148_v31, %s3007_s23 }
  0xbb   :  { %2679 = vrot.lane.b32.xlu0 %v2678_v35, %s3007_s23 }
  0xc3   :  { %1281 = vrot.lane.b32.xlu0 %v3199_v2, %s3004_s18 }
  0xf3   :  { %v696_v37 = vpop.permute.xlu2 %695 }
  0xfb   :  { %v732_v38 = vpop.permute.xlu2 %731 }
  0xfc   :  { %2576 = vmatpush.xpose.msk.msrb.mxu1 %vm165_vm1, %v732_v38 }
 0x103   :  { %v722_v45 = vpop.permute.xlu2 %721 }
 0x105   :  { %v202_v39 = vpop.permute.xlu0 %201 }
 0x106   :  { %725 = vrot.lane.b32.xlu1 %v202_v39, %s3006_s22 }
 0x10d   :  { %v208_v40 = vpop.permute.xlu1 %207  ;;  %v204_v41 = vpop.permute.xlu0 %203 }
 0x10e   :  { %168 = vrot.lane.b32.xlu1 %v147_v34, %s3007_s23  ;;  %2547 = vmatpush.xpose.msk.msrb.mxu0 %vm165_vm1, %v208_v40 }
 0x10f   :  { %2664 = vmatpush.xpose.msk.msra.mxu3 %vm165_vm1, %v208_v40  ;;  %727 = vrot.lane.b32.xlu2 %v204_v41, %s3006_s22 }
 0x115   :  { %v206_v43 = vpop.permute.xlu1 %205  ;;  %v730_v44 = vpop.permute.xlu0 %729 }
 0x116   :  { %2684 = vrot.lane.b32.xlu1 %v2683_v42, %s3005_s21  ;;  %2548 = vmatpush.xpose.msk.msrb.mxu0 %vm165_vm1, %v206_v43 }
 0x117   :  { %2665 = vmatpush.xpose.msk.msra.mxu3 %vm165_vm1, %v206_v43  ;;  %2689 = vrot.lane.b32.xlu2 %v2678_v35, %s3003_s17 }
 0x118   :  { %2577 = vmatpush.xpose.msk.msrb.mxu1 %vm165_vm1, %v730_v44 }
 0x119   :  { %2549 = vmatmul.msk.f32.vlgmr.msrb.gmra.mxu0 %vm165_vm1, %v131_v24  ;;  %v137_v24 = vadd.s32 8, %v136_v16 }
 0x11a   :  { %2573 = vmatpush.xpose.msk.msra.mxu0 %vm165_vm1, %v696_v37  ;;  %2550 = vmatmul.msk.f32.vlgmr.msra.gmra.mxu3 %vm165_vm1, %v132_v32 }
 0x11b   :  { %2578 = vmatmul.msk.f32.vlgmr.msrb.gmra.mxu1 %vm165_vm1, %v722_v45  ;;  %vm141_vm3 = vcmp.le.s32.totalorder %v3213_v17, %v137_v24 }
 0x11c   :  { %v3230_v31 = vsel %vm141_vm3, 1.0, %v4765_v19 }
 0x11d   :  { %v694_v46 = vpop.permute.xlu1 %693  ;;  %v724_v47 = vpop.permute.xlu0 %723 }
 0x11e   :  { %2574 = vmatpush.xpose.msk.msra.mxu0 %vm165_vm1, %v694_v46  ;;  %1279 = vrot.lane.b32.xlu1 %v3184_v59, %s3004_s18 }
 0x11f   :  { %1275 = vrot.lane.b32.xlu2 %v3184_v59, %s3002_s12 }
 0x121   :  { %2575 = vmatmul.msk.f32.vlgmr.msra.gmra.mxu0 %vm165_vm1, %v3008_v48 }
 0x122   :  { %2551 = vmatmul.msk.f32.gmra.mxu3 %vm165_vm1, %v202_v39 }
 0x123   :  { %2579 = vmatmul.msk.f32.gmra.mxu1 %vm165_vm1, %v724_v47 }
 0x125   :  { %v171_v49 = vpop.permute.xlu0 %170 }
 0x126   :  { %2544 = vmatpush.xpose.msk.msra.mxu2 %vm165_vm1, %v171_v49 }
 0x127   :  { %1277 = vrot.lane.b32.xlu2 %v3199_v2, %s3002_s12 }
 0x12a   :  { %2552 = vmatmul.msk.f32.gmra.mxu3 %vm165_vm1, %v204_v41 }
 0x12d   :  { %v2680_v50 = vpop.permute.xlu0 %2679 }
 0x12e   :  { %v2681_v51 = vunpack.i.l.bf16 %v2680_v50  ;;  %v2682_v52 = vunpack.i.h.bf16 %v2680_v50 }
 0x130   :  { %546 = vmatpush.msrb.mxu3 %v2681_v51 }
 0x132   :  { %547 = vmatpush.msrb.mxu3 %v2682_v52 }
 0x135   :  { %v1282_v54 = vpop.permute.xlu0 %1281 }
 0x169   :  { %v728_v3 = vpop.permute.xlu2 %727 }
 0x171   :  { %v2690_v4 = vpop.permute.xlu2 %2689 }
 0x172   :  { %v2691_v5 = vunpack.i.l.bf16 %v2690_v4  ;;  %v2692_v6 = vunpack.i.h.bf16 %v2690_v4 }
 0x174   :  { %1070 = vmatpush.msrb.mxu0 %v2691_v5  ;;  %v692_v15 = vsel %vm165_vm1, %v2691_v5, %v171_v49 }
 0x176   :  { %1071 = vmatpush.msrb.mxu0 %v2692_v6 }
 0x178   :  { %v726_v7 = vpop.permute.xlu1 %725 }
 0x179   :  { %2580 = vmatmul.msk.f32.gmra.mxu1 %vm165_vm1, %v726_v7  ;;  %v3306_v7 = vpop.permute.xlu2 %1275 }
 0x180   :  { %v169_v8 = vpop.permute.xlu1 %168 }
 0x181   :  { %2545 = vmatpush.xpose.msk.msra.mxu2 %vm165_vm1, %v169_v8  ;;  %2581 = vmatmul.msk.f32.gmra.mxu1 %vm165_vm1, %v728_v3  ;;  %v691_v18 = vsel %vm165_vm1, %v2692_v6, %v169_v8 }
 0x184   :  { %2546 = vmatmul.msk.f32.vlgmr.msra.gmra.mxu2 %vm165_vm1, %v3008_v48 }
 0x188   :  { %v2685_v9 = vpop.permute.xlu1 %2684 }
 0x189   :  { %v2687_v10 = vunpack.i.h.bf16 %v2685_v9  ;;  %v2686_v11 = vunpack.i.l.bf16 %v2685_v9 }
 0x18b   :  { %v167_v12 = vsel %vm165_vm1, %v2681_v51, %v2686_v11  ;;  %v166_v14 = vsel %vm165_vm1, %v2682_v52, %v2687_v10  ;;  %v3268_v52 = vmul.f32 %v3190_v60, %v3190_v60 }
 0x18c   :  { %304 = vmatpush.msrb.mxu2 %v167_v12 }
 0x18e   :  { %305 = vmatpush.msrb.mxu2 %v166_v14 }
 0x190   :  { %828 = vmatpush.msra.mxu2 %v692_v15  ;;  %v1280_v55 = vpop.permute.xlu1 %1279 }
 0x192   :  { %829 = vmatpush.msra.mxu2 %v691_v18 }
 0x196   :  { %v238_v22 = vpop.f32.mrf.mxu0 }
 0x197   :  { %v250_v23 = vmax.f32 %v238_v22, 0.0  ;;  %v1278_v22 = vpop.permute.xlu2 %1277 }
 0x198   :  { %v762_v25 = vpop.f32.mrf.mxu1 }
 0x199   :  { %v3221_v26 = vmul.f32 %v3218_v21, %v250_v23  ;;  %v774_v28 = vmax.f32 %v762_v25, 0.0  ;;  %v3344_v23 = vcvt.s32.f32 %v3213_v17 }
 0x19b   :  { %2553 = vmatmul.msk.f32.vlgmr.msrb.gmra.mxu2 %vm165_vm1, %v3221_v26  ;;  %v3227_v29 = vmul.f32 %v3218_v21, %v774_v28  ;;  %vm407_vm8 = vcmp.gt.f32.partialorder %v3221_v26, 0.2 }
 0x19c   :  { %2605 = vmatpush.xpose.msk.msrb.mxu2 %vm165_vm1, %v1282_v54 }
 0x19d   :  { %v241_v30 = vpop.f32.mrf.mxu3  ;;  %vm931_vm4 = vcmp.gt.f32.partialorder %v3227_v29, 0.2 }
 0x19e   :  { %v251_v32 = vmax.f32 %v241_v30, 0.0  ;;  %v718_v33 = vpop.f32.mrf.mxu0 }
 0x19f   :  { %v935_v34 = vperm.slane %v718_v33, 0 }
 0x1a0   :  { %v765_v35 = vpop.f32.mrf.mxu1  ;;  %v3234_v36 = vmul.f32 %v3230_v31, %v251_v32  ;;  %2606 = vmatpush.xpose.msk.msrb.mxu2 %vm165_vm1, %v1280_v55 }
 0x1a1   :  { %v775_v37 = vmax.f32 %v765_v35, 0.0  ;;  %v3236_v38 = vsel %vm931_vm4, %v935_v34, -1e+30  ;;  %v3252_v45 = vsel %vm931_vm4, %v935_v34, 1e+30 }
 0x1a2   :  { %v944_v39 = vsel %vm165_vm1, %v3236_v38, -inf  ;;  %v976_v47 = vsel %vm165_vm1, %v3252_v45, inf  ;;  %vm408_vm10 = vcmp.gt.f32.partialorder %v3234_v36, 0.2 }
 0x1a3   :  { %v3241_v40 = vmul.f32 %v3230_v31, %v775_v37  ;;  %2554 = vmatmul.msk.f32.gmra.mxu2 %vm165_vm1, %v3234_v36  ;;  %945 = vmax.xlane.f32.xlu2 %v944_v39 }
 0x1a5   :  { %v244_v41 = vpop.f32.mrf.mxu3  ;;  %vm932_vm5 = vcmp.gt.f32.partialorder %v3241_v40, 0.2 }
 0x1a6   :  { %v252_v42 = vmax.f32 %v244_v41, 0.0  ;;  %v3248_v43 = vsel %vm932_vm5, %v935_v34, -1e+30  ;;  %v3282_v56 = vsel %vm932_vm5, %v935_v34, 1e+30 }
 0x1a7   :  { %v947_v44 = vsel %vm165_vm1, %v3248_v43, -inf  ;;  %v979_v57 = vsel %vm165_vm1, %v3282_v56, inf }
 0x1a8   :  { %948 = vmax.xlane.f32.xlu0 %v947_v44  ;;  %v3255_v46 = vmul.f32 %v3218_v21, %v252_v42 }
 0x1aa   :  { %vm409_vm9 = vcmp.gt.f32.partialorder %v3255_v46, 0.2 }
 0x1ab   :  { %2555 = vmatmul.msk.f32.gmra.mxu2 %vm165_vm1, %v3255_v46  ;;  %977 = vmin.xlane.f32.xlu2 %v976_v47 }
 0x1ad   :  { %v247_v49 = vpop.f32.mrf.mxu3 }
 0x1ae   :  { %v253_v50 = vmax.f32 %v247_v49, 0.0 }
 0x1b0   :  { %v3262_v51 = vmul.f32 %v3230_v31, %v253_v50 }
 0x1b2   :  { %vm410_vm11 = vcmp.gt.f32.partialorder %v3262_v51, 0.2 }
 0x1b3   :  { %2556 = vmatmul.msk.f32.gmra.mxu2 %vm165_vm1, %v3262_v51 }
 0x1bb   :  { %2582 = vmatmul.msk.f32.vlgmr.msra.gmra.mxu2 %vm165_vm1, %v3227_v29 }
 0x1bc   :  { %1767 = vrot.lane.b32.xlu0 %v3268_v52, %s3003_s17 }
 0x1c3   :  { %2583 = vmatmul.msk.f32.gmra.mxu2 %vm165_vm1, %v3241_v40  ;;  %1803 = vrot.lane.b32.xlu2 %v3199_v2, %s3005_s21 }
 0x1e6   :  { %980 = vmin.xlane.f32.xlu0 %v979_v57 }
 0x1f6   :  { %v768_v58 = vpop.f32.mrf.mxu1 }
 0x1f7   :  { %v776_v61 = vmax.f32 %v768_v58, 0.0  ;;  %v3379_v58 = vmul.f32 %v3175_v53, %v3175_v53 }
 0x1f9   :  { %v3287_v62 = vmul.f32 %v3218_v21, %v776_v61 }
 0x1fb   :  { %2584 = vmatmul.msk.f32.gmra.mxu2 %vm165_vm1, %v3287_v62  ;;  %vm933_vm6 = vcmp.gt.f32.partialorder %v3287_v62, 0.2 }
 0x1fc   :  { %v3292_v63 = vsel %vm933_vm6, %v935_v34, -1e+30  ;;  %v3294_v0 = vsel %vm933_vm6, %v935_v34, 1e+30 }
 0x1fd   :  { %v950_v1 = vsel %vm165_vm1, %v3292_v63, -inf  ;;  %v982_v3 = vsel %vm165_vm1, %v3294_v0, inf }
 0x1fe   :  { %v771_v4 = vpop.f32.mrf.mxu1  ;;  %951 = vmax.xlane.f32.xlu1 %v950_v1  ;;  %983 = vmin.xlane.f32.xlu0 %v982_v3 }
 0x1ff   :  { %v777_v5 = vmax.f32 %v771_v4, 0.0 }
 0x201   :  { %v3301_v6 = vmul.f32 %v3230_v31, %v777_v5 }
 0x203   :  { %2585 = vmatmul.msk.f32.gmra.mxu2 %vm165_vm1, %v3301_v6  ;;  %vm934_vm7 = vcmp.gt.f32.partialorder %v3301_v6, 0.2 }
 0x204   :  { %v939_v8 = vsel %vm934_vm7, %v935_v34, -1e+30  ;;  %v3308_v9 = vsel %vm934_vm7, %v935_v34, 1e+30 }
 0x205   :  { %v953_v10 = vsel %vm165_vm1, %v939_v8, -inf  ;;  %v985_v11 = vsel %vm165_vm1, %v3308_v9, inf }
 0x206   :  { %954 = vmax.xlane.f32.xlu2 %v953_v10  ;;  %986 = vmin.xlane.f32.xlu0 %v985_v11 }
 0x207   :  { %v196_v12 = vpop.f32.mrf.mxu2 }
 0x208   :  { %v3313_v13 = vperm.slane %v196_v12, 0 }
 0x20a   :  { %v3324_v14 = vsel %vm408_vm10, %v3313_v13, -1e+30  ;;  %v3329_v15 = vsel %vm407_vm8, %v3313_v13, 1e+30  ;;  %v3334_v16 = vsel %vm409_vm9, %v3313_v13, 1e+30 }
 0x20b   :  { %2607 = vmatmul.msk.f32.vlgmr.msrb.gmra.mxu2 %vm165_vm1, %v3184_v59  ;;  %v3339_v18 = vsel %vm410_vm11, %v3313_v13, 1e+30  ;;  %v412_v5 = vsel %vm407_vm8, %v3313_v13, -1e+30  ;;  %v3415_v10 = vsel %vm409_vm9, %v3313_v13, -1e+30 }
 0x20c   :  { %v426_v11 = vsel %vm165_vm1, %v3415_v10, -inf  ;;  %v3424_v12 = vsel %vm408_vm10, %v3313_v13, 1e+30 }
 0x213   :  { %2608 = vmatmul.msk.f32.gmra.mxu2 %vm165_vm1, %v3199_v2 }
 0x216   :  { %v946_v24 = vpop.xlane.xlu2 %945 }
 0x217   :  { %vm956_vm12 = vcmp.eq.f32.partialorder %v3236_v38, %v946_v24 }
 0x218   :  { %v960_v25 = vsel %vm956_vm12, %v3344_v23, 16.0 }
 0x219   :  { %v964_v28 = vsel %vm165_vm1, %v960_v25, inf }
 0x21a   :  { %965 = vmin.xlane.f32.xlu1 %v964_v28 }
 0x21b   :  { %v949_v30 = vpop.xlane.xlu0 %948  ;;  %2609 = vmatmul.msk.f32.gmra.mxu2 %vm165_vm1, %v3306_v7 }
 0x21c   :  { %vm957_vm13 = vcmp.eq.f32.partialorder %v3248_v43, %v949_v30 }
 0x21d   :  { %v961_v17 = vsel %vm957_vm13, %v3344_v23, 16.0 }
 0x21e   :  { %1247 = vrot.lane.b32.xlu2 %v3268_v52, %s3007_s23  ;;  %v978_v32 = vpop.xlane.xlu2 %977  ;;  %v967_v35 = vsel %vm165_vm1, %v961_v17, inf }
 0x21f   :  { %vm988_vm14 = vcmp.eq.f32.partialorder %v3252_v45, %v978_v32 }
 0x220   :  { %v992_v33 = vsel %vm988_vm14, %v3344_v23, 16.0 }
 0x221   :  { %v996_v34 = vsel %vm165_vm1, %v992_v33, inf }
 0x222   :  { %997 = vmin.xlane.f32.xlu0 %v996_v34  ;;  %968 = vmin.xlane.f32.xlu1 %v967_v35  ;;  %v423_v34 = vsel %vm165_vm1, %v3324_v14, -inf }
 0x223   :  { %2610 = vmatmul.msk.f32.gmra.mxu2 %vm165_vm1, %v1278_v22 }
 0x226   :  { %v1804_v37 = vpop.permute.xlu2 %1803 }
 0x227   :  { %2634 = vmatpush.xpose.msk.msra.mxu0 %vm165_vm1, %v1804_v37 }
 0x22e   :  { %v1768_v38 = vpop.permute.xlu0 %1767 }
 0x22f   :  { %2631 = vmatpush.xpose.msk.msra.mxu2 %vm165_vm1, %v1768_v38  ;;  %v452_v38 = vsel %vm165_vm1, %v3329_v15, inf }
 0x259   :  { %v981_v39 = vpop.xlane.xlu0 %980 }
 0x25a   :  { %vm989_vm15 = vcmp.eq.f32.partialorder %v3282_v56, %v981_v39 }
 0x25b   :  { %v993_v41 = vsel %vm989_vm15, %v3344_v23, 16.0 }
 0x25c   :  { %v999_v42 = vsel %vm165_vm1, %v993_v41, inf }
 0x25d   :  { %1000 = vmin.xlane.f32.xlu1 %v999_v42  ;;  %v458_v42 = vsel %vm165_vm1, %v3334_v16, inf }
 0x271   :  { %v952_v43 = vpop.xlane.xlu1 %951  ;;  %v984_v44 = vpop.xlane.xlu0 %983 }
 0x272   :  { %vm958_vm2 = vcmp.eq.f32.partialorder %v3292_v63, %v952_v43  ;;  %vm990_vm3 = vcmp.eq.f32.partialorder %v3294_v0, %v984_v44  ;;  %v3458_v43 = vpop.f32.mrf.mxu2 }
 0x273   :  { %v962_v45 = vsel %vm958_vm2, %v3344_v23, 16.0  ;;  %v994_v47 = vsel %vm990_vm3, %v3344_v23, 16.0 }
 0x274   :  { %v970_v49 = vsel %vm165_vm1, %v962_v45, inf  ;;  %v1002_v50 = vsel %vm165_vm1, %v994_v47, inf }
 0x275   :  { %971 = vmin.xlane.f32.xlu1 %v970_v49  ;;  %1003 = vmin.xlane.f32.xlu0 %v1002_v50 }
 0x279   :  { %v955_v54 = vpop.xlane.xlu2 %954  ;;  %v987_v3 = vpop.xlane.xlu0 %986 }
 0x27a   :  { %vm959_vm4 = vcmp.eq.f32.partialorder %v939_v8, %v955_v54  ;;  %vm991_vm7 = vcmp.eq.f32.partialorder %v3308_v9, %v987_v3  ;;  %v420_v8 = vsel %vm165_vm1, %v412_v5, -inf  ;;  %v3461_v44 = vpop.f32.mrf.mxu2 }
 0x27b   :  { %v963_v55 = vsel %vm959_vm4, %v3344_v23, 16.0 }
 0x27c   :  { %v973_v56 = vsel %vm165_vm1, %v963_v55, inf }
 0x27d   :  { %974 = vmin.xlane.f32.xlu2 %v973_v56 }
 0x281   :  { %v3373_v57 = vpop.permute.xlu2 %1247 }
 0x282   :  { %2602 = vmatpush.xpose.msk.msra.mxu1 %vm165_vm1, %v3373_v57  ;;  %v3463_v45 = vpop.f32.mrf.mxu2 }
 0x289   :  { %1245 = vrot.lane.b32.xlu0 %v3379_v58, %s3007_s23 }
 0x28a   :  { %v3465_v49 = vpop.f32.mrf.mxu2 }
 0x28d   :  { %v966_v61 = vpop.xlane.xlu1 %965 }
 0x28e   :  { %vm1008_vm5 = vcmp.eq.f32.partialorder %v3344_v23, %v966_v61  ;;  %1765 = vrot.lane.b32.xlu1 %v3379_v58, %s3003_s17 }
 0x28f   :  { %v2586_v63 = vsel %vm1008_vm5, 1.0, %v4765_v19 }
 0x290   :  { %2594 = vmatmul.msk.f32.vlgmr.msrb.gmra.mxu0 %vm165_vm1, %v2586_v63 }
 0x291   :  { %1795 = vrot.lane.b32.xlu0 %v3199_v2, %s3006_s22  ;;  %v995_v2 = vsel %vm991_vm7, %v3344_v23, 16.0 }
 0x292   :  { %v1005_v4 = vsel %vm165_vm1, %v995_v2, inf  ;;  %v3472_v63 = vpop.f32.mrf.mxu2 }
 0x295   :  { %1801 = vrot.lane.b32.xlu2 %v3184_v59, %s3005_s21  ;;  %v969_v0 = vpop.xlane.xlu1 %968  ;;  %v998_v30 = vpop.xlane.xlu0 %997 }
 0x296   :  { %vm1009_vm6 = vcmp.eq.f32.partialorder %v3344_v23, %v969_v0  ;;  %vm1020_vm10 = vcmp.eq.f32.partialorder %v3344_v23, %v998_v30 }
 0x297   :  { %v2587_v1 = vsel %vm1009_vm6, 1.0, %v4765_v19  ;;  %v2590_v33 = vsel %vm1020_vm10, 1.0, %v4765_v19 }
 0x298   :  { %2595 = vmatmul.msk.f32.gmra.mxu0 %vm165_vm1, %v2587_v1  ;;  %v461_v1 = vsel %vm165_vm1, %v3339_v18, inf }
 0x29a   :  { %v3477_v3 = vpop.f32.mrf.mxu2 }
 0x29d   :  { %1793 = vrot.lane.b32.xlu2 %v3184_v59, %s3006_s22  ;;  %v3408_v59 = vsel %vm410_vm11, %v3313_v13, -1e+30 }
 0x29e   :  { %v429_v9 = vsel %vm165_vm1, %v3408_v59, -inf }
 0x2a5   :  { %1799 = vrot.lane.b32.xlu2 %v1278_v22, %s3006_s22  ;;  %v455_v22 = vsel %vm165_vm1, %v3424_v12, inf }
 0x2b8   :  { %1006 = vmin.xlane.f32.xlu1 %v1005_v4 }
 0x2bb   :  { %421 = vmax.xlane.f32.xlu0 %v420_v8 }
 0x2c3   :  { %430 = vmax.xlane.f32.xlu0 %v429_v9  ;;  %v3483_v9 = vpop.f32.mrf.mxu2 }
 0x2ce   :  { %427 = vmax.xlane.f32.xlu2 %v426_v11 }
 0x2d0   :  { %v1001_v24 = vpop.xlane.xlu1 %1000 }
 0x2d1   :  { %1797 = vrot.lane.b32.xlu1 %v3306_v7, %s3006_s22  ;;  %vm1021_vm11 = vcmp.eq.f32.partialorder %v3344_v23, %v1001_v24 }
 0x2d2   :  { %v2591_v39 = vsel %vm1021_vm11, 1.0, %v4765_v19 }
 0x2d6   :  { %456 = vmin.xlane.f32.xlu2 %v455_v22 }
 0x2e8   :  { %v972_v25 = vpop.xlane.xlu1 %971  ;;  %v1004_v13 = vpop.xlane.xlu0 %1003 }
 0x2e9   :  { %vm1010_vm8 = vcmp.eq.f32.partialorder %v3344_v23, %v972_v25  ;;  %vm1022_vm12 = vcmp.eq.f32.partialorder %v3344_v23, %v1004_v13  ;;  %v3493_v25 = vpop.f32.mrf.mxu2 }
 0x2ea   :  { %v2588_v28 = vsel %vm1010_vm8, 1.0, %v4765_v19  ;;  %v2592_v41 = vsel %vm1022_vm12, 1.0, %v4765_v19 }
 0x2eb   :  { %2596 = vmatmul.msk.f32.gmra.mxu0 %vm165_vm1, %v2588_v28 }
 0x2f0   :  { %v975_v32 = vpop.xlane.xlu2 %974 }
 0x2f1   :  { %vm1011_vm9 = vcmp.eq.f32.partialorder %v3344_v23, %v975_v32  ;;  %v1312_v30 = vpop.f32.mrf.mxu2 }
 0x2f2   :  { %v2589_v7 = vsel %vm1011_vm9, 1.0, %v4765_v19 }
 0x2f3   :  { %2597 = vmatmul.msk.f32.gmra.mxu0 %vm165_vm1, %v2589_v7 }
 0x2f8   :  { %v1802_v17 = vpop.permute.xlu2 %1801 }
 0x2f9   :  { %2635 = vmatpush.xpose.msk.msra.mxu0 %vm165_vm1, %v1802_v17  ;;  %v1315_v32 = vpop.f32.mrf.mxu2 }
 0x2fb   :  { %424 = vmax.xlane.f32.xlu1 %v423_v34  ;;  %2598 = vmatmul.msk.f32.gmra.mxu0 %vm165_vm1, %v2590_v33  ;;  %v3440_v35 = vpop.permute.xlu0 %1245  ;;  %v1324_v34 = vmax.f32 %v1312_v30, 0.0 }
 0x2fc   :  { %2603 = vmatpush.xpose.msk.msra.mxu1 %vm165_vm1, %v3440_v35 }
 0x2ff   :  { %2604 = vmatmul.msk.f32.vlgmr.msra.gmra.mxu1 %vm165_vm1, %v3008_v48 }
 0x300   :  { %v1766_v37 = vpop.permute.xlu1 %1765  ;;  %v1794_v55 = vpop.permute.xlu2 %1793 }
 0x301   :  { %2632 = vmatpush.xpose.msk.msra.mxu2 %vm165_vm1, %v1766_v37  ;;  %v1318_v13 = vpop.f32.mrf.mxu2 }
 0x303   :  { %453 = vmin.xlane.f32.xlu1 %v452_v38  ;;  %2599 = vmatmul.msk.f32.gmra.mxu0 %vm165_vm1, %v2591_v39  ;;  %v1796_v47 = vpop.permute.xlu0 %1795 }
 0x304   :  { %2633 = vmatmul.msk.f32.vlgmr.msra.gmra.mxu2 %vm165_vm1, %v3008_v48 }
 0x308   :  { %v1800_v0 = vpop.permute.xlu2 %1799 }
 0x309   :  { %v1321_v38 = vpop.f32.mrf.mxu2 }
 0x30b   :  { %459 = vmin.xlane.f32.xlu1 %v458_v42  ;;  %2600 = vmatmul.msk.f32.gmra.mxu0 %vm165_vm1, %v2592_v41 }
 0x30d   :  { %v3495_v28 = vpop.f32.mrf.mxu0 }
 0x32b   :  { %v1007_v48 = vpop.xlane.xlu1 %1006 }
 0x32c   :  { %vm1023_vm13 = vcmp.eq.f32.partialorder %v3344_v23, %v1007_v48  ;;  %v3512_v48 = vmul.f32 %v3218_v21, %v1324_v34 }
 0x32d   :  { %v2593_v50 = vsel %vm1023_vm13, 1.0, %v4765_v19 }
 0x32e   :  { %2601 = vmatmul.msk.f32.gmra.mxu0 %vm165_vm1, %v2593_v50  ;;  %v422_v54 = vpop.xlane.xlu0 %421  ;;  %v1327_v50 = vmax.f32 %v1321_v38, 0.0  ;;  %vm1481_vm6 = vcmp.gt.f32.partialorder %v3512_v48, 0.2 }
 0x32f   :  { %vm432_vm14 = vcmp.eq.f32.partialorder %v412_v5, %v422_v54 }
 0x330   :  { %v436_v56 = vsel %vm432_vm14, %v3344_v23, 16.0 }
 0x331   :  { %v440_v61 = vsel %vm165_vm1, %v436_v56, inf  ;;  %v3519_v56 = vmul.f32 %v3230_v31, %v1327_v50 }
 0x332   :  { %441 = vmin.xlane.f32.xlu0 %v440_v61 }
 0x333   :  { %vm1484_vm8 = vcmp.gt.f32.partialorder %v3519_v56, 0.2 }
 0x336   :  { %2636 = vmatmul.msk.f32.vlgmr.msra.gmra.mxu0 %vm165_vm1, %v1794_v55  ;;  %v431_v4 = vpop.xlane.xlu0 %430 }
 0x337   :  { %vm435_vm2 = vcmp.eq.f32.partialorder %v3408_v59, %v431_v4  ;;  %v3497_v59 = vpop.f32.mrf.mxu0 }
 0x338   :  { %v439_v22 = vsel %vm435_vm2, %v3344_v23, 16.0 }
 0x339   :  { %v449_v24 = vsel %vm165_vm1, %v439_v22, inf  ;;  %v1325_v22 = vmax.f32 %v1315_v32, 0.0 }
 0x33a   :  { %462 = vmin.xlane.f32.xlu0 %v461_v1 }
 0x33b   :  { %v3551_v30 = vmul.f32 %v3230_v31, %v1325_v22 }
 0x33d   :  { %vm1482_vm10 = vcmp.gt.f32.partialorder %v3551_v30, 0.2 }
 0x33e   :  { %2637 = vmatmul.msk.f32.gmra.mxu0 %vm165_vm1, %v1796_v47  ;;  %v1326_v47 = vmax.f32 %v1318_v13, 0.0 }
 0x340   :  { %v3516_v55 = vmul.f32 %v3218_v21, %v1326_v47 }
 0x341   :  { %v428_v2 = vpop.xlane.xlu2 %427 }
 0x342   :  { %vm434_vm15 = vcmp.eq.f32.partialorder %v3415_v10, %v428_v2  ;;  %v2698_v10 = vpack.i.bf16 %v3379_v58, %v3268_v52  ;;  %vm1483_vm7 = vcmp.gt.f32.partialorder %v3516_v55, 0.2 }
 0x343   :  { %v438_v5 = vsel %vm434_vm15, %v3344_v23, 16.0  ;;  %v1798_v11 = vpop.permute.xlu1 %1797 }
 0x344   :  { %v446_v8 = vsel %vm165_vm1, %v438_v5, inf }
 0x345   :  { %447 = vmin.xlane.f32.xlu1 %v446_v8 }
 0x346   :  { %2638 = vmatmul.msk.f32.gmra.mxu0 %vm165_vm1, %v1798_v11 }
 0x349   :  { %v457_v39 = vpop.xlane.xlu2 %456 }
 0x34a   :  { %vm465_vm5 = vcmp.eq.f32.partialorder %v3424_v12, %v457_v39 }
 0x34b   :  { %v469_v61 = vsel %vm465_vm5, %v3344_v23, 16.0 }
 0x34c   :  { %v475_v5 = vsel %vm165_vm1, %v469_v61, inf }
 0x34d   :  { %450 = vmin.xlane.f32.xlu1 %v449_v24 }
 0x34e   :  { %2639 = vmatmul.msk.f32.gmra.mxu0 %vm165_vm1, %v1800_v0  ;;  %2699 = vrot.lane.b32.xlu0 %v2698_v10, %s3005_s21 }
 0x368   :  { %v3499_v7 = vpop.f32.mrf.mxu0 }
 0x36e   :  { %v425_v17 = vpop.xlane.xlu1 %424 }
 0x36f   :  { %vm433_vm3 = vcmp.eq.f32.partialorder %v3324_v14, %v425_v17 }
 0x370   :  { %v3502_v52 = vpop.f32.mrf.mxu0  ;;  %v437_v58 = vsel %vm433_vm3, %v3344_v23, 16.0 }
 0x371   :  { %v443_v33 = vsel %vm165_vm1, %v437_v58, inf }
 0x372   :  { %444 = vmin.xlane.f32.xlu2 %v443_v33 }
 0x376   :  { %v454_v37 = vpop.xlane.xlu1 %453 }
 0x377   :  { %vm464_vm4 = vcmp.eq.f32.partialorder %v3329_v15, %v454_v37 }
 0x378   :  { %v3507_v41 = vpop.f32.mrf.mxu0  ;;  %v468_v42 = vsel %vm464_vm4, %v3344_v23, 16.0 }
 0x379   :  { %v472_v14 = vsel %vm165_vm1, %v468_v42, inf }
 0x37a   :  { %473 = vmin.xlane.f32.xlu1 %v472_v14 }
 0x37c   :  { %v1270_v54 = vpop.f32.mrf.mxu1 }
 0x37d   :  { %v1485_v15 = vperm.slane %v1270_v54, 0 }
 0x37e   :  { %v460_v1 = vpop.xlane.xlu1 %459 }
 0x37f   :  { %v3525_v0 = vsel %vm1481_vm6, %v1485_v15, -1e+30  ;;  %v3538_v8 = vsel %vm1483_vm7, %v1485_v15, 1e+30  ;;  %vm466_vm9 = vcmp.eq.f32.partialorder %v3334_v16, %v460_v1  ;;  %v3543_v11 = vsel %vm1484_vm8, %v1485_v15, 1e+30 }
 0x380   :  { %v3527_v2 = vpop.f32.mrf.mxu0  ;;  %v1494_v12 = vsel %vm165_vm1, %v3525_v0, -inf  ;;  %v3547_v24 = vsel %vm1481_vm6, %v1485_v15, 1e+30  ;;  %v470_v10 = vsel %vm466_vm9, %v3344_v23, 16.0  ;;  %v3563_v58 = vsel %vm1482_vm10, %v1485_v15, -1e+30 }
 0x381   :  { %1495 = vmax.xlane.f32.xlu2 %v1494_v12  ;;  %v1526_v17 = vsel %vm165_vm1, %v3547_v24, inf  ;;  %v478_v32 = vsel %vm165_vm1, %v470_v10, inf  ;;  %v1497_v33 = vsel %vm165_vm1, %v3563_v58, -inf  ;;  %v3569_v34 = vsel %vm1483_vm7, %v1485_v15, -1e+30 }
 0x382   :  { %476 = vmin.xlane.f32.xlu1 %v475_v5  ;;  %v1500_v37 = vsel %vm165_vm1, %v3569_v34, -inf  ;;  %v3575_v38 = vsel %vm1484_vm8, %v1485_v15, -1e+30 }
 0x383   :  { %v1503_v39 = vsel %vm165_vm1, %v3575_v38, -inf }
 0x387   :  { %v1790_v12 = vpop.f32.mrf.mxu2 }
 0x388   :  { %v3553_v13 = vpop.f32.mrf.mxu0  ;;  %v2007_v10 = vperm.slane %v1790_v12, 0 }
 0x389   :  { %1527 = vmin.xlane.f32.xlu2 %v1526_v17  ;;  %v3591_v17 = vsel %vm1482_vm10, %v1485_v15, 1e+30 }
 0x38a   :  { %479 = vmin.xlane.f32.xlu1 %v478_v32 }
 0x391   :  { %1498 = vmax.xlane.f32.xlu2 %v1497_v33  ;;  %v2693_v33 = vpack.i.bf16 %v3175_v53, %v3190_v60 }
 0x399   :  { %1501 = vmax.xlane.f32.xlu2 %v1500_v37 }
 0x3a1   :  { %1504 = vmax.xlane.f32.xlu2 %v1503_v39 }
 0x3a5   :  { %v442_v42 = vpop.xlane.xlu0 %441 }
 0x3a6   :  { %vm484_vm11 = vcmp.eq.f32.partialorder %v3344_v23, %v442_v42 }
 0x3a7   :  { %v2557_v47 = vsel %vm484_vm11, 1.0, %v4765_v19 }
 0x3a8   :  { %2565 = vmatmul.msk.f32.vlgmr.msrb.gmra.mxu3 %vm165_vm1, %v2557_v47 }
 0x3ab   :  { %v3582_v14 = vpop.f32.mrf.mxu0 }
 0x3ad   :  { %v463_v54 = vpop.xlane.xlu0 %462 }
 0x3ae   :  { %vm467_vm12 = vcmp.eq.f32.partialorder %v3339_v18, %v463_v54  ;;  %v1529_v18 = vsel %vm165_vm1, %v3591_v17, inf }
 0x3af   :  { %v471_v61 = vsel %vm467_vm12, %v3344_v23, 16.0 }
 0x3b0   :  { %v481_v1 = vsel %vm165_vm1, %v471_v61, inf }
 0x3b1   :  { %482 = vmin.xlane.f32.xlu1 %v481_v1 }
 0x3b3   :  { %v1834_v5 = vpop.f32.mrf.mxu0 }
 0x3b4   :  { %v1846_v22 = vmax.f32 %v1834_v5, 0.0 }
 0x3b6   :  { %v3594_v32 = vmul.f32 %v3218_v21, %v1846_v22 }
 0x3b8   :  { %vm2003_vm13 = vcmp.gt.f32.partialorder %v3594_v32, 0.2 }
 0x3b9   :  { %2694 = vrot.lane.b32.xlu2 %v2693_v33, %s3007_s23  ;;  %1530 = vmin.xlane.f32.xlu1 %v1529_v18  ;;  %v3602_v37 = vsel %vm2003_vm13, %v2007_v10, -1e+30  ;;  %v3606_v47 = vsel %vm2003_vm13, %v2007_v10, 1e+30 }
 0x3ba   :  { %v2016_v15 = vsel %vm165_vm1, %v3602_v37, -inf  ;;  %v2048_v61 = vsel %vm165_vm1, %v3606_v47, inf }
 0x3bb   :  { %v1837_v39 = vpop.f32.mrf.mxu0  ;;  %2017 = vmax.xlane.f32.xlu0 %v2016_v15 }
 0x3bc   :  { %v1847_v42 = vmax.f32 %v1837_v39, 0.0 }
 0x3be   :  { %v3609_v54 = vmul.f32 %v3230_v31, %v1847_v42 }
 0x3c0   :  { %vm2004_vm14 = vcmp.gt.f32.partialorder %v3609_v54, 0.2 }
 0x3c1   :  { %v3619_v22 = vsel %vm2004_vm14, %v2007_v10, -1e+30 }
 0x3c2   :  { %v2019_v15 = vsel %vm165_vm1, %v3619_v22, -inf }
 0x3c3   :  { %v1840_v1 = vpop.f32.mrf.mxu0  ;;  %2049 = vmin.xlane.f32.xlu0 %v2048_v61 }
 0x3c4   :  { %v1848_v12 = vmax.f32 %v1840_v1, 0.0 }
 0x3c6   :  { %v3615_v5 = vmul.f32 %v3218_v21, %v1848_v12 }
 0x3c8   :  { %vm2005_vm15 = vcmp.gt.f32.partialorder %v3615_v5, 0.2 }
 0x3c9   :  { %v3622_v18 = vsel %vm2005_vm15, %v2007_v10, 1e+30  ;;  %v3629_v1 = vsel %vm2005_vm15, %v2007_v10, -1e+30 }
 0x3ca   :  { %v2022_v12 = vsel %vm165_vm1, %v3629_v1, -inf }
 0x3cb   :  { %v1843_v39 = vpop.f32.mrf.mxu0  ;;  %2020 = vmax.xlane.f32.xlu0 %v2019_v15  ;;  %v448_v15 = vpop.xlane.xlu1 %447 }
 0x3cc   :  { %v1849_v42 = vmax.f32 %v1843_v39, 0.0  ;;  %vm486_vm4 = vcmp.eq.f32.partialorder %v3344_v23, %v448_v15 }
 0x3cd   :  { %v2559_v16 = vsel %vm486_vm4, 1.0, %v4765_v19 }
 0x3ce   :  { %v3627_v61 = vmul.f32 %v3230_v31, %v1849_v42 }
 0x3d0   :  { %vm2006_vm2 = vcmp.gt.f32.partialorder %v3627_v61, 0.2 }
 0x3d1   :  { %v3632_v21 = vsel %vm2006_vm2, %v2007_v10, 1e+30  ;;  %v3636_v4 = vsel %vm2006_vm2, %v2007_v10, -1e+30 }
 0x3d2   :  { %v2025_v50 = vsel %vm165_vm1, %v3636_v4, -inf }
 0x3d3   :  { %2023 = vmax.xlane.f32.xlu0 %v2022_v12  ;;  %v451_v42 = vpop.xlane.xlu1 %450 }
 0x3d4   :  { %vm487_vm5 = vcmp.eq.f32.partialorder %v3344_v23, %v451_v42 }
 0x3d5   :  { %v2560_v53 = vsel %vm487_vm5, 1.0, %v4765_v19 }
 0x3db   :  { %2026 = vmax.xlane.f32.xlu0 %v2025_v50 }
 0x3e5   :  { %v445_v39 = vpop.xlane.xlu2 %444 }
 0x3e6   :  { %vm485_vm3 = vcmp.eq.f32.partialorder %v3344_v23, %v445_v39 }
 0x3e7   :  { %v2558_v31 = vsel %vm485_vm3, 1.0, %v4765_v19 }
 0x3e8   :  { %2566 = vmatmul.msk.f32.gmra.mxu3 %vm165_vm1, %v2558_v31 }
 0x3ed   :  { %v474_v12 = vpop.xlane.xlu1 %473 }
 0x3ee   :  { %vm496_vm7 = vcmp.eq.f32.partialorder %v3344_v23, %v474_v12  ;;  %v1532_v12 = vsel %vm165_vm1, %v3538_v8, inf }
 0x3ef   :  { %2704 = vrot.lane.b32.xlu0 %v2693_v33, %s3003_s17  ;;  %v2561_v15 = vsel %vm496_vm7, 1.0, %v4765_v19 }
 0x3f0   :  { %2567 = vmatmul.msk.f32.gmra.mxu3 %vm165_vm1, %v2559_v16  ;;  %v3658_v16 = vsel %vm2004_vm14, %v2007_v10, 1e+30 }
 0x3f1   :  { %v2051_v42 = vsel %vm165_vm1, %v3658_v16, inf }
 0x3f4   :  { %v1496_v50 = vpop.xlane.xlu2 %1495 }
 0x3f5   :  { %vm1506_vm6 = vcmp.eq.f32.partialorder %v3525_v0, %v1496_v50  ;;  %v477_v0 = vpop.xlane.xlu1 %476 }
 0x3f6   :  { %v1510_v39 = vsel %vm1506_vm6, %v3344_v23, 16.0  ;;  %vm497_vm8 = vcmp.eq.f32.partialorder %v3344_v23, %v477_v0 }
 0x3f7   :  { %v1514_v31 = vsel %vm165_vm1, %v1510_v39, inf  ;;  %v2562_v50 = vsel %vm497_vm8, 1.0, %v4765_v19 }
 0x3f8   :  { %2568 = vmatmul.msk.f32.gmra.mxu3 %vm165_vm1, %v2560_v53  ;;  %1515 = vmin.xlane.f32.xlu1 %v1514_v31 }
 0x3fc   :  { %v3654_v33 = vpop.xlane.xlu2 %1527 }
 0x3fd   :  { %v480_v10 = vpop.xlane.xlu1 %479  ;;  %vm1538_vm4 = vcmp.eq.f32.partialorder %v3547_v24, %v3654_v33 }
 0x3fe   :  { %vm498_vm10 = vcmp.eq.f32.partialorder %v3344_v23, %v480_v10 }
 0x400   :  { %2569 = vmatmul.msk.f32.gmra.mxu3 %vm165_vm1, %v2561_v15  ;;  %2052 = vmin.xlane.f32.xlu1 %v2051_v42  ;;  %v2563_v15 = vsel %vm498_vm10, 1.0, %v4765_v19 }
 0x404   :  { %v1499_v53 = vpop.xlane.xlu2 %1498 }
 0x405   :  { %vm1507_vm9 = vcmp.eq.f32.partialorder %v3563_v58, %v1499_v53  ;;  %v2054_v58 = vsel %vm165_vm1, %v3622_v18, inf  ;;  %v2700_v53 = vpop.permute.xlu0 %2699 }
 0x406   :  { %v1511_v31 = vsel %vm1507_vm9, %v3344_v23, 16.0  ;;  %v2701_v10 = vunpack.i.l.bf16 %v2700_v53 }
 0x407   :  { %v1517_v0 = vsel %vm165_vm1, %v1511_v31, inf }
 0x408   :  { %2570 = vmatmul.msk.f32.gmra.mxu3 %vm165_vm1, %v2562_v50  ;;  %1533 = vmin.xlane.f32.xlu1 %v1532_v12  ;;  %v1535_v50 = vsel %vm165_vm1, %v3543_v11, inf }
 0x40c   :  { %v1502_v39 = vpop.xlane.xlu2 %1501 }
 0x40d   :  { %vm1508_vm14 = vcmp.eq.f32.partialorder %v3569_v34, %v1502_v39 }
 0x410   :  { %2571 = vmatmul.msk.f32.gmra.mxu3 %vm165_vm1, %v2563_v15  ;;  %1518 = vmin.xlane.f32.xlu1 %v1517_v0  ;;  %v2702_v15 = vunpack.i.h.bf16 %v2700_v53  ;;  %v2057_v0 = vsel %vm165_vm1, %v3632_v21, inf  ;;  %v4795_v53 = vmov 0.0  }
 0x414   :  { %v1505_v42 = vpop.xlane.xlu2 %1504 }
 0x415   :  { %vm1509_vm11 = vcmp.eq.f32.partialorder %v3575_v38, %v1505_v42 }
 0x416   :  { %v1513_v31 = vsel %vm1509_vm11, %v3344_v23, 16.0 }
 0x418   :  { %1536 = vmin.xlane.f32.xlu1 %v1535_v50 }
 0x419   :  { %2055 = vmin.xlane.f32.xlu0 %v2054_v58  ;;  %v1523_v58 = vsel %vm165_vm1, %v1513_v31, inf }
 0x41c   :  { %v2695_v12 = vpop.permute.xlu2 %2694 }
 0x41d   :  { %v2697_v19 = vunpack.i.h.bf16 %v2695_v12  ;;  %v2696_v60 = vunpack.i.l.bf16 %v2695_v12 }
 0x41f   :  { %1620 = vmatpush.msra.mxu3 %v2696_v60  ;;  %v1244_v50 = vsel %vm165_vm1, %v2696_v60, %v2701_v10  ;;  %v1243_v38 = vsel %vm165_vm1, %v2697_v19, %v2702_v15  ;;  %v1512_v15 = vsel %vm1508_vm14, %v3344_v23, 16.0 }
 0x420   :  { %2058 = vmin.xlane.f32.xlu1 %v2057_v0  ;;  %1378 = vmatpush.msrb.mxu1 %v1244_v50  ;;  %v1520_v50 = vsel %vm165_vm1, %v1512_v15, inf }
 0x421   :  { %1621 = vmatpush.msra.mxu3 %v2697_v19  ;;  %1524 = vmin.xlane.f32.xlu0 %v1523_v58 }
 0x422   :  { %1379 = vmatpush.msrb.mxu1 %v1243_v38 }
 0x423   :  { %2611 = vmatmul.msk.f32.vlgmr.msrb.gmra.mxu1 %vm165_vm1, %v3512_v48 }
 0x424   :  { %v483_v42 = vpop.xlane.xlu1 %482 }
 0x425   :  { %vm499_vm12 = vcmp.eq.f32.partialorder %v3344_v23, %v483_v42 }
 0x426   :  { %v2564_v12 = vsel %vm499_vm12, 1.0, %v4795_v53 }
 0x427   :  { %2572 = vmatmul.msk.f32.gmra.mxu3 %vm165_vm1, %v2564_v12 }
 0x42b   :  { %2612 = vmatmul.msk.f32.gmra.mxu1 %vm165_vm1, %v3551_v30 }
 0x42e   :  { %v2018_v60 = vpop.xlane.xlu0 %2017 }
 0x42f   :  { %vm2028_vm13 = vcmp.eq.f32.partialorder %v3602_v37, %v2018_v60  ;;  %v1542_v60 = vsel %vm1538_vm4, %v3344_v23, 16.0 }
 0x430   :  { %v2032_v10 = vsel %vm2028_vm13, %v3344_v23, 16.0 }
 0x431   :  { %v2036_v19 = vsel %vm165_vm1, %v2032_v10, inf }
 0x432   :  { %2037 = vmin.xlane.f32.xlu2 %v2036_v19  ;;  %v1546_v19 = vsel %vm165_vm1, %v1542_v60, inf }
 0x433   :  { %2613 = vmatmul.msk.f32.gmra.mxu1 %vm165_vm1, %v3516_v55 }
 0x436   :  { %v2050_v31 = vpop.xlane.xlu0 %2049 }
 0x437   :  { %vm2060_vm15 = vcmp.eq.f32.partialorder %v3606_v47, %v2050_v31 }
 0x438   :  { %v2064_v0 = vsel %vm2060_vm15, %v3344_v23, 16.0 }
 0x439   :  { %v2068_v37 = vsel %vm165_vm1, %v2064_v0, inf }
 0x43a   :  { %1521 = vmin.xlane.f32.xlu2 %v1520_v50  ;;  %2069 = vmin.xlane.f32.xlu0 %v2068_v37 }
 0x43b   :  { %2614 = vmatmul.msk.f32.gmra.mxu1 %vm165_vm1, %v3519_v56 }
 0x43e   :  { %v2021_v34 = vpop.xlane.xlu0 %2020 }
 0x43f   :  { %vm2029_vm2 = vcmp.eq.f32.partialorder %v3619_v22, %v2021_v34  ;;  %v1531_v22 = vpop.xlane.xlu1 %1530 }
 0x440   :  { %v2033_v39 = vsel %vm2029_vm2, %v3344_v23, 16.0  ;;  %vm1539_vm6 = vcmp.eq.f32.partialorder %v3591_v17, %v1531_v22 }
 0x441   :  { %v2039_v58 = vsel %vm165_vm1, %v2033_v39, inf  ;;  %v1543_v31 = vsel %vm1539_vm6, %v3344_v23, 16.0 }
 0x442   :  { %2040 = vmin.xlane.f32.xlu1 %v2039_v58  ;;  %v1549_v24 = vsel %vm165_vm1, %v1543_v31, inf }
 0x446   :  { %v2024_v47 = vpop.xlane.xlu0 %2023 }
 0x447   :  { %vm2030_vm3 = vcmp.eq.f32.partialorder %v3629_v1, %v2024_v47 }
 0x448   :  { %v2034_v38 = vsel %vm2030_vm3, %v3344_v23, 16.0 }
 0x449   :  { %v2042_v42 = vsel %vm165_vm1, %v2034_v38, inf }
 0x44a   :  { %2043 = vmin.xlane.f32.xlu1 %v2042_v42 }
 0x44e   :  { %v2027_v12 = vpop.xlane.xlu0 %2026 }
 0x44f   :  { %vm2031_vm5 = vcmp.eq.f32.partialorder %v3636_v4, %v2027_v12  ;;  %v3722_v4 = vpop.f32.mrf.mxu3 }
 0x450   :  { %v2035_v10 = vsel %vm2031_vm5, %v3344_v23, 16.0 }
 0x451   :  { %v2045_v1 = vsel %vm165_vm1, %v2035_v10, inf }
 0x452   :  { %1547 = vmin.xlane.f32.xlu1 %v1546_v19  ;;  %2046 = vmin.xlane.f32.xlu2 %v2045_v1 }
 0x45a   :  { %1550 = vmin.xlane.f32.xlu2 %v1549_v24 }
 0x461   :  { %v2705_v33 = vpop.permute.xlu0 %2704 }
 0x462   :  { %v2707_v15 = vunpack.i.h.bf16 %v2705_v33  ;;  %v2706_v0 = vunpack.i.l.bf16 %v2705_v33 }
 0x464   :  { %2142 = vmatpush.msrb.mxu2 %v2706_v0  ;;  %v1764_v50 = vsel %vm165_vm1, %v2706_v0, %v3373_v57  ;;  %v1763_v37 = vsel %vm165_vm1, %v2707_v15, %v3440_v35 }
 0x465   :  { %1900 = vmatpush.msra.mxu1 %v1764_v50 }
 0x466   :  { %2143 = vmatpush.msrb.mxu2 %v2707_v15 }
 0x467   :  { %1901 = vmatpush.msra.mxu1 %v1763_v37 }
 0x468   :  { %2640 = vmatmul.msk.f32.vlgmr.msra.gmra.mxu1 %vm165_vm1, %v3594_v32 }
 0x46b   :  { %v3730_v17 = vpop.f32.mrf.mxu3  ;;  %v1516_v34 = vpop.xlane.xlu1 %1515 }
 0x46c   :  { %vm1558_vm7 = vcmp.eq.f32.partialorder %v3344_v23, %v1516_v34  ;;  %v264_v34 = vsel %vm165_vm1, %v3255_v46, 0.0  ;;  %v1863_v46 = vsel %vm165_vm1, %v3627_v61, 0.0 }
 0x46d   :  { %v2615_v39 = vsel %vm1558_vm7, 1.0, %v4795_v53 }
 0x46e   :  { %2623 = vmatmul.msk.f32.vlgmr.msra.gmra.mxu3 %vm165_vm1, %v2615_v39  ;;  %v267_v39 = vsel %vm165_vm1, %v3262_v51, 0.0 }
 0x470   :  { %2641 = vmatmul.msk.f32.gmra.mxu1 %vm165_vm1, %v3609_v54 }
 0x473   :  { %v3737_v57 = vpop.f32.mrf.mxu3  ;;  %v2053_v58 = vpop.xlane.xlu1 %2052 }
 0x474   :  { %vm2061_vm8 = vcmp.eq.f32.partialorder %v3658_v16, %v2053_v58  ;;  %v1338_v58 = vsel %vm165_vm1, %v3516_v55, 0.0  ;;  %v1341_v55 = vsel %vm165_vm1, %v3519_v56, 0.0 }
 0x475   :  { %v2065_v35 = vsel %vm2061_vm8, %v3344_v23, 16.0 }
 0x476   :  { %v2071_v47 = vsel %vm165_vm1, %v2065_v35, inf }
 0x477   :  { %2072 = vmin.xlane.f32.xlu1 %v2071_v47  ;;  %v258_v47 = vsel %vm165_vm1, %v3221_v26, 0.0  ;;  %v785_v26 = vsel %vm165_vm1, %v3241_v40, 0.0  ;;  %v1335_v40 = vsel %vm165_vm1, %v3551_v30, 0.0 }
 0x478   :  { %2642 = vmatmul.msk.f32.gmra.mxu1 %vm165_vm1, %v3615_v5 }
 0x47b   :  { %v3744_v38 = vpop.f32.mrf.mxu3  ;;  %v1534_v42 = vpop.xlane.xlu1 %1533 }
 0x47c   :  { %vm1540_vm9 = vcmp.eq.f32.partialorder %v3538_v8, %v1534_v42  ;;  %v782_v42 = vsel %vm165_vm1, %v3227_v29, 0.0  ;;  %v1332_v29 = vsel %vm165_vm1, %v3512_v48, 0.0  ;;  %v1857_v48 = vsel %vm165_vm1, %v3609_v54, 0.0 }
 0x47d   :  { %v1544_v12 = vsel %vm1540_vm9, %v3344_v23, 16.0  ;;  %v4796_v54 = vpack.i.bf16 %v3553_v13, %v3499_v7 }
 0x47e   :  { %v1552_v60 = vsel %vm165_vm1, %v1544_v12, inf }
 0x47f   :  { %1553 = vmin.xlane.f32.xlu0 %v1552_v60 }
 0x480   :  { %2643 = vmatmul.msk.f32.gmra.mxu1 %vm165_vm1, %v3627_v61 }
 0x483   :  { %v3751_v16 = vpop.f32.mrf.mxu3  ;;  %v1519_v22 = vpop.xlane.xlu1 %1518 }
 0x484   :  { %vm1559_vm10 = vcmp.eq.f32.partialorder %v3344_v23, %v1519_v22 }
 0x485   :  { %v2616_v10 = vsel %vm1559_vm10, 1.0, %v4795_v53 }
 0x486   :  { %2624 = vmatmul.msk.f32.gmra.mxu3 %vm165_vm1, %v2616_v10 }
 0x48b   :  { %v3756_v19 = vpop.f32.mrf.mxu3  ;;  %v1537_v8 = vpop.xlane.xlu1 %1536 }
 0x48c   :  { %vm1541_vm11 = vcmp.eq.f32.partialorder %v3543_v11, %v1537_v8  ;;  %v2056_v31 = vpop.xlane.xlu0 %2055 }
 0x48d   :  { %vm2062_vm12 = vcmp.eq.f32.partialorder %v3622_v18, %v2056_v31  ;;  %v1545_v24 = vsel %vm1541_vm11, %v3344_v23, 16.0  ;;  %v788_v18 = vsel %vm165_vm1, %v3287_v62, 0.0  ;;  %v1860_v62 = vsel %vm165_vm1, %v3615_v5, 0.0 }
 0x48e   :  { %v1555_v33 = vsel %vm165_vm1, %v1545_v24, inf  ;;  %v2066_v15 = vsel %vm2062_vm12, %v3344_v23, 16.0  ;;  %v261_v5 = vsel %vm165_vm1, %v3234_v36, 0.0  ;;  %v1854_v36 = vsel %vm165_vm1, %v3594_v32, 0.0 }
 0x48f   :  { %1556 = vmin.xlane.f32.xlu1 %v1555_v33  ;;  %v2074_v0 = vsel %vm165_vm1, %v2066_v15, inf }
 0x490   :  { %2075 = vmin.xlane.f32.xlu2 %v2074_v0 }
 0x493   :  { %v2059_v50 = vpop.xlane.xlu1 %2058 }
 0x494   :  { %vm2063_vm13 = vcmp.eq.f32.partialorder %v3632_v21, %v2059_v50  ;;  %v791_v21 = vsel %vm165_vm1, %v3301_v6, 0.0  ;;  %v1525_v56 = vpop.xlane.xlu0 %1524 }
 0x495   :  { %v2067_v37 = vsel %vm2063_vm13, %v3344_v23, 16.0  ;;  %vm1561_vm2 = vcmp.eq.f32.partialorder %v3344_v23, %v1525_v56 }
 0x496   :  { %v2077_v11 = vsel %vm165_vm1, %v2067_v37, inf  ;;  %v2618_v60 = vsel %vm1561_vm2, 1.0, %v4795_v53 }
 0x497   :  { %2078 = vmin.xlane.f32.xlu0 %v2077_v11  ;;  %789 = vadd.xlane.f32.xlu1 %v788_v18 }
 0x498   :  { %265 = vadd.xlane.f32.xlu2 %v264_v34 }
 0x49f   :  { %268 = vadd.xlane.f32.xlu0 %v267_v39  ;;  %1339 = vadd.xlane.f32.xlu1 %v1338_v58 }
 0x4a0   :  { %792 = vadd.xlane.f32.xlu2 %v791_v21 }
 0x4a5   :  { %v2038_v35 = vpop.xlane.xlu2 %2037 }
 0x4a6   :  { %vm2080_vm14 = vcmp.eq.f32.partialorder %v3344_v23, %v2038_v35 }
 0x4a7   :  { %v2644_v51 = vsel %vm2080_vm14, 1.0, %v4795_v53  ;;  %1861 = vadd.xlane.f32.xlu0 %v1860_v62  ;;  %1864 = vadd.xlane.f32.xlu1 %v1863_v46 }
 0x4a8   :  { %1342 = vadd.xlane.f32.xlu2 %v1341_v55  ;;  %2652 = vmatmul.msk.f32.vlgmr.msrb.gmra.mxu2 %vm165_vm1, %v2644_v51 }
 0x4ad   :  { %v1522_v6 = vpop.xlane.xlu2 %1521  ;;  %v2070_v30 = vpop.xlane.xlu0 %2069 }
 0x4ae   :  { %vm1560_vm15 = vcmp.eq.f32.partialorder %v3344_v23, %v1522_v6  ;;  %vm2092_vm7 = vcmp.eq.f32.partialorder %v3344_v23, %v2070_v30 }
 0x4af   :  { %v2617_v61 = vsel %vm1560_vm15, 1.0, %v4795_v53  ;;  %259 = vadd.xlane.f32.xlu0 %v258_v47  ;;  %262 = vadd.xlane.f32.xlu1 %v261_v5  ;;  %v2648_v50 = vsel %vm2092_vm7, 1.0, %v4795_v53 }
 0x4b0   :  { %2625 = vmatmul.msk.f32.gmra.mxu3 %vm165_vm1, %v2617_v61  ;;  %783 = vadd.xlane.f32.xlu2 %v782_v42 }
 0x4b5   :  { %v2041_v12 = vpop.xlane.xlu1 %2040 }
 0x4b6   :  { %vm2081_vm3 = vcmp.eq.f32.partialorder %v3344_v23, %v2041_v12 }
 0x4b7   :  { %v2645_v22 = vsel %vm2081_vm3, 1.0, %v4795_v53  ;;  %786 = vadd.xlane.f32.xlu0 %v785_v26  ;;  %1855 = vadd.xlane.f32.xlu1 %v1854_v36 }
 0x4b8   :  { %1333 = vadd.xlane.f32.xlu2 %v1332_v29  ;;  %2626 = vmatmul.msk.f32.gmra.mxu3 %vm165_vm1, %v2618_v60 }
 0x4b9   :  { %2653 = vmatmul.msk.f32.gmra.mxu2 %vm165_vm1, %v2645_v22 }
 0x4bd   :  { %v2044_v10 = vpop.xlane.xlu1 %2043 }
 0x4be   :  { %vm2082_vm4 = vcmp.eq.f32.partialorder %v3344_v23, %v2044_v10 }
 0x4bf   :  { %v2646_v32 = vsel %vm2082_vm4, 1.0, %v4795_v53  ;;  %1336 = vadd.xlane.f32.xlu1 %v1335_v40 }
 0x4c1   :  { %2654 = vmatmul.msk.f32.gmra.mxu2 %vm165_vm1, %v2646_v32 }
 0x4c5   :  { %v1548_v8 = vpop.xlane.xlu1 %1547  ;;  %v2047_v31 = vpop.xlane.xlu2 %2046 }
 0x4c6   :  { %vm1570_vm5 = vcmp.eq.f32.partialorder %v3344_v23, %v1548_v8  ;;  %vm2083_vm6 = vcmp.eq.f32.partialorder %v3344_v23, %v2047_v31 }
 0x4c7   :  { %v2619_v24 = vsel %vm1570_vm5, 1.0, %v4795_v53  ;;  %v2647_v33 = vsel %vm2083_vm6, 1.0, %v4795_v53  ;;  %1858 = vadd.xlane.f32.xlu1 %v1857_v48 }
 0x4c8   :  { %2627 = vmatmul.msk.f32.gmra.mxu3 %vm165_vm1, %v2619_v24 }
 0x4c9   :  { %2655 = vmatmul.msk.f32.gmra.mxu2 %vm165_vm1, %v2647_v33 }
 0x4cd   :  { %v1551_v15 = vpop.xlane.xlu2 %1550 }
 0x4ce   :  { %vm1571_vm8 = vcmp.eq.f32.partialorder %v3344_v23, %v1551_v15 }
 0x4cf   :  { %v2620_v0 = vsel %vm1571_vm8, 1.0, %v4795_v53 }
 0x4d0   :  { %2628 = vmatmul.msk.f32.gmra.mxu3 %vm165_vm1, %v2620_v0 }
 0x4d1   :  { %2656 = vmatmul.msk.f32.gmra.mxu2 %vm165_vm1, %v2648_v50 }
 0x4e0   :  { %2714 = vrot.lane.b32.xlu1 %v4796_v54, %s3002_s12 }
 0x4ea   :  { %v2073_v37 = vpop.xlane.xlu1 %2072 }
 0x4eb   :  { %vm2093_vm9 = vcmp.eq.f32.partialorder %v3344_v23, %v2073_v37 }
 0x4ec   :  { %v2649_v11 = vsel %vm2093_vm9, 1.0, %v4795_v53 }
 0x4ed   :  { %2657 = vmatmul.msk.f32.gmra.mxu2 %vm165_vm1, %v2649_v11 }
 0x4f2   :  { %v1554_v18 = vpop.xlane.xlu0 %1553 }
 0x4f3   :  { %vm1572_vm10 = vcmp.eq.f32.partialorder %v3344_v23, %v1554_v18 }
 0x4f4   :  { %v2621_v34 = vsel %vm1572_vm10, 1.0, %v4795_v53 }
 0x4f5   :  { %2629 = vmatmul.msk.f32.gmra.mxu3 %vm165_vm1, %v2621_v34 }
 0x502   :  { %v1557_v39 = vpop.xlane.xlu1 %1556 }
 0x503   :  { %vm1573_vm11 = vcmp.eq.f32.partialorder %v3344_v23, %v1557_v39  ;;  %v2076_v58 = vpop.xlane.xlu2 %2075 }
 0x504   :  { %v2622_v7 = vsel %vm1573_vm11, 1.0, %v4795_v53  ;;  %vm2094_vm12 = vcmp.eq.f32.partialorder %v3344_v23, %v2076_v58 }
 0x505   :  { %v2650_v13 = vsel %vm2094_vm12, 1.0, %v4795_v53  ;;  %2630 = vmatmul.msk.f32.gmra.mxu3 %vm165_vm1, %v2622_v7 }
 0x506   :  { %2658 = vmatmul.msk.f32.gmra.mxu2 %vm165_vm1, %v2650_v13 }
 0x50a   :  { %v3844_v21 = vpop.xlane.xlu1 %789  ;;  %v2079_v35 = vpop.xlane.xlu0 %2078 }
 0x50b   :  { %vm796_vm13 = vcmp.eq.f32.partialorder %v3844_v21, 0.0  ;;  %vm2095_vm14 = vcmp.eq.f32.partialorder %v3344_v23, %v2079_v35  ;;  %v3848_v62 = vpop.xlane.xlu2 %265 }
 0x50c   :  { %v800_v46 = vsel %vm796_vm13, 1.0, %v3844_v21  ;;  %v2651_v51 = vsel %vm2095_vm14, 1.0, %v4795_v53  ;;  %vm272_vm15 = vcmp.eq.f32.partialorder %v3848_v62, 0.0 }
 0x50d   :  { %2928 = vrcp.f32 %v800_v46  ;;  %v276_v55 = vsel %vm272_vm15, 1.0, %v3848_v62  ;;  %v884_v32 = vand.u32 2147483648, %v800_v46  ;;  %vm878_vm5 = vweird.f32 %v800_v46 }
 0x50e   :  { %2659 = vmatmul.msk.f32.gmra.mxu2 %vm165_vm1, %v2651_v51  ;;  %2930 = vrcp.f32 %v276_v55  ;;  %v882_v31 = vand.u32 2147483647, %v800_v46  ;;  %v360_v30 = vand.u32 2147483648, %v276_v55  ;;  %vm354_vm9 = vweird.f32 %v276_v55 }
 0x50f   :  { %v885_v0 = vor.u32 1.1754944e-38, %v884_v32  ;;  %v358_v50 = vand.u32 2147483647, %v276_v55 }
 0x510   :  { %vm883_vm10 = vcmp.eq.f32.partialorder %v882_v31, 8.507059e+37  ;;  %v361_v58 = vor.u32 1.1754944e-38, %v360_v30 }
 0x511   :  { %vm359_vm12 = vcmp.eq.f32.partialorder %v358_v50, 8.507059e+37 }
 0x512   :  { %v3859_v6 = vpop.xlane.xlu0 %268  ;;  %v3880_v40 = vpop.xlane.xlu1 %1339 }
 0x513   :  { %v2929_v23 = vpop.eup %2928  ;;  %vm273_vm2 = vcmp.eq.f32.partialorder %v3859_v6, 0.0  ;;  %v3868_v56 = vpop.xlane.xlu2 %792  ;;  %vm1346_vm8 = vcmp.eq.f32.partialorder %v3880_v40, 0.0 }
 0x514   :  { %v2931_v47 = vpop.eup %2930  ;;  %v874_v5 = vmul.f32 %v2929_v23, %v800_v46  ;;  %v3865_v53 = vsel %vm273_vm2, 1.0, %v3859_v6  ;;  %vm797_vm3 = vcmp.eq.f32.partialorder %v3868_v56, 0.0  ;;  %vm879_vm4 = vweird.f32 %v2929_v23 }
 0x515   :  { %v350_v61 = vmul.f32 %v2931_v47, %v276_v55  ;;  %2932 = vrcp.f32 %v3865_v53  ;;  %v3878_v29 = vsel %vm797_vm3, 1.0, %v3868_v56  ;;  %vm3885_vm6 = vmor %vm878_vm5, %vm879_vm4  ;;  %vm355_vm7 = vweird.f32 %v2931_v47 }
 0x516   :  { %v875_v42 = vsub.f32 1.0, %v874_v5  ;;  %2934 = vrcp.f32 %v3878_v29  ;;  %vm356_vm11 = vmor %vm354_vm9, %vm355_vm7  ;;  %v3897_v37 = vsel %vm1346_vm8, 1.0, %v3880_v40  ;;  %v375_v5 = vand.u32 2147483648, %v3865_v53 }
 0x517   :  { %v351_v12 = vsub.f32 1.0, %v350_v61  ;;  %2936 = vrcp.f32 %v3897_v37  ;;  %v4822_v56 = vpack.i.bf16 %v3527_v2, %v3497_v59 }
 0x518   :  { %v876_v26 = vmul.f32 %v2929_v23, %v875_v42 }
 0x519   :  { %v352_v22 = vmul.f32 %v2931_v47, %v351_v12 }
 0x51a   :  { %v3871_v36 = vpop.xlane.xlu0 %1861  ;;  %v877_v10 = vadd.f32 %v2929_v23, %v876_v26  ;;  %v3938_v26 = vpop.f32.mrf.mxu1 }
 0x51b   :  { %4797 = vst [vmem:[#allocation7_spill] sm:$0xff] %v3871_v36  ;;  %v3873_v60 = vpop.eup %2932  ;;  %v353_v24 = vadd.f32 %v2931_v47, %v352_v22  ;;  %v3892_v15 = vpop.xlane.xlu2 %1342 }
 0x51c   :  { %v365_v8 = vmul.f32 %v3873_v60, %v3865_v53  ;;  %v881_v33 = vsel %vm3885_vm6, %v2929_v23, %v877_v10  ;;  %v3901_v39 = vpop.eup %2934  ;;  %vm1347_vm14 = vcmp.eq.f32.partialorder %v3892_v15, 0.0  ;;  %vm370_vm5 = vweird.f32 %v3873_v60 }
 0x51d   :  { %v357_v11 = vsel %vm356_vm11, %v2931_v47, %v353_v24  ;;  %v886_v18 = vsel %vm883_vm10, %v885_v0, %v881_v33  ;;  %v889_v46 = vmul.f32 %v3901_v39, %v3878_v29  ;;  %v3927_v47 = vsel %vm1347_vm14, 1.0, %v3892_v15  ;;  %v3934_v42 = vpop.eup %2936  ;;  %v567_v33 = vpop.f32.mrf.mxu3 }
 0x51e   :  { %v366_v54 = vsub.f32 1.0, %v365_v8  ;;  %v3907_v13 = vmul.f32 %v886_v18, %v3483_v9  ;;  %v362_v35 = vsel %vm359_vm12, %v361_v58, %v357_v11  ;;  %vm369_vm6 = vweird.f32 %v3865_v53 }
 0x51f   :  { %v3920_v23 = vmul.f32 %v362_v35, %v3463_v45  ;;  %v373_v45 = vand.u32 2147483647, %v3865_v53  ;;  %v890_v12 = vsub.f32 1.0, %v889_v46  ;;  %vm371_vm7 = vmor %vm369_vm6, %vm370_vm5  ;;  %v1424_v32 = vmul.f32 %v3934_v42, %v3897_v37 }
 0x520   :  { %v367_v7 = vmul.f32 %v3873_v60, %v366_v54  ;;  %v905_v55 = vmul.f32 %v3907_v13, %v3907_v13  ;;  %v376_v8 = vor.u32 1.1754944e-38, %v375_v5  ;;  %vm894_vm11 = vweird.f32 %v3901_v39 }
 0x521   :  { %v381_v22 = vmul.f32 %v3920_v23, %v3920_v23  ;;  %vm374_vm10 = vcmp.eq.f32.partialorder %v373_v45, 8.507059e+37  ;;  %v891_v48 = vmul.f32 %v3901_v39, %v890_v12  ;;  %v1425_v0 = vsub.f32 1.0, %v1424_v32 }
 0x522   :  { %v3899_v34 = vpop.xlane.xlu0 %259  ;;  %v368_v9 = vadd.f32 %v3873_v60, %v367_v7  ;;  %915 = vrot.lane.b32.xlu2 %v905_v55, %s3003_s17  ;;  %v2708_v18 = vpack.i.bf16 %v567_v33, %v3737_v57  ;;  %vm893_vm12 = vweird.f32 %v3878_v29  ;;  %v899_v58 = vand.u32 2147483648, %v3878_v29 }
 0x523   :  { %4800 = vst [vmem:[#allocation8_spill] sm:$0xff] %v3899_v34  ;;  %vm4770_vm4 = vcmp.eq.f32.partialorder %v3899_v34, 0.0  ;;  %v3932_v61 = vpop.xlane.xlu2 %783  ;;  %391 = vrot.lane.b32.xlu0 %v381_v22, %s3003_s17  ;;  %v892_v54 = vadd.f32 %v3901_v39, %v891_v48  ;;  %v897_v35 = vand.u32 2147483647, %v3878_v29  ;;  %v1426_v57 = vmul.f32 %v3934_v42, %v1425_v0  ;;  %vm3980_vm5 = vmor %vm893_vm12, %vm894_vm11 }
 0x524   :  { %v3915_v51 = vsel %vm4770_vm4, 1.0, %v3899_v34  ;;  %4801 = vst [vmem:[#allocation9_spill] sm:$0xff] %v3932_v61  ;;  %v372_v10 = vsel %vm371_vm7, %v3873_v60, %v368_v9  ;;  %vm4791_vm9 = vcmp.eq.f32.partialorder %v3932_v61, 0.0  ;;  %v900_v12 = vor.u32 1.1754944e-38, %v899_v58 }
 0x525   :  { %2938 = vrcp.f32 %v3915_v51  ;;  %v3951_v53 = vsel %vm4791_vm9, 1.0, %v3932_v61  ;;  %v377_v24 = vsel %vm374_vm10, %v376_v8, %v372_v10  ;;  %v896_v29 = vsel %vm3980_vm5, %v3901_v39, %v892_v54  ;;  %v570_v8 = vpop.f32.mrf.mxu3 }
 0x526   :  { %2940 = vrcp.f32 %v3927_v47  ;;  %v3964_v11 = vmul.f32 %v377_v24, %v3465_v49  ;;  %v3977_v49 = vpop.f32.mrf.mxu1  ;;  %vm898_vm6 = vcmp.eq.f32.partialorder %v897_v35, 8.507059e+37  ;;  %v1427_v48 = vadd.f32 %v3934_v42, %v1426_v57 }
 0x527   :  { %2942 = vrcp.f32 %v3951_v53  ;;  %vm1429_vm10 = vweird.f32 %v3934_v42  ;;  %v901_v24 = vsel %vm898_vm6, %v900_v12, %v896_v29  ;;  %v1434_v39 = vand.u32 2147483648, %v3897_v37 }
 0x528   :  { %v382_v9 = vmul.f32 %v3964_v11, %v3964_v11  ;;  %vm324_vm11 = vweird.f32 %v3915_v51  ;;  %v328_v33 = vand.u32 2147483647, %v3915_v51  ;;  %vm1428_vm12 = vweird.f32 %v3897_v37 }
 0x529   :  { %v1432_v0 = vand.u32 2147483647, %v3897_v37  ;;  %vm4007_vm0 = vmor %vm1428_vm12, %vm1429_vm10  ;;  %v4018_v37 = vmul.f32 %v901_v24, %v3493_v25  ;;  %v1449_v12 = vand.u32 2147483648, %v3927_v47  ;;  %vm1443_vm12 = vweird.f32 %v3927_v47 }
 0x52a   :  { %393 = vrot.lane.b32.xlu2 %v382_v9, %s3003_s17  ;;  %v1435_v9 = vor.u32 1.1754944e-38, %v1434_v39  ;;  %vm329_vm6 = vcmp.eq.f32.partialorder %v328_v33, 8.507059e+37 }
 0x52b   :  { %v3953_v31 = vpop.eup %2938  ;;  %2709 = vrot.lane.b32.xlu0 %v2708_v18, %s3006_s22  ;;  %v2718_v18 = vpack.i.bf16 %v570_v8, %v3744_v38  ;;  %v906_v57 = vmul.f32 %v4018_v37, %v4018_v37  ;;  %v1450_v33 = vor.u32 1.1754944e-38, %v1449_v12 }
 0x52c   :  { %v320_v60 = vmul.f32 %v3953_v31, %v3915_v51  ;;  %v3959_v30 = vpop.eup %2940  ;;  %vm325_vm7 = vweird.f32 %v3953_v31 }
 0x52d   :  { %v3969_v7 = vpop.eup %2942  ;;  %v1439_v46 = vmul.f32 %v3959_v30, %v3927_v47  ;;  %vm4001_vm5 = vmor %vm324_vm11, %vm325_vm7  ;;  %vm1433_vm7 = vcmp.eq.f32.partialorder %v1432_v0, 8.507059e+37  ;;  %vm1444_vm11 = vweird.f32 %v3959_v30 }
 0x52e   :  { %v321_v50 = vsub.f32 1.0, %v320_v60  ;;  %v844_v45 = vmul.f32 %v3969_v7, %v3951_v53  ;;  %v330_v60 = vand.u32 2147483648, %v3915_v51  ;;  %v1387_v5 = vpop.f32.mrf.mxu1  ;;  %vm849_vm10 = vweird.f32 %v3969_v7 }
 0x52f   :  { %v1440_v10 = vsub.f32 1.0, %v1439_v46  ;;  %v4015_v46 = vpop.f32.mrf.mxu2 }
 0x530   :  { %v322_v55 = vmul.f32 %v3953_v31, %v321_v50  ;;  %v845_v22 = vsub.f32 1.0, %v844_v45  ;;  %v331_v38 = vor.u32 1.1754944e-38, %v330_v60 }
 0x531   :  { %v1441_v35 = vmul.f32 %v3959_v30, %v1440_v10  ;;  %v1447_v10 = vand.u32 2147483647, %v3927_v47 }
 0x532   :  { %v323_v32 = vadd.f32 %v3953_v31, %v322_v55  ;;  %v846_v54 = vmul.f32 %v3969_v7, %v845_v22  ;;  %v1431_v55 = vsel %vm4007_vm0, %v3934_v42, %v1427_v48  ;;  %2719 = vrot.lane.b32.xlu2 %v2718_v18, %s3006_s22  ;;  %v854_v42 = vand.u32 2147483648, %v3951_v53 }
 0x533   :  { %v1442_v45 = vadd.f32 %v3959_v30, %v1441_v35  ;;  %917 = vrot.lane.b32.xlu0 %v906_v57, %s3003_s17  ;;  %v1436_v29 = vsel %vm1433_vm7, %v1435_v9, %v1431_v55  ;;  %vm848_vm0 = vweird.f32 %v3951_v53  ;;  %v852_v22 = vand.u32 2147483647, %v3951_v53  ;;  %v4083_v55 = vpop.xlane.xlu1 %1864  ;;  %v4095_v57 = vpop.xlane.xlu2 %1333 }
 0x534   :  { %v327_v51 = vsel %vm4001_vm5, %v3953_v31, %v323_v32  ;;  %v847_v31 = vadd.f32 %v3969_v7, %v846_v54  ;;  %vm850_vm5 = vmor %vm848_vm0, %vm849_vm10  ;;  %v4041_v48 = vmul.f32 %v1436_v29, %v1387_v5  ;;  %v855_v24 = vor.u32 1.1754944e-38, %v854_v42  ;;  %4811 = vst [vmem:[#allocation12_spill] sm:$0xff] %v4083_v55 }
 0x535   :  { %v332_v25 = vsel %vm329_vm6, %v331_v38, %v327_v51  ;;  %vm1445_vm6 = vmor %vm1443_vm12, %vm1444_vm11  ;;  %vm853_vm7 = vcmp.eq.f32.partialorder %v852_v22, 8.507059e+37  ;;  %vm1448_vm10 = vcmp.eq.f32.partialorder %v1447_v10, 8.507059e+37  ;;  %v2733_v18 = vpack.i.bf16 %v3507_v41, %v3495_v28  ;;  %v4085_v38 = vpop.f32.mrf.mxu3  ;;  %v4107_v22 = vpop.xlane.xlu0 %786 }
 0x536   :  { %v4038_v32 = vmul.f32 %v332_v25, %v3458_v43  ;;  %v851_v8 = vsel %vm850_vm5, %v3969_v7, %v847_v31  ;;  %v1446_v60 = vsel %vm1445_vm6, %v3959_v30, %v1442_v45  ;;  %v1455_v47 = vmul.f32 %v4041_v48, %v4041_v48  ;;  %v1390_v0 = vpop.f32.mrf.mxu1  ;;  %4813 = vst [vmem:[#allocation14_spill] sm:$0xff] %v4107_v22 }
 0x537   :  { %v856_v43 = vsel %vm853_vm7, %v855_v24, %v851_v8  ;;  %v1451_v7 = vsel %vm1448_vm10, %v1450_v33, %v1446_v60  ;;  %v4809_v30 = vpack.i.bf16 %v3582_v14, %v3502_v52  ;;  %vm4792_vm0 = vcmp.eq.f32.partialorder %v4083_v55, 0.0 }
 0x538   :  { %v379_v39 = vmul.f32 %v4038_v32, %v4038_v32  ;;  %v4057_v50 = vmul.f32 %v856_v43, %v3472_v63  ;;  %v4059_v54 = vmul.f32 %v1451_v7, %v1390_v0  ;;  %v2728_v63 = vpack.i.bf16 %v3751_v16, %v3722_v4 }
 0x539   :  { %v4103_v42 = vsel %vm4792_vm0, 1.0, %v4083_v55  ;;  %vm795_vm7 = vcmp.eq.f32.partialorder %v4107_v22, 0.0 }
 0x53a   :  { %387 = vrot.lane.b32.xlu1 %v379_v39, %s3003_s17  ;;  %1465 = vrot.lane.b32.xlu2 %v1455_v47, %s3003_s17  ;;  %v903_v58 = vmul.f32 %v4057_v50, %v4057_v50  ;;  %v1456_v52 = vmul.f32 %v4059_v54, %v4059_v54 }
 0x53b   :  { %2724 = vrot.lane.b32.xlu0 %v4809_v30, %s3002_s12  ;;  %v4087_v9 = vpop.xlane.xlu1 %262 }
 0x53c   :  { %v4046_v53 = vpop.f32.mrf.mxu2  ;;  %4812 = vst [vmem:[#allocation13_spill] sm:$0xff] %v4087_v9  ;;  %vm4771_vm11 = vcmp.eq.f32.partialorder %v4087_v9, 0.0 }
 0x53d   :  { %4808 = vst [vmem:[#allocation10_spill] sm:$0xff] %v4046_v53  ;;  %v4090_v4 = vpop.f32.mrf.mxu3  ;;  %v275_v16 = vsel %vm4771_vm11, 1.0, %v4087_v9  ;;  %vm1868_vm11 = vcmp.eq.f32.partialorder %v3871_v36, 0.0 }
 0x53e   :  { %2944 = vrcp.f32 %v275_v16  ;;  %v4110_v10 = vpop.f32.mrf.mxu1  ;;  %v345_v7 = vand.u32 2147483648, %v275_v16  ;;  %vm339_vm5 = vweird.f32 %v275_v16  ;;  %v343_v0 = vand.u32 2147483647, %v275_v16 }
 0x53f   :  { %2946 = vrcp.f32 %v4103_v42 }
 0x540   :  { %vm344_vm4 = vcmp.eq.f32.partialorder %v343_v0, 8.507059e+37 }
 0x542   :  { %2734 = vrot.lane.b32.xlu1 %v2733_v18, %s3002_s12  ;;  %911 = vrot.lane.b32.xlu2 %v903_v58, %s3003_s17 }
 0x543   :  { %1467 = vrot.lane.b32.xlu0 %v1456_v52, %s3003_s17  ;;  %v4114_v24 = vpop.xlane.xlu1 %1855 }
 0x544   :  { %v4066_v35 = vpop.f32.mrf.mxu2  ;;  %v2945_v31 = vpop.eup %2944  ;;  %4814 = vst [vmem:[#allocation15_spill] sm:$0xff] %v4114_v24  ;;  %vm4790_vm10 = vcmp.eq.f32.partialorder %v4114_v24, 0.0 }
 0x545   :  { %v4097_v5 = vpop.f32.mrf.mxu3  ;;  %v335_v45 = vmul.f32 %v2945_v31, %v275_v16  ;;  %v4116_v39 = vpop.eup %2946  ;;  %vm340_vm12 = vweird.f32 %v2945_v31 }
 0x546   :  { %v1961_v58 = vmul.f32 %v4116_v39, %v4103_v42  ;;  %vm341_vm6 = vmor %vm339_vm5, %vm340_vm12  ;;  %vm1965_vm12 = vweird.f32 %v4103_v42 }
 0x547   :  { %v336_v29 = vsub.f32 1.0, %v335_v45 }
 0x549   :  { %v337_v60 = vmul.f32 %v2945_v31, %v336_v29  ;;  %v4125_v29 = vpop.f32.mrf.mxu1 }
 0x54b   :  { %2729 = vrot.lane.b32.xlu0 %v2728_v63, %s3006_s22  ;;  %v338_v33 = vadd.f32 %v2945_v31, %v337_v60  ;;  %v346_v60 = vor.u32 1.1754944e-38, %v345_v7  ;;  %v4128_v51 = vpop.xlane.xlu1 %1336  ;;  %v4139_v7 = vsel %vm4790_vm10, 1.0, %v4114_v24 }
 0x54c   :  { %v4074_v14 = vpop.f32.mrf.mxu2 }
 0x54d   :  { %v4105_v12 = vpop.f32.mrf.mxu3  ;;  %v342_v52 = vsel %vm341_vm6, %v2945_v31, %v338_v33  ;;  %v4134_v31 = vsel %vm795_vm7, 1.0, %v4107_v22 }
 0x54e   :  { %v347_v33 = vsel %vm344_vm4, %v346_v60, %v342_v52  ;;  %2948 = vrcp.f32 %v4134_v31  ;;  %vm1966_vm4 = vweird.f32 %v4116_v39 }
 0x54f   :  { %2950 = vrcp.f32 %v4139_v7  ;;  %vm1967_vm5 = vmor %vm1965_vm12, %vm1966_vm4 }
 0x554   :  { %v4077_v28 = vpop.f32.mrf.mxu2 }
 0x555   :  { %v4118_v47 = vpop.f32.mrf.mxu3 }
 0x570   :  { %v4079_v41 = vpop.f32.mrf.mxu2 }
 0x571   :  { %4810 = vst [vmem:[#allocation11_spill] sm:$0xff] %v4079_v41 }
 0x57c   :  { %v916_v25 = vpop.permute.xlu2 %915 }
 0x57d   :  { %v925_v43 = vsub.f32 %v3907_v13, %v916_v25 }
 0x57f   :  { %v929_v63 = vmax.f32 %v925_v43, 0.0  ;;  %v1962_v43 = vsub.f32 1.0, %v1961_v58  ;;  %v4151_v58 = vmul.f32 %v347_v33, %v3461_v44  ;;  %v4164_v33 = vpop.f32.mrf.mxu1 }
 0x581   :  { %4815 = vst [vmem:[#allocation16_spill] sm:$0xff] %v4151_v58  ;;  %v380_v44 = vmul.f32 %v4151_v58, %v4151_v58 }
 0x584   :  { %v4112_v8 = vpop.permute.xlu2 %393 }
 0x587   :  { %v1912_v22 = vpop.f32.mrf.mxu1 }
 0x58c   :  { %v2720_v25 = vpop.permute.xlu2 %2719 }
 0x595   :  { %v392_v30 = vpop.permute.xlu0 %391 }
 0x596   :  { %v401_v18 = vsub.f32 %v3920_v23, %v392_v30  ;;  %v2721_v30 = vunpack.i.l.bf16 %v2720_v25 }
 0x598   :  { %v405_v45 = vmax.f32 %v401_v18, 0.0  ;;  %v4145_v18 = vsel %vm1868_vm11, 1.0, %v3871_v36 }
 0x599   :  { %2952 = vrcp.f32 %v4145_v18  ;;  %vm1950_vm9 = vweird.f32 %v4145_v18 }
 0x59a   :  { %v2748_v16 = vpack.i.bf16 %v929_v63, %v405_v45  ;;  %v4148_v63 = vpop.f32.mrf.mxu3  ;;  %v1963_v45 = vmul.f32 %v4116_v39, %v1962_v43  ;;  %v4167_v43 = vpop.eup %2948 }
 0x59b   :  { %vm864_vm6 = vweird.f32 %v4167_v43 }
 0x59c   :  { %2749 = vrot.lane.b32.xlu1 %v2748_v16, %s3003_s17  ;;  %v600_v16 = vsel %vm273_vm2, %v3123_v27, %v2721_v30  ;;  %v1964_v34 = vadd.f32 %v4116_v39, %v1963_v45  ;;  %v2722_v30 = vunpack.i.h.bf16 %v2720_v25  ;;  %v859_v25 = vmul.f32 %v4167_v43, %v4134_v31 }
 0x59d   :  { %v2710_v0 = vpop.permute.xlu0 %2709 }
 0x59e   :  { %v2711_v52 = vunpack.i.l.bf16 %v2710_v0  ;;  %v2712_v24 = vunpack.i.h.bf16 %v2710_v0  ;;  %v1971_v0 = vand.u32 2147483648, %v4103_v42  ;;  %v860_v36 = vsub.f32 1.0, %v859_v25 }
 0x5a0   :  { %v599_v60 = vsel %vm272_vm15, %v3113_v20, %v2711_v52  ;;  %v4171_v52 = vpop.xlane.xlu1 %1858  ;;  %v619_v45 = vsel %vm272_vm15, %v3113_v20, %v2712_v24  ;;  %v1972_v53 = vor.u32 1.1754944e-38, %v1971_v0 }
 0x5a1   :  { %v2738_v1 = vpack.i.bf16 %v600_v16, %v599_v60  ;;  %v4174_v60 = vpop.eup %2950  ;;  %v1969_v16 = vand.u32 2147483647, %v4103_v42  ;;  %v620_v42 = vsel %vm273_vm2, %v3123_v27, %v2722_v30  ;;  %vm1344_vm2 = vcmp.eq.f32.partialorder %v4095_v57, 0.0 }
 0x5a2   :  { %v4182_v58 = vpop.eup %2952  ;;  %v1916_v9 = vmul.f32 %v4174_v60, %v4139_v7  ;;  %v2753_v62 = vpack.i.bf16 %v620_v42, %v619_v45  ;;  %vm1921_vm4 = vweird.f32 %v4174_v60 }
 0x5a3   :  { %2739 = vrot.lane.b32.xlu2 %v2738_v1, %s3005_s21  ;;  %v1641_v1 = vpop.f32.mrf.mxu3  ;;  %vm1970_vm15 = vcmp.eq.f32.partialorder %v1969_v16, 8.507059e+37  ;;  %v1946_v24 = vmul.f32 %v4182_v58, %v4145_v18  ;;  %v861_v16 = vmul.f32 %v4167_v43, %v860_v36  ;;  %vm1951_vm12 = vweird.f32 %v4182_v58 }
 0x5a4   :  { %389 = vrot.lane.b32.xlu1 %v380_v44, %s3003_s17  ;;  %v1968_v44 = vsel %vm1967_vm5, %v4116_v39, %v1964_v34  ;;  %v2763_v41 = vpack.i.bf16 %v1641_v1, %v4097_v5  ;;  %v1917_v34 = vsub.f32 1.0, %v1916_v9  ;;  %v1926_v9 = vand.u32 2147483648, %v4139_v7 }
 0x5a5   :  { %v4189_v61 = vpop.permute.xlu0 %917  ;;  %v1973_v55 = vsel %vm1970_vm15, %v1972_v53, %v1968_v44  ;;  %v1947_v30 = vsub.f32 1.0, %v1946_v24  ;;  %v869_v44 = vand.u32 2147483648, %v4134_v31  ;;  %vm863_vm5 = vweird.f32 %v4134_v31 }
 0x5a6   :  { %v4199_v6 = vmul.f32 %v1973_v55, %v1912_v22  ;;  %v1918_v42 = vmul.f32 %v4174_v60, %v1917_v34  ;;  %v862_v55 = vadd.f32 %v4167_v43, %v861_v16  ;;  %v867_v24 = vand.u32 2147483647, %v4134_v31  ;;  %vm4230_vm10 = vmor %vm863_vm5, %vm864_vm6 }
 0x5a7   :  { %v1948_v25 = vmul.f32 %v4182_v58, %v1947_v30  ;;  %vm1920_vm15 = vweird.f32 %v4139_v7  ;;  %v1956_v31 = vand.u32 2147483648, %v4145_v18  ;;  %vm4255_vm6 = vmor %vm1950_vm9, %vm1951_vm12  ;;  %vm1867_vm5 = vcmp.eq.f32.partialorder %v4171_v52, 0.0 }
 0x5a8   :  { %v2715_v39 = vpop.permute.xlu1 %2714  ;;  %v1919_v22 = vadd.f32 %v4174_v60, %v1918_v42  ;;  %v2163_v42 = vpop.f32.mrf.mxu2  ;;  %vm4242_vm0 = vmor %vm1920_vm15, %vm1921_vm4  ;;  %vm868_vm4 = vcmp.eq.f32.partialorder %v867_v24, 8.507059e+37  ;;  %vm673_vm15 = vcmask 261120  }
 0x5a9   :  { %v2716_v45 = vunpack.i.l.bf16 %v2715_v39  ;;  %v1949_v30 = vadd.f32 %v4182_v58, %v1948_v25 }
 0x5aa   :  { %v1923_v25 = vsel %vm4242_vm0, %v4174_v60, %v1919_v22 }
 0x5ab   :  { %2754 = vrot.lane.b32.xlu2 %v2753_v62, %s3010_s2  ;;  %v1644_v0 = vpop.f32.mrf.mxu3  ;;  %v1123_v36 = vsel %vm796_vm13, %v3113_v20, %v2716_v45  ;;  %v1348_v45 = vsel %vm1344_vm2, 1.0, %v4095_v57 }
 0x5ac   :  { %2764 = vrot.lane.b32.xlu1 %v2763_v41, %s3006_s22  ;;  %v2768_v53 = vpack.i.bf16 %v1644_v0, %v4105_v12  ;;  %v1978_v41 = vmul.f32 %v4199_v6, %v4199_v6  ;;  %v1924_v0 = vand.u32 2147483647, %v4139_v7  ;;  %2954 = vrcp.f32 %v1348_v45 }
 0x5ad   :  { %v2725_v5 = vpop.permute.xlu0 %2724  ;;  %v1404_v7 = vand.u32 2147483648, %v1348_v45 }
 0x5ae   :  { %v2726_v1 = vunpack.i.l.bf16 %v2725_v5  ;;  %v2727_v34 = vunpack.i.h.bf16 %v2725_v5  ;;  %v866_v5 = vsel %vm4230_vm10, %v4167_v43, %v862_v55  ;;  %v1953_v43 = vsel %vm4255_vm6, %v4182_v58, %v1949_v30 }
 0x5af   :  { %vm1925_vm0 = vcmp.eq.f32.partialorder %v1924_v0, 8.507059e+37  ;;  %vm678_vm6 = vcmask 392192  }
 0x5b0   :  { %v1124_v12 = vsel %vm797_vm3, %v3123_v27, %v2726_v1  ;;  %v1954_v1 = vand.u32 2147483647, %v4145_v18  ;;  %v1144_v18 = vsel %vm797_vm3, %v3123_v27, %v2727_v34  ;;  %v926_v34 = vsub.f32 %v4018_v37, %v4189_v61 }
 0x5b1   :  { %v2743_v62 = vpack.i.bf16 %v1124_v12, %v1123_v36  ;;  %v870_v36 = vor.u32 1.1754944e-38, %v869_v44  ;;  %vm1398_vm3 = vweird.f32 %v1348_v45 }
 0x5b2   :  { %vm1955_vm9 = vcmp.eq.f32.partialorder %v1954_v1, 8.507059e+37  ;;  %v2955_v24 = vpop.eup %2954  ;;  %v2166_v1 = vpop.f32.mrf.mxu2 }
 0x5b3   :  { %2769 = vrot.lane.b32.xlu2 %v2768_v53, %s3006_s22  ;;  %2744 = vrot.lane.b32.xlu0 %v2743_v62, %s3007_s23  ;;  %v2717_v53 = vunpack.i.h.bf16 %v2715_v39  ;;  %v2773_v62 = vpack.i.bf16 %v2163_v42, %v4066_v35  ;;  %v871_v60 = vsel %vm868_vm4, %v870_v36, %v866_v5  ;;  %v1957_v39 = vor.u32 1.1754944e-38, %v1956_v31 }
 0x5b4   :  { %1989 = vrot.lane.b32.xlu1 %v1978_v41, %s3003_s17  ;;  %v1927_v41 = vor.u32 1.1754944e-38, %v1926_v9  ;;  %v4275_v22 = vmul.f32 %v871_v60, %v3477_v3  ;;  %v1394_v2 = vmul.f32 %v2955_v24, %v1348_v45  ;;  %v1402_v5 = vand.u32 2147483647, %v1348_v45 }
 0x5b5   :  { %v1143_v55 = vsel %vm796_vm13, %v3113_v20, %v2717_v53  ;;  %v1958_v58 = vsel %vm1955_vm9, %v1957_v39, %v1953_v43  ;;  %vm1399_vm13 = vweird.f32 %v2955_v24  ;;  %v2798_v53 = vpack.i.bf16 %v4118_v47, %v4085_v38 }
 0x5b6   :  { %v1928_v9 = vsel %vm1925_vm0, %v1927_v41, %v1923_v25  ;;  %v2758_v35 = vpack.i.bf16 %v1144_v18, %v1143_v55  ;;  %v4282_v21 = vmul.f32 %v1958_v58, %v4164_v33  ;;  %v904_v59 = vmul.f32 %v4275_v22, %v4275_v22  ;;  %vm1400_vm10 = vmor %vm1398_vm3, %vm1399_vm13 }
 0x5b7   :  { %v4278_v44 = vmul.f32 %v1928_v9, %v4110_v10  ;;  %v402_v10 = vsub.f32 %v3964_v11, %v4112_v8  ;;  %v930_v33 = vmax.f32 %v926_v34, 0.0  ;;  %v1395_v0 = vsub.f32 1.0, %v1394_v2 }
 0x5b8   :  { %v1977_v30 = vmul.f32 %v4282_v21, %v4282_v21  ;;  %v4823_v8 = vpack.i.bf16 %v3756_v19, %v3730_v17  ;;  %v1405_v41 = vor.u32 1.1754944e-38, %v1404_v7  ;;  %vm1403_vm12 = vcmp.eq.f32.partialorder %v1402_v5, 8.507059e+37 }
 0x5b9   :  { %v1975_v3 = vmul.f32 %v4278_v44, %v4278_v44  ;;  %v406_v61 = vmax.f32 %v402_v10, 0.0  ;;  %v1396_v42 = vmul.f32 %v2955_v24, %v1395_v0  ;;  %v2793_v36 = vpack.i.bf16 %v2166_v1, %v4074_v14  ;;  %v4319_v14 = vpop.permute.xlu2 %1465 }
 0x5ba   :  { %v2823_v19 = vpack.i.bf16 %v4148_v63, %v4090_v4  ;;  %v2803_v47 = vpack.i.bf16 %v4077_v28, %v4015_v46  ;;  %v1871_v18 = vsel %vm1867_vm5, 1.0, %v4171_v52  ;;  %vm1345_vm4 = vcmp.eq.f32.partialorder %v4128_v51, 0.0 }
 0x5bb   :  { %2774 = vrot.lane.b32.xlu2 %v2773_v62, %s3002_s12  ;;  %2759 = vrot.lane.b32.xlu0 %v2758_v35, %s3004_s18  ;;  %v2788_v16 = vpack.i.bf16 %v930_v33, %v406_v61  ;;  %v1397_v31 = vadd.f32 %v2955_v24, %v1396_v42  ;;  %2956 = vrcp.f32 %v1871_v18  ;;  %vm1935_vm9 = vweird.f32 %v1871_v18 }
 0x5bc   :  { %2784 = vrot.lane.b32.xlu1 %v4822_v56, %s3002_s12 }
 0x5bd   :  { %v1401_v25 = vsel %vm1400_vm10, %v2955_v24, %v1397_v31  ;;  %v1468_v24 = vpop.permute.xlu0 %1467  ;;  %v4825_v31 = vld [vmem:[#allocation5_spill] sm:$0xff] }
 0x5be   :  { %v1406_v12 = vsel %vm1403_vm12, %v1405_v41, %v1401_v25  ;;  %v1941_v25 = vand.u32 2147483648, %v1871_v18 }
 0x5bf   :  { %v4308_v17 = vmul.f32 %v1406_v12, %v3938_v26  ;;  %v4323_v26 = vpop.permute.xlu1 %387  ;;  %v1939_v12 = vand.u32 2147483647, %v1871_v18 }
 0x5c1   :  { %v1453_v38 = vmul.f32 %v4308_v17, %v4308_v17  ;;  %v4321_v45 = vpop.permute.xlu2 %911  ;;  %v2957_v56 = vpop.eup %2956  ;;  %vm1940_vm3 = vcmp.eq.f32.partialorder %v1939_v12, 8.507059e+37 }
 0x5c2   :  { %vm1936_vm0 = vweird.f32 %v2957_v56 }
 0x5c3   :  { %913 = vrot.lane.b32.xlu2 %v904_v59, %s3003_s17  ;;  %1987 = vrot.lane.b32.xlu0 %v1977_v30, %s3003_s17  ;;  %v1931_v59 = vmul.f32 %v2957_v56, %v1871_v18  ;;  %v4350_v30 = vsel %vm1345_vm4, 1.0, %v4128_v51  ;;  %vm1937_vm13 = vmor %vm1935_vm9, %vm1936_vm0 }
 0x5c4   :  { %1983 = vrot.lane.b32.xlu1 %v1975_v3, %s3003_s17  ;;  %2958 = vrcp.f32 %v4350_v30 }
 0x5c5   :  { %v1932_v2 = vsub.f32 1.0, %v1931_v59  ;;  %v4352_v61 = vpop.permute.xlu0 %2729 }
 0x5c7   :  { %v4325_v63 = vpop.permute.xlu1 %2734  ;;  %v1933_v0 = vmul.f32 %v2957_v56, %v1932_v2 }
 0x5c9   :  { %v1934_v1 = vadd.f32 %v2957_v56, %v1933_v0  ;;  %v1476_v0 = vsub.f32 %v4059_v54, %v1468_v24  ;;  %v399_v24 = vsub.f32 %v4038_v32, %v4323_v26 }
 0x5cb   :  { %2789 = vrot.lane.b32.xlu2 %v2788_v16, %s3003_s17  ;;  %2779 = vrot.lane.b32.xlu0 %v4823_v8, %s3006_s22  ;;  %v4824_v16 = vld [vmem:[#allocation6_spill] sm:$0xff] }
 0x5d3   :  { %2799 = vrot.lane.b32.xlu2 %v2798_v53, %s3006_s22  ;;  %2794 = vrot.lane.b32.xlu0 %v2793_v36, %s3002_s12 }
 0x5db   :  { %2824 = vrot.lane.b32.xlu2 %v2823_v19, %s3006_s22  ;;  %1461 = vrot.lane.b32.xlu0 %v1453_v38, %s3003_s17 }
 0x5e3   :  { %2804 = vrot.lane.b32.xlu0 %v2803_v47, %s3002_s12 }
 0x5fd   :  { %v2740_v62 = vpop.permute.xlu2 %2739 }
 0x5fe   :  { %v2741_v43 = vunpack.i.l.bf16 %v2740_v62  ;;  %v2742_v5 = vunpack.i.h.bf16 %v2740_v62 }
 0x600   :  { %v671_v39 = vsel %vm165_vm1, %v3920_v23, %v2741_v43  ;;  %v672_v38 = vsel %vm165_vm1, %v3964_v11, %v2742_v5  ;;  %v2959_v43 = vpop.eup %2958  ;;  %v1480_v5 = vmax.f32 %v1476_v0, 0.0 }
 0x605   :  { %v2755_v4 = vpop.permute.xlu2 %2754 }
 0x606   :  { %v2756_v9 = vunpack.i.l.bf16 %v2755_v4  ;;  %v2757_v47 = vunpack.i.h.bf16 %v2755_v4  ;;  %v1409_v4 = vmul.f32 %v2959_v43, %v4350_v30 }
 0x608   :  { %v1410_v59 = vsub.f32 1.0, %v1409_v4 }
 0x60d   :  { %v2770_v46 = vpop.permute.xlu2 %2769 }
 0x60e   :  { %v4331_v28 = vpop.permute.xlu1 %2749  ;;  %v2771_v3 = vunpack.i.l.bf16 %v2770_v46  ;;  %v2772_v41 = vunpack.i.h.bf16 %v2770_v46 }
 0x60f   :  { %v2751_v60 = vunpack.i.l.bf16 %v4331_v28 }
 0x610   :  { %v1674_v42 = vsel %vm1347_vm14, %v4824_v16, %v2771_v3  ;;  %v1694_v18 = vsel %vm1347_vm14, %v4824_v16, %v2772_v41  ;;  %vm1413_vm14 = vweird.f32 %v4350_v30 }
 0x611   :  { %v676_v55 = vsel %vm673_vm15, %v671_v39, %v2751_v60  ;;  %v1938_v60 = vsel %vm1937_vm13, %v2957_v56, %v1934_v1  ;;  %v1417_v1 = vand.u32 2147483647, %v4350_v30 }
 0x612   :  { %v4338_v35 = vsel %vm678_vm6, %v676_v55, %v2756_v9  ;;  %v1942_v9 = vor.u32 1.1754944e-38, %v1941_v25 }
 0x613   :  { %vm1418_vm12 = vcmp.eq.f32.partialorder %v1417_v1, 8.507059e+37  ;;  %v4828_v1 = vld [vmem:[#allocation12_spill] sm:$0xff] }
 0x614   :  { %v1943_v40 = vsel %vm1940_vm3, %v1942_v9, %v1938_v60  ;;  %vm4829_vm0 = vcmp.eq.f32.partialorder %v4828_v1, 0.0 }
 0x615   :  { %v4340_v58 = vpop.permute.xlu2 %2774  ;;  %v4382_v56 = vmul.f32 %v1943_v40, %v4125_v29  ;;  %v1475_v29 = vsub.f32 %v4041_v48, %v4319_v14  ;;  %v923_v14 = vsub.f32 %v4057_v50, %v4321_v45  ;;  %vm4833_vm9 = vmmov %vm4829_vm0 }
 0x616   :  { %v4342_v34 = vpop.permute.xlu1 %389 }
 0x617   :  { %v927_v26 = vmax.f32 %v923_v14, 0.0  ;;  %v4830_v14 = vld [vmem:[#allocation11_spill] sm:$0xff] }
 0x61d   :  { %v4345_v10 = vpop.permute.xlu2 %913 }
 0x61e   :  { %v2765_v23 = vpop.permute.xlu1 %2764 }
 0x61f   :  { %v2766_v33 = vunpack.i.l.bf16 %v2765_v23  ;;  %v2767_v53 = vunpack.i.h.bf16 %v2765_v23  ;;  %v1976_v23 = vmul.f32 %v4382_v56, %v4382_v56 }
 0x621   :  { %v1673_v8 = vsel %vm1346_vm8, %v4825_v31, %v2766_v33  ;;  %v1693_v62 = vsel %vm1346_vm8, %v4825_v31, %v2767_v53  ;;  %v1411_v33 = vmul.f32 %v2959_v43, %v1410_v59  ;;  %vm1414_vm8 = vweird.f32 %v2959_v43 }
 0x622   :  { %v2808_v7 = vpack.i.bf16 %v1674_v42, %v1673_v8  ;;  %v2818_v11 = vpack.i.bf16 %v1694_v18, %v1693_v62  ;;  %vm1415_vm10 = vmor %vm1413_vm14, %vm1414_vm8  ;;  %vm4847_vm14 = vcmask 523264  }
 0x623   :  { %v1412_v8 = vadd.f32 %v2959_v43, %v1411_v33  ;;  %v2776_v33 = vunpack.i.l.bf16 %v4340_v58 }
 0x624   :  { %2809 = vrot.lane.b32.xlu1 %v2808_v7, %s3005_s21  ;;  %v1419_v7 = vand.u32 2147483648, %v4350_v30  ;;  %v403_v30 = vmax.f32 %v399_v24, 0.0 }
 0x625   :  { %v4362_v36 = vpop.permute.xlu2 %2789  ;;  %v4371_v46 = vpop.permute.xlu0 %2744  ;;  %v1416_v12 = vsel %vm1415_vm10, %v2959_v43, %v1412_v8  ;;  %vm4848_vm10 = vmmov %vm4847_vm14 }
 0x626   :  { %v2791_v19 = vunpack.i.l.bf16 %v4362_v36  ;;  %v1990_v2 = vpop.permute.xlu1 %1989  ;;  %v2746_v9 = vunpack.i.l.bf16 %v4371_v46  ;;  %v2858_v4 = vpack.i.bf16 %v927_v26, %v403_v30  ;;  %v2736_v30 = vunpack.i.l.bf16 %v4325_v63 }
 0x627   :  { %v1998_v15 = vsub.f32 %v4199_v6, %v1990_v2  ;;  %v2752_v2 = vunpack.i.h.bf16 %v4331_v28  ;;  %v2792_v57 = vunpack.i.h.bf16 %v4362_v36 }
 0x628   :  { %v677_v39 = vsel %vm673_vm15, %v672_v38, %v2791_v19  ;;  %v1479_v19 = vmax.f32 %v1475_v29, 0.0  ;;  %v1195_v45 = vsel %vm165_vm1, %v3907_v13, %v2746_v9 }
 0x629   :  { %v4377_v55 = vsel %vm678_vm6, %v677_v39, %v2757_v47  ;;  %v2002_v42 = vmax.f32 %v1998_v15, 0.0  ;;  %v1420_v47 = vor.u32 1.1754944e-38, %v1419_v7 }
 0x62b   :  { %v2833_v41 = vpack.i.bf16 %v2002_v42, %v1480_v5  ;;  %v1421_v60 = vsel %vm1418_vm12, %v1420_v47, %v1416_v12  ;;  %vm4849_vm12 = vmmov %vm4848_vm10 }
 0x62c   :  { %2819 = vrot.lane.b32.xlu1 %v2818_v11, %s3010_s2  ;;  %v4407_v11 = vmul.f32 %v1421_v60, %v3977_v49 }
 0x62d   :  { %v4384_v3 = vpop.permute.xlu0 %2759  ;;  %v2800_v39 = vpop.permute.xlu2 %2799 }
 0x62e   :  { %v2785_v18 = vpop.permute.xlu1 %2784  ;;  %v2761_v40 = vunpack.i.l.bf16 %v4384_v3  ;;  %v1454_v15 = vmul.f32 %v4407_v11, %v4407_v11 }
 0x62f   :  { %v2787_v59 = vunpack.i.h.bf16 %v2785_v18 }
 0x631   :  { %v1142_v13 = vsel %vm795_vm7, %v3123_v27, %v2787_v59 }
 0x634   :  { %1985 = vrot.lane.b32.xlu1 %v1976_v23, %s3003_s17  ;;  %v1199_v23 = vsel %vm673_vm15, %v1195_v45, %v2752_v2 }
 0x635   :  { %v1988_v53 = vpop.permute.xlu0 %1987  ;;  %v1203_v49 = vsel %vm678_vm6, %v1199_v23, %v2761_v40  ;;  %v2825_v42 = vpop.permute.xlu2 %2824  ;;  %v4834_v40 = vld [vmem:[#allocation9_spill] sm:$0xff] }
 0x636   :  { %v1997_v25 = vsub.f32 %v4282_v21, %v1988_v53  ;;  %v2873_v29 = vpack.i.bf16 %v1142_v13, %v1203_v49  ;;  %v2826_v7 = vunpack.i.l.bf16 %v2825_v42  ;;  %v2195_v53 = vsel %vm1868_vm11, %v4825_v31, %v2776_v33 }
 0x637   :  { %v2827_v45 = vunpack.i.h.bf16 %v2825_v42  ;;  %vm4835_vm13 = vcmp.eq.f32.partialorder %v4834_v40, 0.0  ;;  %v2731_v49 = vunpack.i.l.bf16 %v4352_v61  ;;  %v2737_v13 = vunpack.i.h.bf16 %v4325_v63  ;;  %v2309_v40 = vld [vmem:[%s4760_s4 + $0x60] sm:$0xff] }
 0x638   :  { %v2001_v38 = vmax.f32 %v1997_v25, 0.0  ;;  %v1672_v47 = vsel %vm1345_vm4, %v4824_v16, %v2826_v7  ;;  %v1121_v59 = vsel %vm4835_vm13, %v3113_v20, %v2736_v30  ;;  %v4838_v7 = vld [vmem:[#allocation8_spill] sm:$0xff] }
 0x639   :  { %v1692_v0 = vsel %vm1345_vm4, %v4824_v16, %v2827_v45  ;;  %vm4840_vm4 = vmmov %vm4835_vm13  ;;  %v2326_v45 = vld [vmem:[%s4760_s4 + $0xe8] sm:$0xff] }
 0x63a   :  { %v2813_v62 = vpack.i.bf16 %v2001_v38, %v1479_v19  ;;  %v2786_v19 = vunpack.i.l.bf16 %v2785_v18  ;;  %v2777_v38 = vunpack.i.h.bf16 %v4340_v58  ;;  %v1141_v5 = vsel %vm4840_vm4, %v3113_v20, %v2737_v13  ;;  %v2305_v13 = vld [vmem:[%s4760_s4 + $0x40] sm:$0xff] }
 0x63b   :  { %v2868_v1 = vpack.i.bf16 %v4338_v35, %v1141_v5  ;;  %v2319_v5 = vld [vmem:[%s4760_s4 + $0xb0] sm:$0xff] }
 0x63c   :  { %2834 = vrot.lane.b32.xlu1 %v2833_v41, %s3003_s17  ;;  %2814 = vrot.lane.b32.xlu0 %v2813_v62, %s3003_s17  ;;  %v2801_v41 = vunpack.i.l.bf16 %v2800_v39  ;;  %v4831_v62 = vld [vmem:[#allocation10_spill] sm:$0xff]  ;;  %v1122_v58 = vsel %vm795_vm7, %v3123_v27, %v2786_v19  ;;  %vm4839_vm7 = vcmp.eq.f32.partialorder %v4838_v7, 0.0 }
 0x63d   :  { %v4404_v43 = vpop.permute.xlu0 %2779  ;;  %v4832_v60 = vpack.i.bf16 %v4830_v14, %v4831_v62  ;;  %v2853_v23 = vpack.i.bf16 %v1122_v58, %v1121_v59  ;;  %v597_v51 = vsel %vm4839_vm7, %v3113_v20, %v2731_v49  ;;  %vm4842_vm3 = vmmov %vm4839_vm7  ;;  %v2327_v58 = vld [vmem:[%s4760_s4 + $0xf0] sm:$0xff]  ;;  %v2325_v59 = vld [vmem:[%s4760_s4 + $0xe0] sm:$0xff] }
 0x63e   :  { %v1671_v9 = vsel %vm1344_vm2, %v4825_v31, %v2801_v41  ;;  %v2781_v33 = vunpack.i.l.bf16 %v4404_v43  ;;  %v2306_v49 = vld [vmem:[%s4760_s4 + $0x48] sm:$0xff] }
 0x63f   :  { %v2888_v18 = vpack.i.bf16 %v1672_v47, %v1671_v9  ;;  %v4843_v47 = vld [vmem:[#allocation16_spill] sm:$0xff] }
 0x640   :  { %v400_v14 = vsub.f32 %v4843_v47, %v4342_v34  ;;  %v2312_v34 = vld [vmem:[%s4760_s4 + $0x78] sm:$0xff] }
 0x641   :  { %2329 = vmatpush.msrb.mxu0 %v2312_v34 }
 0x644   :  { %2859 = vrot.lane.b32.xlu1 %v2858_v4, %s3003_s17  ;;  %1463 = vrot.lane.b32.xlu0 %v1454_v15, %s3003_s17  ;;  %v2215_v4 = vsel %vm1868_vm11, %v4825_v31, %v2777_v38  ;;  %v2802_v15 = vunpack.i.h.bf16 %v2800_v39  ;;  %v4836_v39 = vld [vmem:[#allocation13_spill] sm:$0xff] }
 0x645   :  { %v2795_v8 = vpop.permute.xlu0 %2794  ;;  %vm4837_vm11 = vcmp.eq.f32.partialorder %v4836_v39, 0.0 }
 0x646   :  { %v2796_v28 = vunpack.i.l.bf16 %v2795_v8  ;;  %v2797_v12 = vunpack.i.h.bf16 %v2795_v8  ;;  %v1691_v42 = vsel %vm1344_vm2, %v4825_v31, %v2802_v15  ;;  %v598_v8 = vsel %vm4837_vm11, %v3123_v27, %v2781_v33  ;;  %vm4841_vm2 = vmmov %vm4837_vm11  ;;  %v2324_v15 = vld [vmem:[%s4760_s4 + $0xd8] sm:$0xff]  ;;  %v2323_v33 = vld [vmem:[%s4760_s4 + $0xd0] sm:$0xff] }
 0x647   :  { %v2848_v63 = vpack.i.bf16 %v598_v8, %v597_v51  ;;  %v2304_v8 = vld [vmem:[%s4760_s4 + $0x38] sm:$0xff]  ;;  %v2303_v51 = vld [vmem:[%s4760_s4 + $0x30] sm:$0xff] }
 0x648   :  { %v2196_v25 = vsel %vm4829_vm0, %v4824_v16, %v2796_v28  ;;  %v2216_v26 = vsel %vm4833_vm9, %v4824_v16, %v2797_v12  ;;  %v2747_v28 = vunpack.i.h.bf16 %v4371_v46  ;;  %v1984_v12 = vpop.permute.xlu1 %1983  ;;  %vm4850_vm0 = vmmov %vm4848_vm10 }
 0x649   :  { %v2838_v24 = vpack.i.bf16 %v2196_v25, %v2195_v53  ;;  %v2843_v2 = vpack.i.bf16 %v2216_v26, %v2215_v4  ;;  %v2782_v53 = vunpack.i.h.bf16 %v4404_v43  ;;  %v2762_v25 = vunpack.i.h.bf16 %v4384_v3  ;;  %v2311_v26 = vld [vmem:[%s4760_s4 + $0x70] sm:$0xff]  ;;  %v2310_v4 = vld [vmem:[%s4760_s4 + $0x68] sm:$0xff]  ;;  %vm4851_vm9 = vmmov %vm4850_vm0 }
 0x64a   :  { %v1196_v46 = vsel %vm165_vm1, %v4018_v37, %v2747_v28  ;;  %v924_v3 = vsub.f32 %v4275_v22, %v4345_v10  ;;  %2330 = vmatpush.msrb.mxu0 %v2311_v26  ;;  %v2320_v28 = vld [vmem:[%s4760_s4 + $0xb8] sm:$0xff]  ;;  %vm4852_vm13 = vmmov %vm4850_vm0 }
 0x64b   :  { %2839 = vrot.lane.b32.xlu2 %v2838_v24, %s3007_s23  ;;  %v2732_v24 = vunpack.i.h.bf16 %v4352_v61  ;;  %v1200_v41 = vsel %vm673_vm15, %v1196_v46, %v2792_v57  ;;  %v618_v36 = vsel %vm4841_vm2, %v3123_v27, %v2782_v53  ;;  %v1995_v27 = vsub.f32 %v4278_v44, %v1984_v12  ;;  %v2318_v57 = vld [vmem:[%s4760_s4 + $0xa8] sm:$0xff]  ;;  %v2301_v53 = vld [vmem:[%s4760_s4 + $0x20] sm:$0xff]  ;;  %v2300_v46 = vld [vmem:[%s4760_s4 + $0x18] sm:$0xff] }
 0x64c   :  { %2874 = vrot.lane.b32.xlu1 %v2873_v29, %s3004_s18  ;;  %2829 = vrot.lane.b32.xlu0 %v4832_v60, %s3002_s12  ;;  %v2903_v29 = vpack.i.bf16 %v1692_v0, %v1691_v42  ;;  %v1204_v43 = vsel %vm678_vm6, %v1200_v41, %v2762_v25  ;;  %v928_v62 = vmax.f32 %v924_v3, 0.0  ;;  %v404_v60 = vmax.f32 %v400_v14, 0.0  ;;  %v2322_v0 = vld [vmem:[%s4760_s4 + $0xc8] sm:$0xff]  ;;  %v2321_v42 = vld [vmem:[%s4760_s4 + $0xc0] sm:$0xff]  ;;  %vm4853_vm11 = vmmov %vm4850_vm0 }
 0x64d   :  { %v1462_v35 = vpop.permute.xlu0 %1461  ;;  %v617_v37 = vsel %vm4842_vm3, %v3113_v20, %v2732_v24  ;;  %v2883_v19 = vpack.i.bf16 %v1204_v43, %v4377_v55  ;;  %v1999_v30 = vmax.f32 %v1995_v27, 0.0  ;;  %v2328_v55 = vld [vmem:[%s4760_s4 + $0xf8] sm:$0xff]  ;;  %2331 = vmatpush.msrb.mxu0 %v2310_v4  ;;  %v2315_v43 = vld [vmem:[%s4760_s4 + $0x90] sm:$0xff]  ;;  %v2314_v3 = vld [vmem:[%s4760_s4 + $0x88] sm:$0xff] }
 0x64e   :  { %v2863_v61 = vpack.i.bf16 %v618_v36, %v617_v37  ;;  %v1473_v38 = vsub.f32 %v4308_v17, %v1462_v35  ;;  %v2878_v10 = vpack.i.bf16 %v928_v62, %v404_v60  ;;  %2358 = vmatpush.msrb.mxu1 %v2328_v55  ;;  %v2316_v25 = vld [vmem:[%s4760_s4 + $0x98] sm:$0xff]  ;;  %v2299_v36 = vld [vmem:[%s4760_s4 + $0x10] sm:$0xff]  ;;  %v2298_v37 = vld [vmem:[%s4760_s4 + $0x8] sm:$0xff] }
 0x64f   :  { %2332 = vmatpush.msrb.mxu0 %v2309_v40  ;;  %v2297_v12 = vld [vmem:[%s4760_s4] sm:$0xff]  ;;  %vm4854_vm7 = vmmov %vm4850_vm0 }
 0x650   :  { %v1477_v20 = vmax.f32 %v1473_v38, 0.0  ;;  %2359 = vmatpush.msrb.mxu1 %v2327_v58 }
 0x652   :  { %v2898_v9 = vpack.i.bf16 %v1999_v30, %v1477_v20  ;;  %2360 = vmatpush.msrb.mxu1 %v2326_v45 }
 0x653   :  { %2844 = vrot.lane.b32.xlu2 %v2843_v2, %s3004_s18  ;;  %v2308_v2 = vld [vmem:[%s4760_s4 + $0x58] sm:$0xff] }
 0x654   :  { %2889 = vrot.lane.b32.xlu1 %v2888_v18, %s3005_s21  ;;  %2854 = vrot.lane.b32.xlu0 %v2853_v23, %s3007_s23  ;;  %v2307_v23 = vld [vmem:[%s4760_s4 + $0x50] sm:$0xff] }
 0x655   :  { %2361 = vmatpush.msrb.mxu1 %v2325_v59  ;;  %2333 = vmatpush.msrb.mxu0 %v2308_v2 }
 0x657   :  { %2362 = vmatpush.msrb.mxu1 %v2324_v15  ;;  %2334 = vmatpush.msrb.mxu0 %v2307_v23  ;;  %v4844_v15 = vld [vmem:[#allocation15_spill] sm:$0xff] }
 0x658   :  { %vm4845_vm8 = vcmp.eq.f32.partialorder %v4844_v15, 0.0 }
 0x659   :  { %2363 = vmatpush.msrb.mxu1 %v2323_v33  ;;  %2335 = vmatpush.msrb.mxu0 %v2306_v49 }
 0x65b   :  { %2849 = vrot.lane.b32.xlu2 %v2848_v63, %s3005_s21  ;;  %2364 = vmatpush.msrb.mxu1 %v2322_v0  ;;  %v2302_v63 = vld [vmem:[%s4760_s4 + $0x28] sm:$0xff] }
 0x65c   :  { %2904 = vrot.lane.b32.xlu1 %v2903_v29, %s3010_s2  ;;  %2869 = vrot.lane.b32.xlu0 %v2868_v1, %s3004_s18  ;;  %v4564_v29 = vpop.permute.xlu0 %2804  ;;  %v2317_v1 = vld [vmem:[%s4760_s4 + $0xa0] sm:$0xff] }
 0x65d   :  { %2336 = vmatpush.msrb.mxu0 %v2305_v13  ;;  %2365 = vmatpush.msrb.mxu1 %v2321_v42  ;;  %v2806_v34 = vunpack.i.l.bf16 %v4564_v29 }
 0x65f   :  { %2337 = vmatpush.msrb.mxu0 %v2304_v8  ;;  %2366 = vmatpush.msrb.mxu1 %v2320_v28  ;;  %v2193_v23 = vsel %vm4845_vm8, %v4825_v31, %v2806_v34 }
 0x661   :  { %2338 = vmatpush.msrb.mxu0 %v2303_v51  ;;  %2367 = vmatpush.msrb.mxu1 %v2319_v5  ;;  %v2807_v5 = vunpack.i.h.bf16 %v4564_v29 }
 0x663   :  { %2864 = vrot.lane.b32.xlu2 %v2863_v61, %s3010_s2  ;;  %2339 = vmatpush.msrb.mxu0 %v2302_v63  ;;  %v2313_v61 = vld [vmem:[%s4760_s4 + $0x80] sm:$0xff] }
 0x664   :  { %2884 = vrot.lane.b32.xlu0 %v2883_v19, %s3004_s18  ;;  %2368 = vmatpush.msrb.mxu1 %v2318_v57 }
 0x665   :  { %2340 = vmatpush.msrb.mxu0 %v2301_v53 }
 0x666   :  { %2369 = vmatpush.msrb.mxu1 %v2317_v1 }
 0x667   :  { %2341 = vmatpush.msrb.mxu0 %v2300_v46 }
 0x668   :  { %2370 = vmatpush.msrb.mxu1 %v2316_v25 }
 0x669   :  { %2342 = vmatpush.msrb.mxu0 %v2299_v36 }
 0x66a   :  { %2371 = vmatpush.msrb.mxu1 %v2315_v43 }
 0x66b   :  { %2879 = vrot.lane.b32.xlu2 %v2878_v10, %s3003_s17  ;;  %2343 = vmatpush.msrb.mxu0 %v2298_v37 }
 0x66c   :  { %2899 = vrot.lane.b32.xlu0 %v2898_v9, %s3003_s17  ;;  %2372 = vmatpush.msrb.mxu1 %v2314_v3 }
 0x66d   :  { %2344 = vmatpush.msrb.mxu0 %v2297_v12 }
 0x66e   :  { %2373 = vmatpush.msrb.mxu1 %v2313_v61 }
 0x696   :  { %v4518_v18 = vpop.permute.xlu1 %2809 }
 0x697   :  { %v2811_v4 = vunpack.i.l.bf16 %v4518_v18 }
 0x699   :  { %v1745_v42 = vsel %vm165_vm1, %v4041_v48, %v2811_v4 }
 0x69e   :  { %v4556_v39 = vpop.permute.xlu1 %2819 }
 0x69f   :  { %v2821_v52 = vunpack.i.l.bf16 %v4556_v39  ;;  %v2822_v43 = vunpack.i.h.bf16 %v4556_v39 }
 0x6a5   :  { %v4566_v7 = vpop.permute.xlu2 %2839 }
 0x6a6   :  { %v1986_v41 = vpop.permute.xlu1 %1985  ;;  %v2841_v27 = vunpack.i.l.bf16 %v4566_v7  ;;  %v2842_v57 = vunpack.i.h.bf16 %v4566_v7 }
 0x6a7   :  { %v1996_v19 = vsub.f32 %v4382_v56, %v1986_v41 }
 0x6a8   :  { %v2267_v55 = vsel %vm165_vm1, %v4282_v21, %v2841_v27 }
 0x6a9   :  { %v2000_v62 = vmax.f32 %v1996_v19, 0.0 }
 0x6ad   :  { %v4598_v35 = vpop.permute.xlu2 %2844 }
 0x6ae   :  { %v2815_v24 = vpop.permute.xlu0 %2814  ;;  %v2835_v20 = vpop.permute.xlu1 %2834  ;;  %v2846_v45 = vunpack.i.l.bf16 %v4598_v35 }
 0x6af   :  { %v2817_v30 = vunpack.i.h.bf16 %v2815_v24  ;;  %v2816_v2 = vunpack.i.l.bf16 %v2815_v24  ;;  %v2836_v53 = vunpack.i.l.bf16 %v2835_v20  ;;  %v2837_v1 = vunpack.i.h.bf16 %v2835_v20 }
 0x6b1   :  { %v2271_v26 = vsel %vm673_vm15, %v2267_v55, %v2817_v30  ;;  %v1749_v28 = vsel %vm673_vm15, %v1745_v42, %v2816_v2 }
 0x6b2   :  { %v2275_v49 = vsel %vm678_vm6, %v2271_v26, %v2846_v45  ;;  %v1753_v48 = vsel %vm678_vm6, %v1749_v28, %v2821_v52 }
 0x6b5   :  { %v4615_v10 = vpop.permute.xlu2 %2849 }
 0x6b6   :  { %v1464_v38 = vpop.permute.xlu0 %1463  ;;  %v2860_v8 = vpop.permute.xlu1 %2859  ;;  %v2851_v46 = vunpack.i.l.bf16 %v4615_v10 }
 0x6b7   :  { %v1474_v14 = vsub.f32 %v4407_v11, %v1464_v38  ;;  %v2861_v36 = vunpack.i.l.bf16 %v2860_v8 }
 0x6b8   :  { %v669_v3 = vsel %vm165_vm1, %v4038_v32, %v2851_v46 }
 0x6b9   :  { %v1478_v60 = vmax.f32 %v1474_v14, 0.0  ;;  %v674_v27 = vsel %vm673_vm15, %v669_v3, %v2861_v36 }
 0x6bb   :  { %v2918_v9 = vpack.i.bf16 %v2000_v62, %v1478_v60  ;;  %v2852_v60 = vunpack.i.h.bf16 %v4615_v10 }
 0x6bd   :  { %2919 = vrot.lane.b32.xlu1 %v2918_v9, %s3003_s17  ;;  %v2865_v51 = vpop.permute.xlu2 %2864  ;;  %v670_v10 = vsel %vm165_vm1, %v4843_v47, %v2852_v60  ;;  %v2482_v60 = vld [vmem:[%s4761_s5 + $0x78] sm:$0xff] }
 0x6be   :  { %v2830_v58 = vpop.permute.xlu0 %2829  ;;  %v2866_v12 = vunpack.i.l.bf16 %v2865_v51  ;;  %v2867_v2 = vunpack.i.h.bf16 %v2865_v51  ;;  %2483 = vmatpush.msrb.mxu3 %v2482_v60 }
 0x6bf   :  { %v2832_v40 = vunpack.i.h.bf16 %v2830_v58  ;;  %v2831_v59 = vunpack.i.l.bf16 %v2830_v58 }
 0x6c1   :  { %v2214_v21 = vsel %vm1867_vm5, %v4824_v16, %v2832_v40  ;;  %v2194_v33 = vsel %vm1867_vm5, %v4824_v16, %v2831_v59  ;;  %v2812_v16 = vunpack.i.h.bf16 %v4518_v18  ;;  %vm4846_vm5 = vmmov %vm4845_vm8  ;;  %v2268_v18 = vsel %vm165_vm1, %v4199_v6, %v2842_v57 }
 0x6c2   :  { %v2893_v0 = vpack.i.bf16 %v2194_v33, %v2193_v23  ;;  %v2913_v13 = vpack.i.bf16 %v2214_v21, %v2275_v49  ;;  %v2213_v25 = vsel %vm4846_vm5, %v4825_v31, %v2807_v5  ;;  %v2272_v37 = vsel %vm673_vm15, %v2268_v18, %v2837_v1 }
 0x6c3   :  { %v1746_v29 = vsel %vm165_vm1, %v4059_v54, %v2812_v16  ;;  %v2908_v41 = vpack.i.bf16 %v1753_v48, %v2213_v25  ;;  %v2847_v31 = vunpack.i.h.bf16 %v4598_v35  ;;  %v2875_v54 = vpop.permute.xlu1 %2874  ;;  %v2862_v6 = vunpack.i.h.bf16 %v2860_v8 }
 0x6c4   :  { %2914 = vrot.lane.b32.xlu0 %v2913_v13, %s3004_s18  ;;  %2894 = vrot.lane.b32.xlu2 %v2893_v0, %s3007_s23  ;;  %v1750_v7 = vsel %vm673_vm15, %v1746_v29, %v2836_v53  ;;  %v2876_v30 = vunpack.i.l.bf16 %v2875_v54  ;;  %v679_v35 = vsel %vm678_vm6, %v674_v27, %v2866_v12  ;;  %v2877_v15 = vunpack.i.h.bf16 %v2875_v54 }
 0x6c5   :  { %v2880_v19 = vpop.permute.xlu2 %2879  ;;  %v1754_v39 = vsel %vm678_vm6, %v1750_v7, %v2822_v43  ;;  %v2276_v32 = vsel %vm678_vm6, %v2272_v37, %v2847_v31 }
 0x6c6   :  { %v2855_v63 = vpop.permute.xlu0 %2854  ;;  %v2923_v4 = vpack.i.bf16 %v2276_v32, %v1754_v39  ;;  %v2882_v45 = vunpack.i.h.bf16 %v2880_v19 }
 0x6c7   :  { %v2856_v24 = vunpack.i.l.bf16 %v2855_v63  ;;  %v2857_v38 = vunpack.i.h.bf16 %v2855_v63 }
 0x6c9   :  { %v1193_v61 = vsel %vm165_vm1, %v4057_v50, %v2856_v24  ;;  %v2881_v50 = vunpack.i.l.bf16 %v2880_v19  ;;  %v1194_v26 = vsel %vm165_vm1, %v4275_v22, %v2857_v38 }
 0x6ca   :  { %v1197_v9 = vsel %vm673_vm15, %v1193_v61, %v2862_v6  ;;  %v1198_v59 = vsel %vm673_vm15, %v1194_v26, %v2882_v45  ;;  %v2475_v26 = vld [vmem:[%s4761_s5 + $0x40] sm:$0xff] }
 0x6cb   :  { %v675_v40 = vsel %vm673_vm15, %v670_v10, %v2881_v50  ;;  %v1202_v49 = vsel %vm678_vm6, %v1198_v59, %v2877_v15  ;;  %v2890_v47 = vpop.permute.xlu1 %2889  ;;  %v2477_v50 = vld [vmem:[%s4761_s5 + $0x50] sm:$0xff]  ;;  %v2472_v59 = vld [vmem:[%s4761_s5 + $0x28] sm:$0xff] }
 0x6cc   :  { %2909 = vrot.lane.b32.xlu2 %v2908_v41, %s3004_s18  ;;  %v680_v33 = vsel %vm678_vm6, %v675_v40, %v2867_v2  ;;  %v2891_v28 = vunpack.i.l.bf16 %v2890_v47  ;;  %v2892_v46 = vunpack.i.h.bf16 %v2890_v47  ;;  %v2473_v10 = vld [vmem:[%s4761_s5 + $0x30] sm:$0xff]  ;;  %v2471_v2 = vld [vmem:[%s4761_s5 + $0x20] sm:$0xff] }
 0x6ce   :  { %v2870_v14 = vpop.permute.xlu0 %2869  ;;  %v1743_v52 = vsel %vm165_vm1, %v4308_v17, %v2891_v28  ;;  %v1744_v18 = vsel %vm165_vm1, %v4407_v11, %v2892_v46 }
 0x6cf   :  { %v2872_v62 = vunpack.i.h.bf16 %v2870_v14  ;;  %v2871_v20 = vunpack.i.l.bf16 %v2870_v14 }
 0x6d1   :  { %v1221_v34 = vsel %vm4847_vm14, %v679_v35, %v2872_v62  ;;  %v1201_v55 = vsel %vm678_vm6, %v1197_v9, %v2871_v20  ;;  %v2479_v35 = vld [vmem:[%s4761_s5 + $0x60] sm:$0xff]  ;;  %v2478_v9 = vld [vmem:[%s4761_s5 + $0x58] sm:$0xff] }
 0x6d2   :  { %2345 = vmatmul.f32.vlgmr.msrb.gmra.mxu0 %v1221_v34  ;;  %v1223_v58 = vsel %vm4848_vm10, %v1201_v55, %v2876_v30  ;;  %v2481_v30 = vld [vmem:[%s4761_s5 + $0x70] sm:$0xff]  ;;  %v2476_v34 = vld [vmem:[%s4761_s5 + $0x48] sm:$0xff] }
 0x6d3   :  { %2374 = vmatmul.f32.vlgmr.msrb.gmra.mxu1 %v1223_v58  ;;  %v2905_v51 = vpop.permute.xlu1 %2904  ;;  %2484 = vmatpush.msrb.mxu3 %v2481_v30  ;;  %v2474_v58 = vld [vmem:[%s4761_s5 + $0x38] sm:$0xff] }
 0x6d4   :  { %2924 = vrot.lane.b32.xlu2 %v2923_v4, %s3004_s18  ;;  %v2906_v63 = vunpack.i.l.bf16 %v2905_v51  ;;  %v2907_v7 = vunpack.i.h.bf16 %v2905_v51 }
 0x6d6   :  { %v2885_v23 = vpop.permute.xlu0 %2884 }
 0x6d7   :  { %v2887_v21 = vunpack.i.h.bf16 %v2885_v23  ;;  %v2886_v22 = vunpack.i.l.bf16 %v2885_v23  ;;  %v2470_v23 = vld [vmem:[%s4761_s5 + $0x18] sm:$0xff] }
 0x6d9   :  { %v1222_v0 = vsel %vm4849_vm12, %v680_v33, %v2886_v22  ;;  %v1224_v13 = vsel %vm4850_vm0, %v1202_v49, %v2887_v21  ;;  %v2469_v33 = vld [vmem:[%s4761_s5 + $0x10] sm:$0xff] }
 0x6da   :  { %2348 = vmatmul.f32.gmra.mxu0 %v1222_v0 }
 0x6db   :  { %2377 = vmatmul.f32.gmra.mxu1 %v1224_v13  ;;  %v2468_v13 = vld [vmem:[%s4761_s5 + $0x8] sm:$0xff] }
 0x6de   :  { %v2900_v42 = vpop.permute.xlu0 %2899 }
 0x6df   :  { %v2901_v5 = vunpack.i.l.bf16 %v2900_v42  ;;  %v2902_v31 = vunpack.i.h.bf16 %v2900_v42  ;;  %v2467_v42 = vld [vmem:[%s4761_s5] sm:$0xff] }
 0x6e1   :  { %v1747_v16 = vsel %vm673_vm15, %v1743_v52, %v2901_v5 }
 0x6e2   :  { %v1751_v48 = vsel %vm678_vm6, %v1747_v16, %v2906_v63 }
 0x71e   :  { %v2895_v8 = vpop.permute.xlu2 %2894 }
 0x71f   :  { %v2896_v29 = vunpack.i.l.bf16 %v2895_v8  ;;  %v2897_v19 = vunpack.i.h.bf16 %v2895_v8 }
 0x721   :  { %v2265_v37 = vsel %vm165_vm1, %v4278_v44, %v2896_v29  ;;  %v2266_v44 = vsel %vm165_vm1, %v4382_v56, %v2897_v19  ;;  %v2480_v56 = vld [vmem:[%s4761_s5 + $0x68] sm:$0xff]  ;;  %s3011_s5 = smov [#allocation2]  }
 0x722   :  { %v2269_v6 = vsel %vm673_vm15, %v2265_v37, %v2902_v31  ;;  %2485 = vmatpush.msrb.mxu3 %v2480_v56  ;;  %s2520_s23 = sshll.u32 %s3011_s5, 4  ;;  %s2521_s23 = int_to_ptr.vmem [resolvable:$true] %s2520_s23 }
 0x724   :  { %2486 = vmatpush.msrb.mxu3 %v2479_v35 }
 0x726   :  { %v2910_v57 = vpop.permute.xlu2 %2909  ;;  %2487 = vmatpush.msrb.mxu3 %v2478_v9 }
 0x727   :  { %v2912_v53 = vunpack.i.h.bf16 %v2910_v57  ;;  %v2911_v3 = vunpack.i.l.bf16 %v2910_v57 }
 0x728   :  { %2488 = vmatpush.msrb.mxu3 %v2477_v50 }
 0x729   :  { %v2293_v1 = vsel %vm4851_vm9, %v1751_v48, %v2912_v53  ;;  %v2273_v11 = vsel %vm678_vm6, %v2269_v6, %v2911_v3 }
 0x72a   :  { %2351 = vmatmul.f32.gmra.mxu0 %v2293_v1  ;;  %2489 = vmatpush.msrb.mxu3 %v2476_v34 }
 0x72c   :  { %2490 = vmatpush.msrb.mxu3 %v2475_v26 }
 0x72e   :  { %v2925_v25 = vpop.permute.xlu2 %2924  ;;  %2491 = vmatpush.msrb.mxu3 %v2474_v58 }
 0x72f   :  { %v2920_v24 = vpop.permute.xlu1 %2919  ;;  %v2926_v17 = vunpack.i.l.bf16 %v2925_v25  ;;  %v2927_v20 = vunpack.i.h.bf16 %v2925_v25 }
 0x730   :  { %v2921_v41 = vunpack.i.l.bf16 %v2920_v24  ;;  %v2922_v38 = vunpack.i.h.bf16 %v2920_v24  ;;  %2492 = vmatpush.msrb.mxu3 %v2473_v10 }
 0x732   :  { %v1748_v36 = vsel %vm673_vm15, %v1744_v18, %v2921_v41  ;;  %v2270_v27 = vsel %vm673_vm15, %v2266_v44, %v2922_v38  ;;  %2493 = vmatpush.msrb.mxu3 %v2472_v59 }
 0x733   :  { %v1752_v43 = vsel %vm678_vm6, %v1748_v36, %v2907_v7 }
 0x734   :  { %v2294_v12 = vsel %vm4852_vm13, %v1752_v43, %v2926_v17  ;;  %2494 = vmatpush.msrb.mxu3 %v2471_v2 }
 0x735   :  { %2354 = vmatmul.f32.gmra.mxu0 %v2294_v12 }
 0x736   :  { %v2915_v54 = vpop.permute.xlu0 %2914  ;;  %2495 = vmatpush.msrb.mxu3 %v2470_v23 }
 0x737   :  { %v2916_v61 = vunpack.i.l.bf16 %v2915_v54  ;;  %v2917_v39 = vunpack.i.h.bf16 %v2915_v54 }
 0x738   :  { %2496 = vmatpush.msrb.mxu3 %v2469_v33 }
 0x739   :  { %v2295_v14 = vsel %vm4853_vm11, %v2273_v11, %v2916_v61  ;;  %v2274_v62 = vsel %vm678_vm6, %v2270_v27, %v2917_v39 }
 0x73a   :  { %2380 = vmatmul.f32.gmra.mxu1 %v2295_v14  ;;  %v2296_v32 = vsel %vm4854_vm7, %v2274_v62, %v2927_v20  ;;  %2497 = vmatpush.msrb.mxu3 %v2468_v13 }
 0x73c   :  { %2498 = vmatpush.msrb.mxu3 %v2467_v42 }
 0x742   :  { %2383 = vmatmul.f32.gmra.mxu1 %v2296_v32 }
 0x74f   :  { %v2346_v55 = vpop.f32.mrf.mxu0 }
 0x750   :  { %v2375_v4 = vpop.f32.mrf.mxu1 }
 0x751   :  { %v2376_v45 = vadd.f32 %v2375_v4, %v2346_v55 }
 0x753   :  { %v2660_v40 = vmul.f32 -1.442695, %v2376_v45 }
 0x755   :  { %2960 = vpow2.f32 %v2660_v40 }
 0x757   :  { %v2349_v15 = vpop.f32.mrf.mxu0 }
 0x758   :  { %v2378_v21 = vpop.f32.mrf.mxu1 }
 0x759   :  { %v2379_v22 = vadd.f32 %v2378_v21, %v2349_v15 }
 0x75b   :  { %v2961_v49 = vpop.eup %2960  ;;  %v2661_v0 = vmul.f32 -1.442695, %v2379_v22 }
 0x75c   :  { %v2399_v47 = vadd.f32 1.0, %v2961_v49 }
 0x75d   :  { %2962 = vpow2.f32 %v2661_v0 }
 0x75e   :  { %2964 = vrcp.f32 %v2399_v47  ;;  %v2414_v16 = vand.u32 2147483648, %v2399_v47  ;;  %v2412_v57 = vand.u32 2147483647, %v2399_v47  ;;  %vm2408_vm15 = vweird.f32 %v2399_v47 }
 0x760   :  { %v2415_v1 = vor.u32 1.1754944e-38, %v2414_v16  ;;  %vm2413_vm4 = vcmp.eq.f32.partialorder %v2412_v57, 8.507059e+37 }
 0x763   :  { %v2963_v8 = vpop.eup %2962 }
 0x764   :  { %v2965_v28 = vpop.eup %2964  ;;  %v2400_v5 = vadd.f32 1.0, %v2963_v8 }
 0x765   :  { %v2404_v51 = vmul.f32 %v2965_v28, %v2399_v47  ;;  %vm2409_vm1 = vweird.f32 %v2965_v28 }
 0x766   :  { %2966 = vrcp.f32 %v2400_v5  ;;  %vm2410_vm6 = vmor %vm2408_vm15, %vm2409_vm1  ;;  %v2429_v18 = vand.u32 2147483648, %v2400_v5  ;;  %v2427_v17 = vand.u32 2147483647, %v2400_v5  ;;  %vm2423_vm3 = vweird.f32 %v2400_v5 }
 0x767   :  { %v2405_v52 = vsub.f32 1.0, %v2404_v51  ;;  %vm4855_vm1 = vcmask 523264  }
 0x768   :  { %v2430_v43 = vor.u32 1.1754944e-38, %v2429_v18  ;;  %vm2428_vm5 = vcmp.eq.f32.partialorder %v2427_v17, 8.507059e+37  ;;  %vm4856_vm15 = vmmov %vm4855_vm1 }
 0x769   :  { %v2406_v63 = vmul.f32 %v2965_v28, %v2405_v52 }
 0x76b   :  { %v2407_v53 = vadd.f32 %v2965_v28, %v2406_v63 }
 0x76c   :  { %v2967_v48 = vpop.eup %2966 }
 0x76d   :  { %v2411_v46 = vsel %vm2410_vm6, %v2965_v28, %v2407_v53  ;;  %v2419_v25 = vmul.f32 %v2967_v48, %v2400_v5  ;;  %vm2424_vm2 = vweird.f32 %v2967_v48  ;;  %vm4857_vm6 = vmmov %vm4855_vm1 }
 0x76e   :  { %v2416_v24 = vsel %vm2413_vm4, %v2415_v1, %v2411_v46  ;;  %vm2425_vm8 = vmor %vm2423_vm3, %vm2424_vm2 }
 0x76f   :  { %v2463_v29 = vmul.f32 %v2416_v24, %v2376_v45  ;;  %v2420_v41 = vsub.f32 1.0, %v2419_v25  ;;  %vm4858_vm4 = vmmov %vm4855_vm1 }
 0x771   :  { %2499 = vmatmul.f32.vlgmr.msrb.gmra.mxu3 %v2463_v29  ;;  %v2421_v7 = vmul.f32 %v2967_v48, %v2420_v41 }
 0x773   :  { %v2422_v36 = vadd.f32 %v2967_v48, %v2421_v7 }
 0x775   :  { %v2426_v37 = vsel %vm2425_vm8, %v2967_v48, %v2422_v36 }
 0x776   :  { %v2431_v3 = vsel %vm2428_vm5, %v2430_v43, %v2426_v37 }
 0x777   :  { %v2464_v12 = vmul.f32 %v2431_v3, %v2379_v22 }
 0x779   :  { %2502 = vmatmul.f32.gmra.mxu3 %v2464_v12 }
 0x7a7   :  { %v2352_v31 = vpop.f32.mrf.mxu0 }
 0x7b2   :  { %v2355_v19 = vpop.f32.mrf.mxu0 }
 0x7b7   :  { %v2381_v54 = vpop.f32.mrf.mxu1 }
 0x7b8   :  { %v2382_v61 = vadd.f32 %v2381_v54, %v2352_v31 }
 0x7ba   :  { %v2662_v6 = vmul.f32 -1.442695, %v2382_v61 }
 0x7bc   :  { %2968 = vpow2.f32 %v2662_v6 }
 0x7bf   :  { %v2384_v11 = vpop.f32.mrf.mxu1 }
 0x7c0   :  { %v2385_v38 = vadd.f32 %v2384_v11, %v2355_v19 }
 0x7c2   :  { %v2969_v14 = vpop.eup %2968  ;;  %v2663_v39 = vmul.f32 -1.442695, %v2385_v38 }
 0x7c3   :  { %v2401_v44 = vadd.f32 1.0, %v2969_v14 }
 0x7c4   :  { %2970 = vpow2.f32 %v2663_v39 }
 0x7c5   :  { %2972 = vrcp.f32 %v2401_v44  ;;  %v2444_v30 = vand.u32 2147483648, %v2401_v44  ;;  %v2442_v35 = vand.u32 2147483647, %v2401_v44  ;;  %vm2438_vm10 = vweird.f32 %v2401_v44 }
 0x7c7   :  { %v2445_v34 = vor.u32 1.1754944e-38, %v2444_v30  ;;  %vm2443_vm0 = vcmp.eq.f32.partialorder %v2442_v35, 8.507059e+37 }
 0x7ca   :  { %v2971_v27 = vpop.eup %2970 }
 0x7cb   :  { %v2973_v62 = vpop.eup %2972  ;;  %v2402_v20 = vadd.f32 1.0, %v2971_v27 }
 0x7cc   :  { %v2434_v32 = vmul.f32 %v2973_v62, %v2401_v44  ;;  %vm2439_vm14 = vweird.f32 %v2973_v62 }
 0x7cd   :  { %2974 = vrcp.f32 %v2402_v20  ;;  %vm2440_vm12 = vmor %vm2438_vm10, %vm2439_vm14  ;;  %v2459_v10 = vand.u32 2147483648, %v2402_v20  ;;  %v2457_v59 = vand.u32 2147483647, %v2402_v20  ;;  %vm2453_vm13 = vweird.f32 %v2402_v20 }
 0x7ce   :  { %v2435_v60 = vsub.f32 1.0, %v2434_v32 }
 0x7cf   :  { %v2460_v15 = vor.u32 1.1754944e-38, %v2459_v10  ;;  %vm2458_vm7 = vcmp.eq.f32.partialorder %v2457_v59, 8.507059e+37 }
 0x7d0   :  { %v2436_v56 = vmul.f32 %v2973_v62, %v2435_v60 }
 0x7d2   :  { %v2437_v9 = vadd.f32 %v2973_v62, %v2436_v56 }
 0x7d3   :  { %v2975_v50 = vpop.eup %2974 }
 0x7d4   :  { %v2441_v55 = vsel %vm2440_vm12, %v2973_v62, %v2437_v9  ;;  %v2449_v26 = vmul.f32 %v2975_v50, %v2402_v20  ;;  %vm2454_vm9 = vweird.f32 %v2975_v50 }
 0x7d5   :  { %v2446_v58 = vsel %vm2443_vm0, %v2445_v34, %v2441_v55  ;;  %vm2455_vm11 = vmor %vm2453_vm13, %vm2454_vm9 }
 0x7d6   :  { %v2465_v4 = vmul.f32 %v2446_v58, %v2382_v61  ;;  %v2450_v45 = vsub.f32 1.0, %v2449_v26 }
 0x7d8   :  { %2505 = vmatmul.f32.gmra.mxu3 %v2465_v4  ;;  %v2451_v40 = vmul.f32 %v2975_v50, %v2450_v45 }
 0x7da   :  { %v2452_v2 = vadd.f32 %v2975_v50, %v2451_v40 }
 0x7dc   :  { %v2456_v23 = vsel %vm2455_vm11, %v2975_v50, %v2452_v2 }
 0x7dd   :  { %v2461_v21 = vsel %vm2458_vm7, %v2460_v15, %v2456_v23 }
 0x7de   :  { %v2466_v22 = vmul.f32 %v2461_v21, %v2385_v38 }
 0x7e0   :  { %2508 = vmatmul.f32.gmra.mxu3 %v2466_v22 }
 0x7f4   :  { %v2500_v33 = vpop.f32.mrf.mxu3 }
 0x7f5   :  { %2512 = vst.msk [vmem:[#allocation2] sm:$0xff] %vm4855_vm1, %v2500_v33 }
 0x7fc   :  { %v2503_v49 = vpop.f32.mrf.mxu3 }
 0x7fd   :  { %2513 = vst.msk [vmem:[#allocation2 + $0x8] sm:$0xff] %vm4856_vm15, %v2503_v49 }
 0x85b   :  { %v2506_v0 = vpop.f32.mrf.mxu3 }
 0x85c   :  { %2514 = vst.msk [vmem:[#allocation2 + $0x10] sm:$0xff] %vm4857_vm6, %v2506_v0 }
 0x863   :  { %v2509_v13 = vpop.f32.mrf.mxu3 }
 0x864   :  { %2515 = vst.msk [vmem:[#allocation2 + $0x18] sm:$0xff] %vm4858_vm4, %v2509_v13 }
 0x865   :  { %2528 = dma.vmem_to_hbm [thread:$0]  %s2521_s23, 512, %s2523_s0, [#allocation3], %s3012_s26, %s3012_s26, %s3013_s27  }
 0x866   :  { %3000 = dma.done.wait [#allocation3], 512  }
 0x867   :  { %3001 = vsyncadd [#allocation3], 4294966784 }
 0x868   :  { %2533 = vsyncpa [#allocation3], 1 }

</bundles_post_ra>
